<compile_context>
chip_gen: v5e
topology: v5e:2x2
jax: 0.10.0
libtpu: 0.0.40
codegen_flags: <defaults>
</compile_context>

<pallas_src>
import jax
import jax.numpy as jnp
from jax.experimental import pallas as pl
from jax.experimental.pallas import tpu as pltpu

# ----------------------------- problem sizes --------------------------------
A = 8                     # max atoms per molecule   (= params['conv1d_in'])
MAX_DEGREE = 4            # params['max_degree']
FA = 16                   # params['num_atom_features']
FB = 8                    # params['num_bond_features']
GCW = 32                  # params['graph_conv_width'] (all three equal)
NDEG_W = MAX_DEGREE * GCW                    # 128
COUT = 16                 # params['conv1d_out']
C1, C2 = 16, 16           # params['conv1d_dist_out']
POOL = 2                  # params['pool_size']
OUT_POOL = (C2 - POOL) // POOL + 1           # 8
D1, D2, D3 = 64, 32, 16   # params['dense_size']

TILE = 8                  # molecule pairs processed per grid step
MOL_T = 2 * TILE          # molecules per step (both siamese branches)
NA_T = MOL_T * A          # atom rows per step = 128

# ------------------------- packed weight-slab layout -------------------------
OFF_WA1 = 0
OFF_WB1 = OFF_WA1 + FA            # 16
OFF_WA2 = OFF_WB1 + FB            # 24
OFF_WB2 = OFF_WA2 + GCW           # 56
OFF_WA3 = OFF_WB2 + FB            # 64
OFF_WB3 = OFF_WA3 + GCW           # 96
OFF_CWBD = OFF_WB3 + FB           # 104  encoder conv (block-diag, MOL_T blocks)
OFF_Q1 = OFF_CWBD + MOL_T * COUT  # 360  dist conv1 (block-diag, TILE blocks)
OFF_Q2 = OFF_Q1 + TILE * C1       # 488  dist conv2 (block-diag + pool-permuted)
OFF_D2W = OFF_Q2 + TILE * C2      # 616
OFF_D3W = OFF_D2W + D1            # 680
OFF_GW = OFF_D3W + D2             # 712
OFF_VEC = OFF_GW + D3             # 728  16 single-row vectors (biases / BN affines)
PACK_ROWS = OFF_VEC + 16          # 744

# vector-row indices inside the VEC block
V_GB1, V_GB2, V_GB3 = 0, 1, 2     # graph-layer per-degree biases (BN-scale folded)
V_GT1, V_GT2, V_GT3 = 3, 4, 5     # graph-layer BN shifts
V_ES, V_ET = 6, 7                 # encoder bn4 scale / shift (per length pos)
V_1S, V_1T = 8, 9                 # dist bn1 scale / shift
V_2S, V_2T = 10, 11               # dist bn2 scale / shift
V_D1B, V_D2B, V_D3B, V_GB = 12, 13, 14, 15


# ------------------------------- fused kernel --------------------------------
def _siamese_kernel(a1_ref, b1_ref, e1_ref, a2_ref, b2_ref, e2_ref,
                    pack_ref, w1cat_ref, out_ref):
    """Entire deepSIBA siamese forward for TILE pairs; everything VMEM-resident."""
    f32 = jnp.float32

    def wmat(off, rows, cols=128):                 # static sub-view of weight slab
        return pack_ref[pl.ds(off, rows), pl.ds(0, cols)]

    def vrow(i, cols):                             # single packed vector row
        return pack_ref[pl.ds(OFF_VEC + i, 1), pl.ds(0, cols)]

    def pattern(rows, cols, fn):                   # iota-generated 0/1 matrix
        r = jax.lax.broadcasted_iota(jnp.int32, (rows, cols), 0)
        c = jax.lax.broadcasted_iota(jnp.int32, (rows, cols), 1)
        return fn(r, c).astype(f32)

    # ---- fused graph preprocessing: adjacency (+self), degree mask, bond sum ----
    atoms = jnp.concatenate([a1_ref[...], a2_ref[...]], axis=0)      # (NA_T, FA)
    bonds = jnp.concatenate([b1_ref[...], b2_ref[...]], axis=0)      # (NA_T, 4*FB)
    edges = jnp.concatenate([e1_ref[...], e2_ref[...]], axis=0)      # (NA_T, 4) i32

    col2 = jax.lax.broadcasted_iota(jnp.int32, (NA_T, NA_T), 1)
    adj = pattern(NA_T, NA_T, lambda r, c: r == c)                   # self loops
    mol_base = (jax.lax.broadcasted_iota(jnp.int32, (NA_T, MAX_DEGREE), 0) >> 3) << 3
    valid = edges >= 0
    abs_e = jnp.where(valid, edges + mol_base, -1)                   # global atom idx
    for d in range(MAX_DEGREE):                                      # 4 cheap compares
        adj = adj + (col2 == abs_e[:, d:d + 1]).astype(f32)
    degree = jnp.sum(valid.astype(jnp.int32), axis=1, keepdims=True) # (NA_T, 1)
    # degree one-hot repeated per output feature (deg >= MAX_DEGREE -> zero row,
    # matching the keras NeuralGraphHidden convention)
    dcol = jax.lax.broadcasted_iota(jnp.int32, (NA_T, NDEG_W), 1) >> 5   # // GCW
    dmw = (dcol == degree).astype(f32)                               # (NA_T, 128)

    foldb = pattern(MAX_DEGREE * FB, FB, lambda r, c: (r & (FB - 1)) == c)
    sbond = jnp.dot(bonds, foldb, preferred_element_type=f32)        # (NA_T, FB)
    fold4 = pattern(NDEG_W, GCW, lambda r, c: (r & (GCW - 1)) == c)  # degree fold

    # ---- 3x NeuralGraphHidden + BN(eval, scale folded) + ReLU ----
    def graph_layer(x, off_wa, rows_wa, off_wb, bias_i, shift_i):
        sa = jnp.dot(adj, x, preferred_element_type=f32)             # self+neigh sum
        h = (jnp.dot(sa, wmat(off_wa, rows_wa), preferred_element_type=f32)
             + jnp.dot(sbond, wmat(off_wb, FB), preferred_element_type=f32)
             + vrow(bias_i, NDEG_W))                                 # (NA_T, 128)
        y = jnp.dot(h * dmw, fold4, preferred_element_type=f32)      # degree select+sum
        return jnp.maximum(y + vrow(shift_i, GCW), 0.0)              # BN shift + ReLU

    x = graph_layer(atoms, OFF_WA1, FA, OFF_WB1, V_GB1, V_GT1)
    x = graph_layer(x, OFF_WA2, GCW, OFF_WB2, V_GB2, V_GT2)
    x = graph_layer(x, OFF_WA3, GCW, OFF_WB3, V_GB3, V_GT3)          # (NA_T, 32)

    # ---- encoder 1x1 Conv1d over atoms (block-diag) + bn4 + ReLU ----
    enc = jnp.dot(wmat(OFF_CWBD, MOL_T * COUT), x, preferred_element_type=f32)
    enc = jnp.maximum(enc * vrow(V_ES, GCW) + vrow(V_ET, GCW), 0.0)  # (256, 32)

    # ---- siamese L1 distance (branch-major rows: first half vs second half) ----
    hh = TILE * COUT                                                 # 128
    l1 = jnp.abs(enc[:hh] - enc[hh:])                                # (128, 32)

    # ---- distance head: conv1 / conv2 (block-diag per pair), per-length BN, ReLU ----
    z = jnp.dot(wmat(OFF_Q1, TILE * C1), l1, preferred_element_type=f32)
    z = jnp.maximum(z * vrow(V_1S, GCW) + vrow(V_1T, GCW), 0.0)
    z = jnp.dot(wmat(OFF_Q2, TILE * C2), z, preferred_element_type=f32)  # rows pre-permuted
    z = jnp.maximum(z * vrow(V_2S, GCW) + vrow(V_2T, GCW), 0.0)      # (128, 32)

    # ---- MaxPool1d(2) over channels == max of the two permuted halves ----
    hp = TILE * OUT_POOL                                             # 64
    zp = jnp.maximum(z[:hp], z[hp:])                                 # (64, 32); bn3 folded

    # ---- flatten + dense1 (bn3 & mlp-bn4 folded) via masked MXU matmuls ----
    g = jnp.dot(zp, w1cat_ref[...], preferred_element_type=f32)      # (64, 8*D1)
    sel = pattern(hp, OUT_POOL * D1,
                  lambda r, c: (r & (OUT_POOL - 1)) == (c >> 6))     # c // D1
    esum = pattern(TILE, hp, lambda r, c: r == (c >> 3))             # sum rows per pair
    fold8 = pattern(OUT_POOL * D1, D1, lambda r, c: (r & (D1 - 1)) == c)
    r1 = jnp.dot(esum, g * sel, preferred_element_type=f32)          # (TILE, 8*D1)
    h = jnp.dot(r1, fold8, preferred_element_type=f32) + vrow(V_D1B, D1)
    h = jnp.maximum(h, 0.0)                                          # (TILE, 64)

    # ---- dense2 / dense3 (bn5 / bn6 folded) + ReLU ----
    h = jnp.maximum(jnp.dot(h, wmat(OFF_D2W, D1, D2),
                            preferred_element_type=f32) + vrow(V_D2B, D2), 0.0)
    h = jnp.maximum(jnp.dot(h, wmat(OFF_D3W, D2, D3),
                            preferred_element_type=f32) + vrow(V_D3B, D3), 0.0)

    # ---- Gaussian head: [mu, softplus(sigma) + 1e-6] (stable softplus) ----
    raw = jnp.dot(h, wmat(OFF_GW, D3, 2), preferred_element_type=f32) + vrow(V_GB, 2)
    sp = jnp.maximum(raw, 0.0) + jnp.log(1.0 + jnp.exp(-jnp.abs(raw)))
    col = jax.lax.broadcasted_iota(jnp.int32, raw.shape, 1)
    out_ref[...] = jnp.where(col == 1, sp + 1e-6, raw)               # (TILE, 2)


# --------------------------------- model glue --------------------------------
def siamese_forward(pack128, w1cat, atoms1, bonds1, edges1, atoms2, bonds2, edges2):
    npairs = atoms1.shape[0]
    assert npairs % TILE == 0, "demo requires npairs to be a multiple of TILE"
    nsteps = npairs // TILE

    # free reshapes only -- all other prep is fused in-kernel or hoisted to init
    a1 = atoms1.reshape(npairs * A, FA)
    a2 = atoms2.reshape(npairs * A, FA)
    b1 = bonds1.reshape(npairs * A, MAX_DEGREE * FB)
    b2 = bonds2.reshape(npairs * A, MAX_DEGREE * FB)
    e1 = edges1.reshape(npairs * A, MAX_DEGREE)
    e2 = edges2.reshape(npairs * A, MAX_DEGREE)

    row_map = lambda s: (s, 0)
    const_map = lambda s: (0, 0)                    # resident weights (fetched once)
    in_specs = [
        pl.BlockSpec((TILE * A, FA), row_map),
        pl.BlockSpec((TILE * A, MAX_DEGREE * FB), row_map),
        pl.BlockSpec((TILE * A, MAX_DEGREE), row_map),
        pl.BlockSpec((TILE * A, FA), row_map),
        pl.BlockSpec((TILE * A, MAX_DEGREE * FB), row_map),
        pl.BlockSpec((TILE * A, MAX_DEGREE), row_map),
        pl.BlockSpec((PACK_ROWS, 128), const_map),
        pl.BlockSpec((GCW, OUT_POOL * D1), const_map),
    ]
    return pl.pallas_call(
        _siamese_kernel,
        grid=(nsteps,),
        in_specs=in_specs,
        out_specs=pl.BlockSpec((TILE, 2), row_map),
        out_shape=jax.ShapeDtypeStruct((npairs, 2), jnp.float32),
        compiler_params=pltpu.CompilerParams(
            dimension_semantics=("parallel",),          # shards across v7x cores
            vmem_limit_bytes=32 * 1024 * 1024),
    )(a1, b1, e1, a2, b2, e2, pack128, w1cat)


# ------------------------- parameter init + packing --------------------------
def _xavier_normal(key, shape, gain=1.0):
    fan_in, fan_out = shape[-2], shape[-1]
    std = gain * (2.0 / (fan_in + fan_out)) ** 0.5
    return (std * jax.random.normal(key, shape)).astype(jnp.float32)


def _bn_affine(n, eps=1e-5):
    # fresh BatchNorm1d in eval(): gamma=1, beta=0, running_mean=0, running_var=1
    scale = jnp.full((n,), 1.0 / (1.0 + eps) ** 0.5, jnp.float32)
    shift = jnp.zeros((n,), jnp.float32)
    return scale, shift


def init_packed_params(key):
    """Build all weights, fold eval-mode BN, and pack into two buffers (hoisted)."""
    keys = iter(jax.random.split(key, 24))
    g_relu = 2.0 ** 0.5

    def padw(m):
        m = jnp.asarray(m, jnp.float32)
        return jnp.pad(m, ((0, 0), (0, 128 - m.shape[1])))

    def vec_row(v):
        return padw(jnp.asarray(v, jnp.float32).reshape(1, -1))

    blocks, vecs = [], [None] * 16

    # --- three NeuralGraphHidden layers (BN scale folded into weights) ---
    fins = (FA, GCW, GCW)
    for l in range(3):
        fin = fins[l]
        w = _xavier_normal(next(keys), (MAX_DEGREE, fin + FB, GCW))
        b = (0.01 * jax.random.normal(next(keys), (MAX_DEGREE, GCW))).astype(jnp.float32)
        s, t = _bn_affine(GCW)
        wf = w * s[None, None, :]
        wa = jnp.transpose(wf[:, :fin, :], (1, 0, 2)).reshape(fin, NDEG_W)
        wb = jnp.transpose(wf[:, fin:, :], (1, 0, 2)).reshape(FB, NDEG_W)
        blocks += [wa, wb]
        vecs[V_GB1 + l] = vec_row((b * s[None, :]).reshape(1, NDEG_W))
        vecs[V_GT1 + l] = vec_row(t)

    # --- encoder 1x1 Conv1d (bias=False) as block-diag over MOL_T molecules ---
    conv_w = _xavier_normal(next(keys), (COUT, A))
    blocks.append(jnp.kron(jnp.eye(MOL_T, dtype=jnp.float32), conv_w))   # (256, 128)
    s4e, t4e = _bn_affine(GCW)
    vecs[V_ES], vecs[V_ET] = vec_row(s4e), vec_row(t4e)

    # --- distance-head conv1 / conv2 (block-diag per pair) ---
    conv1_w = _xavier_normal(next(keys), (C1, COUT), g_relu)
    blocks.append(jnp.kron(jnp.eye(TILE, dtype=jnp.float32), conv1_w))   # (128, 128)
    s1d, t1d = _bn_affine(GCW)
    vecs[V_1S], vecs[V_1T] = vec_row(s1d), vec_row(t1d)

    conv2_w = _xavier_normal(next(keys), (C2, C1), g_relu)
    q2bd = jnp.kron(jnp.eye(TILE, dtype=jnp.float32), conv2_w)
    # pool-permutation: even output channels first, then odd, per pair ->
    # MaxPool1d(2) over channels becomes max(z[:64], z[64:]) in-kernel.
    perm = [p * C2 + 2 * i + par for par in (0, 1)
            for p in range(TILE) for i in range(OUT_POOL)]
    blocks.append(q2bd[jnp.asarray(perm), :])                            # (128, 128)
    s2d, t2d = _bn_affine(GCW)
    vecs[V_2S], vecs[V_2T] = vec_row(s2d), vec_row(t2d)

    # --- dense1 with bn3 (pre) and mlp bn4 (post) folded, rearranged for the
    #     masked-matmul flatten (nn.Flatten fold) ---
    d1_w = _xavier_normal(next(keys), (OUT_POOL * GCW, D1), g_relu)
    d1_b = jnp.zeros((D1,), jnp.float32)
    s4m, t4m = _bn_affine(D1)
    w1p = d1_w * s4m[None, :]
    b1p = d1_b * s4m + t4m
    s3, t3 = _bn_affine(GCW)
    w1pp = w1p * jnp.tile(s3, OUT_POOL)[:, None]
    b1pp = b1p + jnp.tile(t3, OUT_POOL) @ w1p
    w1cat = jnp.transpose(w1pp.reshape(OUT_POOL, GCW, D1),
                          (1, 0, 2)).reshape(GCW, OUT_POOL * D1)         # (32, 512)
    vecs[V_D1B] = vec_row(b1pp)

    # --- dense2 / dense3 (bn5 / bn6 folded), Gaussian head ---
    d2_w = _xavier_normal(next(keys), (D1, D2), g_relu)
    s5, t5 = _bn_affine(D2)
    blocks.append(padw(d2_w * s5[None, :]))
    vecs[V_D2B] = vec_row(jnp.zeros((D2,), jnp.float32) * s5 + t5)

    d3_w = _xavier_normal(next(keys), (D2, D3), g_relu)
    s6, t6 = _bn_affine(D3)
    blocks.append(padw(d3_w * s6[None, :]))
    vecs[V_D3B] = vec_row(jnp.zeros((D3,), jnp.float32) * s6 + t6)

    g_w = _xavier_normal(next(keys), (D3, 2))    # col 0 -> mu, col 1 -> sigma
    blocks.append(padw(g_w))
    vecs[V_GB] = vec_row(jnp.zeros((2,), jnp.float32))

    pack128 = jnp.concatenate(blocks + vecs, axis=0)
    assert pack128.shape == (PACK_ROWS, 128), pack128.shape
    return pack128, w1cat


# ------------------------------------ main -----------------------------------
if __name__ == "__main__":
    NPAIRS = 16                                # batched pairs (2 grid steps of 8)
    key = jax.random.PRNGKey(0)
    kp, ka1, kb1, ke1, ka2, kb2, ke2 = jax.random.split(key, 7)
    pack128, w1cat = init_packed_params(kp)    # hoisted: built once, reused

    def make_graph(ka, kb, ke):
        atoms = jax.random.normal(ka, (NPAIRS, A, FA), dtype=jnp.float32)
        bonds = jax.random.normal(kb, (NPAIRS, A, MAX_DEGREE, FB), dtype=jnp.float32)
        e = jax.random.randint(ke, (NPAIRS, A, MAX_DEGREE), -3, A)
        edges = jnp.where(e < 0, -1, e).astype(jnp.int32)
        return atoms, bonds, edges

    atoms1, bonds1, edges1 = make_graph(ka1, kb1, ke1)
    atoms2, bonds2, edges2 = make_graph(ka2, kb2, ke2)

    fwd = jax.jit(siamese_forward)
    out = fwd(pack128, w1cat, atoms1, bonds1, edges1, atoms2, bonds2, edges2)
    out = jax.block_until_ready(out)
    assert out.shape == (NPAIRS, 2)
    assert bool(jnp.all(jnp.isfinite(out)))
    print("KERNEL_OK")
</pallas_src>

<mosaic_0001>
module attributes {stable_mosaic.version = 11 : i64} {
  func.func @_siamese_kernel(%arg0: i32, %arg1: memref<64x16xf32, #tpu.memory_space<vmem>>, %arg2: memref<64x32xf32, #tpu.memory_space<vmem>>, %arg3: memref<64x4xi32, #tpu.memory_space<vmem>>, %arg4: memref<64x16xf32, #tpu.memory_space<vmem>>, %arg5: memref<64x32xf32, #tpu.memory_space<vmem>>, %arg6: memref<64x4xi32, #tpu.memory_space<vmem>>, %arg7: memref<744x128xf32, #tpu.memory_space<vmem>>, %arg8: memref<32x512xf32, #tpu.memory_space<vmem>>, %arg9: memref<8x2xf32, #tpu.memory_space<vmem>>) attributes {dimension_semantics = [#tpu.dimension_semantics<parallel>], iteration_bounds = array<i64: 2>, scalar_prefetch = 0 : i64, scratch_operands = 0 : i64, tpu.core_type = #tpu.core_type<tc>, window_params = [{transform_indices = @transform_0, window_bounds = array<i64: 64, 16>}, {transform_indices = @transform_1, window_bounds = array<i64: 64, 32>}, {transform_indices = @transform_2, window_bounds = array<i64: 64, 4>}, {transform_indices = @transform_3, window_bounds = array<i64: 64, 16>}, {transform_indices = @transform_4, window_bounds = array<i64: 64, 32>}, {transform_indices = @transform_5, window_bounds = array<i64: 64, 4>}, {pipeline_mode = #tpu.pipeline_mode<synchronous>, transform_indices = @transform_6, window_bounds = array<i64: 744, 128>}, {pipeline_mode = #tpu.pipeline_mode<synchronous>, transform_indices = @transform_7, window_bounds = array<i64: 32, 512>}, {transform_indices = @transform_8, window_bounds = array<i64: 8, 2>}]} {
    %c0 = arith.constant 0 : index
    %c0_0 = arith.constant 0 : index
    %0 = vector.load %arg1[%c0, %c0_0] : memref<64x16xf32, #tpu.memory_space<vmem>>, vector<64x16xf32>
    %c0_1 = arith.constant 0 : index
    %c0_2 = arith.constant 0 : index
    %1 = vector.load %arg4[%c0_1, %c0_2] : memref<64x16xf32, #tpu.memory_space<vmem>>, vector<64x16xf32>
    %2 = tpu.concatenate %0, %1 in 0 : vector<64x16xf32>, vector<64x16xf32> -> vector<128x16xf32>
    %c0_3 = arith.constant 0 : index
    %c0_4 = arith.constant 0 : index
    %3 = vector.load %arg2[%c0_3, %c0_4] : memref<64x32xf32, #tpu.memory_space<vmem>>, vector<64x32xf32>
    %c0_5 = arith.constant 0 : index
    %c0_6 = arith.constant 0 : index
    %4 = vector.load %arg5[%c0_5, %c0_6] : memref<64x32xf32, #tpu.memory_space<vmem>>, vector<64x32xf32>
    %5 = tpu.concatenate %3, %4 in 0 : vector<64x32xf32>, vector<64x32xf32> -> vector<128x32xf32>
    %c0_7 = arith.constant 0 : index
    %c0_8 = arith.constant 0 : index
    %6 = vector.load %arg3[%c0_7, %c0_8] : memref<64x4xi32, #tpu.memory_space<vmem>>, vector<64x4xi32>
    %c0_9 = arith.constant 0 : index
    %c0_10 = arith.constant 0 : index
    %7 = vector.load %arg6[%c0_9, %c0_10] : memref<64x4xi32, #tpu.memory_space<vmem>>, vector<64x4xi32>
    %8 = tpu.concatenate %6, %7 in 0 : vector<64x4xi32>, vector<64x4xi32> -> vector<128x4xi32>
    %9 = tpu.iota {dimensions = array<i32: 1>} : vector<128x128xi32>
    %10 = tpu.iota {dimensions = array<i32: 0>} : vector<128x128xi32>
    %11 = tpu.iota {dimensions = array<i32: 1>} : vector<128x128xi32>
    %12 = arith.cmpi eq, %10, %11 : vector<128x128xi32>
    %13 = arith.extui %12 : vector<128x128xi1> to vector<128x128xi32>
    %14 = arith.sitofp %13 : vector<128x128xi32> to vector<128x128xf32>
    %15 = tpu.iota {dimensions = array<i32: 0>} : vector<128x4xi32>
    %c3_i32 = arith.constant 3 : i32
    %16 = vector.broadcast %c3_i32 : i32 to vector<128x4xi32>
    %17 = arith.shrsi %15, %16 : vector<128x4xi32>
    %c3_i32_11 = arith.constant 3 : i32
    %18 = vector.broadcast %c3_i32_11 : i32 to vector<128x4xi32>
    %19 = arith.shli %17, %18 : vector<128x4xi32>
    %c0_i32 = arith.constant 0 : i32
    %20 = vector.broadcast %c0_i32 : i32 to vector<128x4xi32>
    %21 = arith.cmpi sge, %8, %20 : vector<128x4xi32>
    %22 = arith.addi %8, %19 : vector<128x4xi32>
    %c-1_i32 = arith.constant -1 : i32
    %23 = vector.broadcast %c-1_i32 : i32 to vector<128x4xi32>
    %24 = arith.select %21, %22, %23 : vector<128x4xi1>, vector<128x4xi32>
    %25 = vector.extract_strided_slice %24 {offsets = [0, 0], sizes = [128, 1], strides = [1, 1]} : vector<128x4xi32> to vector<128x1xi32>
    %26 = vector.broadcast %25 : vector<128x1xi32> to vector<128x128xi32>
    %27 = arith.cmpi eq, %9, %26 : vector<128x128xi32>
    %28 = arith.extui %27 : vector<128x128xi1> to vector<128x128xi32>
    %29 = arith.sitofp %28 : vector<128x128xi32> to vector<128x128xf32>
    %30 = arith.addf %14, %29 : vector<128x128xf32>
    %31 = vector.extract_strided_slice %24 {offsets = [0, 1], sizes = [128, 1], strides = [1, 1]} : vector<128x4xi32> to vector<128x1xi32>
    %32 = vector.broadcast %31 : vector<128x1xi32> to vector<128x128xi32>
    %33 = arith.cmpi eq, %9, %32 : vector<128x128xi32>
    %34 = arith.extui %33 : vector<128x128xi1> to vector<128x128xi32>
    %35 = arith.sitofp %34 : vector<128x128xi32> to vector<128x128xf32>
    %36 = arith.addf %30, %35 : vector<128x128xf32>
    %37 = vector.extract_strided_slice %24 {offsets = [0, 2], sizes = [128, 1], strides = [1, 1]} : vector<128x4xi32> to vector<128x1xi32>
    %38 = vector.broadcast %37 : vector<128x1xi32> to vector<128x128xi32>
    %39 = arith.cmpi eq, %9, %38 : vector<128x128xi32>
    %40 = arith.extui %39 : vector<128x128xi1> to vector<128x128xi32>
    %41 = arith.sitofp %40 : vector<128x128xi32> to vector<128x128xf32>
    %42 = arith.addf %36, %41 : vector<128x128xf32>
    %43 = vector.extract_strided_slice %24 {offsets = [0, 3], sizes = [128, 1], strides = [1, 1]} : vector<128x4xi32> to vector<128x1xi32>
    %44 = vector.broadcast %43 : vector<128x1xi32> to vector<128x128xi32>
    %45 = arith.cmpi eq, %9, %44 : vector<128x128xi32>
    %46 = arith.extui %45 : vector<128x128xi1> to vector<128x128xi32>
    %47 = arith.sitofp %46 : vector<128x128xi32> to vector<128x128xf32>
    %48 = arith.addf %42, %47 : vector<128x128xf32>
    %49 = arith.extui %21 : vector<128x4xi1> to vector<128x4xi32>
    %cst = arith.constant dense<0> : vector<128xi32>
    %50 = vector.multi_reduction <add>, %49, %cst [1] : vector<128x4xi32> to vector<128xi32>
    %51 = vector.shape_cast %50 : vector<128xi32> to vector<128x1xi32>
    %52 = tpu.iota {dimensions = array<i32: 1>} : vector<128x128xi32>
    %c5_i32 = arith.constant 5 : i32
    %53 = vector.broadcast %c5_i32 : i32 to vector<128x128xi32>
    %54 = arith.shrsi %52, %53 : vector<128x128xi32>
    %55 = vector.broadcast %51 : vector<128x1xi32> to vector<128x128xi32>
    %56 = arith.cmpi eq, %54, %55 : vector<128x128xi32>
    %57 = arith.extui %56 : vector<128x128xi1> to vector<128x128xi32>
    %58 = arith.sitofp %57 : vector<128x128xi32> to vector<128x128xf32>
    %59 = tpu.iota {dimensions = array<i32: 0>} : vector<32x8xi32>
    %60 = tpu.iota {dimensions = array<i32: 1>} : vector<32x8xi32>
    %c7_i32 = arith.constant 7 : i32
    %61 = vector.broadcast %c7_i32 : i32 to vector<32x8xi32>
    %62 = arith.andi %59, %61 : vector<32x8xi32>
    %63 = arith.cmpi eq, %62, %60 : vector<32x8xi32>
    %64 = arith.extui %63 : vector<32x8xi1> to vector<32x8xi32>
    %65 = arith.sitofp %64 : vector<32x8xi32> to vector<32x8xf32>
    %cst_12 = arith.constant dense<0.000000e+00> : vector<128x8xf32>
    %66 = tpu.matmul %5, %65, %cst_12 {dimension_numbers = #tpu.dot_dimension_numbers<[1], [0], [0], [1], [0, 0, 1, 1], [], []>} : vector<128x32xf32>, vector<32x8xf32>, vector<128x8xf32> -> vector<128x8xf32>
    %67 = tpu.iota {dimensions = array<i32: 0>} : vector<128x32xi32>
    %68 = tpu.iota {dimensions = array<i32: 1>} : vector<128x32xi32>
    %c31_i32 = arith.constant 31 : i32
    %69 = vector.broadcast %c31_i32 : i32 to vector<128x32xi32>
    %70 = arith.andi %67, %69 : vector<128x32xi32>
    %71 = arith.cmpi eq, %70, %68 : vector<128x32xi32>
    %72 = arith.extui %71 : vector<128x32xi1> to vector<128x32xi32>
    %73 = arith.sitofp %72 : vector<128x32xi32> to vector<128x32xf32>
    %cst_13 = arith.constant dense<0.000000e+00> : vector<128x16xf32>
    %74 = tpu.matmul %48, %2, %cst_13 {dimension_numbers = #tpu.dot_dimension_numbers<[1], [0], [0], [1], [0, 0, 1, 1], [], []>} : vector<128x128xf32>, vector<128x16xf32>, vector<128x16xf32> -> vector<128x16xf32>
    %c0_14 = arith.constant 0 : index
    %c0_15 = arith.constant 0 : index
    %75 = vector.load %arg7[%c0_14, %c0_15] : memref<744x128xf32, #tpu.memory_space<vmem>>, vector<16x128xf32>
    %cst_16 = arith.constant dense<0.000000e+00> : vector<128x128xf32>
    %76 = tpu.matmul %74, %75, %cst_16 {dimension_numbers = #tpu.dot_dimension_numbers<[1], [0], [0], [1], [0, 0, 1, 1], [], []>} : vector<128x16xf32>, vector<16x128xf32>, vector<128x128xf32> -> vector<128x128xf32>
    %c16 = arith.constant 16 : index
    %c0_17 = arith.constant 0 : index
    %77 = vector.load %arg7[%c16, %c0_17] : memref<744x128xf32, #tpu.memory_space<vmem>>, vector<8x128xf32>
    %cst_18 = arith.constant dense<0.000000e+00> : vector<128x128xf32>
    %78 = tpu.matmul %66, %77, %cst_18 {dimension_numbers = #tpu.dot_dimension_numbers<[1], [0], [0], [1], [0, 0, 1, 1], [], []>} : vector<128x8xf32>, vector<8x128xf32>, vector<128x128xf32> -> vector<128x128xf32>
    %79 = arith.addf %76, %78 : vector<128x128xf32>
    %c728 = arith.constant 728 : index
    %c0_19 = arith.constant 0 : index
    %80 = vector.load %arg7[%c728, %c0_19] : memref<744x128xf32, #tpu.memory_space<vmem>>, vector<1x128xf32>
    %81 = vector.broadcast %80 : vector<1x128xf32> to vector<128x128xf32>
    %82 = arith.addf %79, %81 : vector<128x128xf32>
    %83 = arith.mulf %82, %58 : vector<128x128xf32>
    %cst_20 = arith.constant dense<0.000000e+00> : vector<128x32xf32>
    %84 = tpu.matmul %83, %73, %cst_20 {dimension_numbers = #tpu.dot_dimension_numbers<[1], [0], [0], [1], [0, 0, 1, 1], [], []>} : vector<128x128xf32>, vector<128x32xf32>, vector<128x32xf32> -> vector<128x32xf32>
    %c731 = arith.constant 731 : index
    %c0_21 = arith.constant 0 : index
    %85 = vector.load %arg7[%c731, %c0_21] : memref<744x128xf32, #tpu.memory_space<vmem>>, vector<1x32xf32>
    %86 = vector.broadcast %85 : vector<1x32xf32> to vector<128x32xf32>
    %87 = arith.addf %84, %86 : vector<128x32xf32>
    %cst_22 = arith.constant 0.000000e+00 : f32
    %88 = vector.broadcast %cst_22 : f32 to vector<128x32xf32>
    %89 = arith.maximumf %87, %88 : vector<128x32xf32>
    %cst_23 = arith.constant dense<0.000000e+00> : vector<128x32xf32>
    %90 = tpu.matmul %48, %89, %cst_23 {dimension_numbers = #tpu.dot_dimension_numbers<[1], [0], [0], [1], [0, 0, 1, 1], [], []>} : vector<128x128xf32>, vector<128x32xf32>, vector<128x32xf32> -> vector<128x32xf32>
    %c24 = arith.constant 24 : index
    %c0_24 = arith.constant 0 : index
    %91 = vector.load %arg7[%c24, %c0_24] : memref<744x128xf32, #tpu.memory_space<vmem>>, vector<32x128xf32>
    %cst_25 = arith.constant dense<0.000000e+00> : vector<128x128xf32>
    %92 = tpu.matmul %90, %91, %cst_25 {dimension_numbers = #tpu.dot_dimension_numbers<[1], [0], [0], [1], [0, 0, 1, 1], [], []>} : vector<128x32xf32>, vector<32x128xf32>, vector<128x128xf32> -> vector<128x128xf32>
    %c56 = arith.constant 56 : index
    %c0_26 = arith.constant 0 : index
    %93 = vector.load %arg7[%c56, %c0_26] : memref<744x128xf32, #tpu.memory_space<vmem>>, vector<8x128xf32>
    %cst_27 = arith.constant dense<0.000000e+00> : vector<128x128xf32>
    %94 = tpu.matmul %66, %93, %cst_27 {dimension_numbers = #tpu.dot_dimension_numbers<[1], [0], [0], [1], [0, 0, 1, 1], [], []>} : vector<128x8xf32>, vector<8x128xf32>, vector<128x128xf32> -> vector<128x128xf32>
    %95 = arith.addf %92, %94 : vector<128x128xf32>
    %c729 = arith.constant 729 : index
    %c0_28 = arith.constant 0 : index
    %96 = vector.load %arg7[%c729, %c0_28] : memref<744x128xf32, #tpu.memory_space<vmem>>, vector<1x128xf32>
    %97 = vector.broadcast %96 : vector<1x128xf32> to vector<128x128xf32>
    %98 = arith.addf %95, %97 : vector<128x128xf32>
    %99 = arith.mulf %98, %58 : vector<128x128xf32>
    %cst_29 = arith.constant dense<0.000000e+00> : vector<128x32xf32>
    %100 = tpu.matmul %99, %73, %cst_29 {dimension_numbers = #tpu.dot_dimension_numbers<[1], [0], [0], [1], [0, 0, 1, 1], [], []>} : vector<128x128xf32>, vector<128x32xf32>, vector<128x32xf32> -> vector<128x32xf32>
    %c732 = arith.constant 732 : index
    %c0_30 = arith.constant 0 : index
    %101 = vector.load %arg7[%c732, %c0_30] : memref<744x128xf32, #tpu.memory_space<vmem>>, vector<1x32xf32>
    %102 = vector.broadcast %101 : vector<1x32xf32> to vector<128x32xf32>
    %103 = arith.addf %100, %102 : vector<128x32xf32>
    %cst_31 = arith.constant 0.000000e+00 : f32
    %104 = vector.broadcast %cst_31 : f32 to vector<128x32xf32>
    %105 = arith.maximumf %103, %104 : vector<128x32xf32>
    %cst_32 = arith.constant dense<0.000000e+00> : vector<128x32xf32>
    %106 = tpu.matmul %48, %105, %cst_32 {dimension_numbers = #tpu.dot_dimension_numbers<[1], [0], [0], [1], [0, 0, 1, 1], [], []>} : vector<128x128xf32>, vector<128x32xf32>, vector<128x32xf32> -> vector<128x32xf32>
    %c64 = arith.constant 64 : index
    %c0_33 = arith.constant 0 : index
    %107 = vector.load %arg7[%c64, %c0_33] : memref<744x128xf32, #tpu.memory_space<vmem>>, vector<32x128xf32>
    %cst_34 = arith.constant dense<0.000000e+00> : vector<128x128xf32>
    %108 = tpu.matmul %106, %107, %cst_34 {dimension_numbers = #tpu.dot_dimension_numbers<[1], [0], [0], [1], [0, 0, 1, 1], [], []>} : vector<128x32xf32>, vector<32x128xf32>, vector<128x128xf32> -> vector<128x128xf32>
    %c96 = arith.constant 96 : index
    %c0_35 = arith.constant 0 : index
    %109 = vector.load %arg7[%c96, %c0_35] : memref<744x128xf32, #tpu.memory_space<vmem>>, vector<8x128xf32>
    %cst_36 = arith.constant dense<0.000000e+00> : vector<128x128xf32>
    %110 = tpu.matmul %66, %109, %cst_36 {dimension_numbers = #tpu.dot_dimension_numbers<[1], [0], [0], [1], [0, 0, 1, 1], [], []>} : vector<128x8xf32>, vector<8x128xf32>, vector<128x128xf32> -> vector<128x128xf32>
    %111 = arith.addf %108, %110 : vector<128x128xf32>
    %c730 = arith.constant 730 : index
    %c0_37 = arith.constant 0 : index
    %112 = vector.load %arg7[%c730, %c0_37] : memref<744x128xf32, #tpu.memory_space<vmem>>, vector<1x128xf32>
    %113 = vector.broadcast %112 : vector<1x128xf32> to vector<128x128xf32>
    %114 = arith.addf %111, %113 : vector<128x128xf32>
    %115 = arith.mulf %114, %58 : vector<128x128xf32>
    %cst_38 = arith.constant dense<0.000000e+00> : vector<128x32xf32>
    %116 = tpu.matmul %115, %73, %cst_38 {dimension_numbers = #tpu.dot_dimension_numbers<[1], [0], [0], [1], [0, 0, 1, 1], [], []>} : vector<128x128xf32>, vector<128x32xf32>, vector<128x32xf32> -> vector<128x32xf32>
    %c733 = arith.constant 733 : index
    %c0_39 = arith.constant 0 : index
    %117 = vector.load %arg7[%c733, %c0_39] : memref<744x128xf32, #tpu.memory_space<vmem>>, vector<1x32xf32>
    %118 = vector.broadcast %117 : vector<1x32xf32> to vector<128x32xf32>
    %119 = arith.addf %116, %118 : vector<128x32xf32>
    %cst_40 = arith.constant 0.000000e+00 : f32
    %120 = vector.broadcast %cst_40 : f32 to vector<128x32xf32>
    %121 = arith.maximumf %119, %120 : vector<128x32xf32>
    %c104 = arith.constant 104 : index
    %c0_41 = arith.constant 0 : index
    %122 = vector.load %arg7[%c104, %c0_41] : memref<744x128xf32, #tpu.memory_space<vmem>>, vector<256x128xf32>
    %cst_42 = arith.constant dense<0.000000e+00> : vector<256x32xf32>
    %123 = tpu.matmul %122, %121, %cst_42 {dimension_numbers = #tpu.dot_dimension_numbers<[1], [0], [0], [1], [0, 0, 1, 1], [], []>} : vector<256x128xf32>, vector<128x32xf32>, vector<256x32xf32> -> vector<256x32xf32>
    %c734 = arith.constant 734 : index
    %c0_43 = arith.constant 0 : index
    %124 = vector.load %arg7[%c734, %c0_43] : memref<744x128xf32, #tpu.memory_space<vmem>>, vector<1x32xf32>
    %125 = vector.broadcast %124 : vector<1x32xf32> to vector<256x32xf32>
    %126 = arith.mulf %123, %125 : vector<256x32xf32>
    %c735 = arith.constant 735 : index
    %c0_44 = arith.constant 0 : index
    %127 = vector.load %arg7[%c735, %c0_44] : memref<744x128xf32, #tpu.memory_space<vmem>>, vector<1x32xf32>
    %128 = vector.broadcast %127 : vector<1x32xf32> to vector<256x32xf32>
    %129 = arith.addf %126, %128 : vector<256x32xf32>
    %cst_45 = arith.constant 0.000000e+00 : f32
    %130 = vector.broadcast %cst_45 : f32 to vector<256x32xf32>
    %131 = arith.maximumf %129, %130 : vector<256x32xf32>
    %132 = vector.extract_strided_slice %131 {offsets = [0, 0], sizes = [128, 32], strides = [1, 1]} : vector<256x32xf32> to vector<128x32xf32>
    %133 = vector.extract_strided_slice %131 {offsets = [128, 0], sizes = [128, 32], strides = [1, 1]} : vector<256x32xf32> to vector<128x32xf32>
    %134 = arith.subf %132, %133 : vector<128x32xf32>
    %135 = math.absf %134 : vector<128x32xf32>
    %c360 = arith.constant 360 : index
    %c0_46 = arith.constant 0 : index
    %136 = vector.load %arg7[%c360, %c0_46] : memref<744x128xf32, #tpu.memory_space<vmem>>, vector<128x128xf32>
    %cst_47 = arith.constant dense<0.000000e+00> : vector<128x32xf32>
    %137 = tpu.matmul %136, %135, %cst_47 {dimension_numbers = #tpu.dot_dimension_numbers<[1], [0], [0], [1], [0, 0, 1, 1], [], []>} : vector<128x128xf32>, vector<128x32xf32>, vector<128x32xf32> -> vector<128x32xf32>
    %c736 = arith.constant 736 : index
    %c0_48 = arith.constant 0 : index
    %138 = vector.load %arg7[%c736, %c0_48] : memref<744x128xf32, #tpu.memory_space<vmem>>, vector<1x32xf32>
    %139 = vector.broadcast %138 : vector<1x32xf32> to vector<128x32xf32>
    %140 = arith.mulf %137, %139 : vector<128x32xf32>
    %c737 = arith.constant 737 : index
    %c0_49 = arith.constant 0 : index
    %141 = vector.load %arg7[%c737, %c0_49] : memref<744x128xf32, #tpu.memory_space<vmem>>, vector<1x32xf32>
    %142 = vector.broadcast %141 : vector<1x32xf32> to vector<128x32xf32>
    %143 = arith.addf %140, %142 : vector<128x32xf32>
    %cst_50 = arith.constant 0.000000e+00 : f32
    %144 = vector.broadcast %cst_50 : f32 to vector<128x32xf32>
    %145 = arith.maximumf %143, %144 : vector<128x32xf32>
    %c488 = arith.constant 488 : index
    %c0_51 = arith.constant 0 : index
    %146 = vector.load %arg7[%c488, %c0_51] : memref<744x128xf32, #tpu.memory_space<vmem>>, vector<128x128xf32>
    %cst_52 = arith.constant dense<0.000000e+00> : vector<128x32xf32>
    %147 = tpu.matmul %146, %145, %cst_52 {dimension_numbers = #tpu.dot_dimension_numbers<[1], [0], [0], [1], [0, 0, 1, 1], [], []>} : vector<128x128xf32>, vector<128x32xf32>, vector<128x32xf32> -> vector<128x32xf32>
    %c738 = arith.constant 738 : index
    %c0_53 = arith.constant 0 : index
    %148 = vector.load %arg7[%c738, %c0_53] : memref<744x128xf32, #tpu.memory_space<vmem>>, vector<1x32xf32>
    %149 = vector.broadcast %148 : vector<1x32xf32> to vector<128x32xf32>
    %150 = arith.mulf %147, %149 : vector<128x32xf32>
    %c739 = arith.constant 739 : index
    %c0_54 = arith.constant 0 : index
    %151 = vector.load %arg7[%c739, %c0_54] : memref<744x128xf32, #tpu.memory_space<vmem>>, vector<1x32xf32>
    %152 = vector.broadcast %151 : vector<1x32xf32> to vector<128x32xf32>
    %153 = arith.addf %150, %152 : vector<128x32xf32>
    %cst_55 = arith.constant 0.000000e+00 : f32
    %154 = vector.broadcast %cst_55 : f32 to vector<128x32xf32>
    %155 = arith.maximumf %153, %154 : vector<128x32xf32>
    %156 = vector.extract_strided_slice %155 {offsets = [0, 0], sizes = [64, 32], strides = [1, 1]} : vector<128x32xf32> to vector<64x32xf32>
    %157 = vector.extract_strided_slice %155 {offsets = [64, 0], sizes = [64, 32], strides = [1, 1]} : vector<128x32xf32> to vector<64x32xf32>
    %158 = arith.maximumf %156, %157 : vector<64x32xf32>
    %c0_56 = arith.constant 0 : index
    %c0_57 = arith.constant 0 : index
    %159 = vector.load %arg8[%c0_56, %c0_57] : memref<32x512xf32, #tpu.memory_space<vmem>>, vector<32x512xf32>
    %cst_58 = arith.constant dense<0.000000e+00> : vector<64x512xf32>
    %160 = tpu.matmul %158, %159, %cst_58 {dimension_numbers = #tpu.dot_dimension_numbers<[1], [0], [0], [1], [0, 0, 1, 1], [], []>} : vector<64x32xf32>, vector<32x512xf32>, vector<64x512xf32> -> vector<64x512xf32>
    %161 = tpu.iota {dimensions = array<i32: 0>} : vector<64x512xi32>
    %162 = tpu.iota {dimensions = array<i32: 1>} : vector<64x512xi32>
    %c7_i32_59 = arith.constant 7 : i32
    %163 = vector.broadcast %c7_i32_59 : i32 to vector<64x512xi32>
    %164 = arith.andi %161, %163 : vector<64x512xi32>
    %c6_i32 = arith.constant 6 : i32
    %165 = vector.broadcast %c6_i32 : i32 to vector<64x512xi32>
    %166 = arith.shrsi %162, %165 : vector<64x512xi32>
    %167 = arith.cmpi eq, %164, %166 : vector<64x512xi32>
    %168 = arith.extui %167 : vector<64x512xi1> to vector<64x512xi32>
    %169 = arith.sitofp %168 : vector<64x512xi32> to vector<64x512xf32>
    %170 = tpu.iota {dimensions = array<i32: 0>} : vector<8x64xi32>
    %171 = tpu.iota {dimensions = array<i32: 1>} : vector<8x64xi32>
    %c3_i32_60 = arith.constant 3 : i32
    %172 = vector.broadcast %c3_i32_60 : i32 to vector<8x64xi32>
    %173 = arith.shrsi %171, %172 : vector<8x64xi32>
    %174 = arith.cmpi eq, %170, %173 : vector<8x64xi32>
    %175 = arith.extui %174 : vector<8x64xi1> to vector<8x64xi32>
    %176 = arith.sitofp %175 : vector<8x64xi32> to vector<8x64xf32>
    %177 = tpu.iota {dimensions = array<i32: 0>} : vector<512x64xi32>
    %178 = tpu.iota {dimensions = array<i32: 1>} : vector<512x64xi32>
    %c63_i32 = arith.constant 63 : i32
    %179 = vector.broadcast %c63_i32 : i32 to vector<512x64xi32>
    %180 = arith.andi %177, %179 : vector<512x64xi32>
    %181 = arith.cmpi eq, %180, %178 : vector<512x64xi32>
    %182 = arith.extui %181 : vector<512x64xi1> to vector<512x64xi32>
    %183 = arith.sitofp %182 : vector<512x64xi32> to vector<512x64xf32>
    %184 = arith.mulf %160, %169 : vector<64x512xf32>
    %cst_61 = arith.constant dense<0.000000e+00> : vector<8x512xf32>
    %185 = tpu.matmul %176, %184, %cst_61 {dimension_numbers = #tpu.dot_dimension_numbers<[1], [0], [0], [1], [0, 0, 1, 1], [], []>} : vector<8x64xf32>, vector<64x512xf32>, vector<8x512xf32> -> vector<8x512xf32>
    %cst_62 = arith.constant dense<0.000000e+00> : vector<8x64xf32>
    %186 = tpu.matmul %185, %183, %cst_62 {dimension_numbers = #tpu.dot_dimension_numbers<[1], [0], [0], [1], [0, 0, 1, 1], [], []>} : vector<8x512xf32>, vector<512x64xf32>, vector<8x64xf32> -> vector<8x64xf32>
    %c740 = arith.constant 740 : index
    %c0_63 = arith.constant 0 : index
    %187 = vector.load %arg7[%c740, %c0_63] : memref<744x128xf32, #tpu.memory_space<vmem>>, vector<1x64xf32>
    %188 = vector.broadcast %187 : vector<1x64xf32> to vector<8x64xf32>
    %189 = arith.addf %186, %188 : vector<8x64xf32>
    %cst_64 = arith.constant 0.000000e+00 : f32
    %190 = vector.broadcast %cst_64 : f32 to vector<8x64xf32>
    %191 = arith.maximumf %189, %190 : vector<8x64xf32>
    %c616 = arith.constant 616 : index
    %c0_65 = arith.constant 0 : index
    %192 = vector.load %arg7[%c616, %c0_65] : memref<744x128xf32, #tpu.memory_space<vmem>>, vector<64x32xf32>
    %cst_66 = arith.constant dense<0.000000e+00> : vector<8x32xf32>
    %193 = tpu.matmul %191, %192, %cst_66 {dimension_numbers = #tpu.dot_dimension_numbers<[1], [0], [0], [1], [0, 0, 1, 1], [], []>} : vector<8x64xf32>, vector<64x32xf32>, vector<8x32xf32> -> vector<8x32xf32>
    %c741 = arith.constant 741 : index
    %c0_67 = arith.constant 0 : index
    %194 = vector.load %arg7[%c741, %c0_67] : memref<744x128xf32, #tpu.memory_space<vmem>>, vector<1x32xf32>
    %195 = vector.broadcast %194 : vector<1x32xf32> to vector<8x32xf32>
    %196 = arith.addf %193, %195 : vector<8x32xf32>
    %cst_68 = arith.constant 0.000000e+00 : f32
    %197 = vector.broadcast %cst_68 : f32 to vector<8x32xf32>
    %198 = arith.maximumf %196, %197 : vector<8x32xf32>
    %c680 = arith.constant 680 : index
    %c0_69 = arith.constant 0 : index
    %199 = vector.load %arg7[%c680, %c0_69] : memref<744x128xf32, #tpu.memory_space<vmem>>, vector<32x16xf32>
    %cst_70 = arith.constant dense<0.000000e+00> : vector<8x16xf32>
    %200 = tpu.matmul %198, %199, %cst_70 {dimension_numbers = #tpu.dot_dimension_numbers<[1], [0], [0], [1], [0, 0, 1, 1], [], []>} : vector<8x32xf32>, vector<32x16xf32>, vector<8x16xf32> -> vector<8x16xf32>
    %c742 = arith.constant 742 : index
    %c0_71 = arith.constant 0 : index
    %201 = vector.load %arg7[%c742, %c0_71] : memref<744x128xf32, #tpu.memory_space<vmem>>, vector<1x16xf32>
    %202 = vector.broadcast %201 : vector<1x16xf32> to vector<8x16xf32>
    %203 = arith.addf %200, %202 : vector<8x16xf32>
    %cst_72 = arith.constant 0.000000e+00 : f32
    %204 = vector.broadcast %cst_72 : f32 to vector<8x16xf32>
    %205 = arith.maximumf %203, %204 : vector<8x16xf32>
    %c712 = arith.constant 712 : index
    %c0_73 = arith.constant 0 : index
    %206 = vector.load %arg7[%c712, %c0_73] : memref<744x128xf32, #tpu.memory_space<vmem>>, vector<16x2xf32>
    %cst_74 = arith.constant dense<0.000000e+00> : vector<8x2xf32>
    %207 = tpu.matmul %205, %206, %cst_74 {dimension_numbers = #tpu.dot_dimension_numbers<[1], [0], [0], [1], [0, 0, 1, 1], [], []>} : vector<8x16xf32>, vector<16x2xf32>, vector<8x2xf32> -> vector<8x2xf32>
    %c743 = arith.constant 743 : index
    %c0_75 = arith.constant 0 : index
    %208 = vector.load %arg7[%c743, %c0_75] : memref<744x128xf32, #tpu.memory_space<vmem>>, vector<1x2xf32>
    %209 = vector.broadcast %208 : vector<1x2xf32> to vector<8x2xf32>
    %210 = arith.addf %207, %209 : vector<8x2xf32>
    %cst_76 = arith.constant 0.000000e+00 : f32
    %211 = vector.broadcast %cst_76 : f32 to vector<8x2xf32>
    %212 = arith.maximumf %210, %211 : vector<8x2xf32>
    %213 = math.absf %210 : vector<8x2xf32>
    %cst_77 = arith.constant 0.000000e+00 : f32
    %214 = vector.broadcast %cst_77 : f32 to vector<8x2xf32>
    %215 = arith.subf %214, %213 : vector<8x2xf32>
    %216 = math.exp %215 : vector<8x2xf32>
    %cst_78 = arith.constant 1.000000e+00 : f32
    %217 = vector.broadcast %cst_78 : f32 to vector<8x2xf32>
    %218 = arith.addf %217, %216 : vector<8x2xf32>
    %219 = math.log %218 : vector<8x2xf32>
    %220 = arith.addf %212, %219 : vector<8x2xf32>
    %221 = tpu.iota {dimensions = array<i32: 1>} : vector<8x2xi32>
    %c1_i32 = arith.constant 1 : i32
    %222 = vector.broadcast %c1_i32 : i32 to vector<8x2xi32>
    %223 = arith.cmpi eq, %221, %222 : vector<8x2xi32>
    %cst_79 = arith.constant 9.99999997E-7 : f32
    %224 = vector.broadcast %cst_79 : f32 to vector<8x2xf32>
    %225 = arith.addf %220, %224 : vector<8x2xf32>
    %226 = arith.select %223, %225, %210 : vector<8x2xi1>, vector<8x2xf32>
    %c0_80 = arith.constant 0 : index
    %c0_81 = arith.constant 0 : index
    %227 = vector.load %arg9[%c0_80, %c0_81] : memref<8x2xf32, #tpu.memory_space<vmem>>, vector<8x2xf32>
    tpu.vector_store %arg9[%c0_80, %c0_81], %226 {strides = array<i32>} : memref<8x2xf32, #tpu.memory_space<vmem>>, vector<8x2xf32>,
    return
  }
  func.func @transform_0(%arg0: i32) -> (i32, i32) {
    %c0_i32 = arith.constant 0 : i32
    %c0_i32_0 = arith.constant 0 : i32
    return %arg0, %c0_i32 : i32, i32
  }
  func.func @transform_1(%arg0: i32) -> (i32, i32) {
    %c0_i32 = arith.constant 0 : i32
    %c0_i32_0 = arith.constant 0 : i32
    return %arg0, %c0_i32 : i32, i32
  }
  func.func @transform_2(%arg0: i32) -> (i32, i32) {
    %c0_i32 = arith.constant 0 : i32
    %c0_i32_0 = arith.constant 0 : i32
    return %arg0, %c0_i32 : i32, i32
  }
  func.func @transform_3(%arg0: i32) -> (i32, i32) {
    %c0_i32 = arith.constant 0 : i32
    %c0_i32_0 = arith.constant 0 : i32
    return %arg0, %c0_i32 : i32, i32
  }
  func.func @transform_4(%arg0: i32) -> (i32, i32) {
    %c0_i32 = arith.constant 0 : i32
    %c0_i32_0 = arith.constant 0 : i32
    return %arg0, %c0_i32 : i32, i32
  }
  func.func @transform_5(%arg0: i32) -> (i32, i32) {
    %c0_i32 = arith.constant 0 : i32
    %c0_i32_0 = arith.constant 0 : i32
    return %arg0, %c0_i32 : i32, i32
  }
  func.func @transform_6(%arg0: i32) -> (i32, i32) {
    %c0_i32 = arith.constant 0 : i32
    %c0_i32_0 = arith.constant 0 : i32
    %c0_i32_1 = arith.constant 0 : i32
    return %c0_i32, %c0_i32_0 : i32, i32
  }
  func.func @transform_7(%arg0: i32) -> (i32, i32) {
    %c0_i32 = arith.constant 0 : i32
    %c0_i32_0 = arith.constant 0 : i32
    %c0_i32_1 = arith.constant 0 : i32
    return %c0_i32, %c0_i32_0 : i32, i32
  }
  func.func @transform_8(%arg0: i32) -> (i32, i32) {
    %c0_i32 = arith.constant 0 : i32
    %c0_i32_0 = arith.constant 0 : i32
    return %arg0, %c0_i32 : i32, i32
  }
}

</mosaic_0001>

<bundles_post_ra>
// kernel: siamese_forward.1
= control target key start
LH: loop header
LB: loop body
LE: loop exit
PB: predicated region body
PF: predicated region fallthrough
CT: control target
= control target key end

     0   :  { %s4911_s27 = smov 0   ;;  %s7418_s0 = inlined_call_operand.vmem [shape: f32[128,16], index: 0, kind: input, shape index: {}]   ;;  %s7419_s1 = inlined_call_operand.vmem [shape: f32[128,32], index: 1, kind: input, shape index: {}]   ;;  %s7420_s2 = inlined_call_operand.vmem [shape: s32[128,4], index: 2, kind: input, shape index: {}]   ;;  %s7421_s3 = inlined_call_operand.vmem [shape: f32[128,16], index: 3, kind: input, shape index: {}]   ;;  %s7422_s4 = inlined_call_operand.vmem [shape: f32[128,32], index: 4, kind: input, shape index: {}]   ;;  %s7423_s5 = inlined_call_operand.vmem [shape: s32[128,4], index: 5, kind: input, shape index: {}]   ;;  %s7424_s6 = inlined_call_operand.vmem [shape: f32[744,128], index: 6, kind: input, shape index: {}]   ;;  %s7425_s7 = inlined_call_operand.vmem [shape: f32[32,512], index: 7, kind: input, shape index: {}]   ;;  %s7426_s8 = inlined_call_operand.vmem [shape: f32[16,2], index: 8, kind: output, shape index: {}]  }
   0x1 LB: > { %s4917_s28 = sadd.s32 4294967295, %s4858_s27   ;;  %p4261_p0 = scmp.ge.s32.totalorder %s4858_s27, 1  ;;  %s4858_s27 = sphi %s4911_s27, %s18_s27  }
   0x2   : > { %p318_p1 = scmp.lt.s32.totalorder %s4858_s27, 3 }
   0x4   : > { %p319_p2 = pnand %p4261_p0, %p318_p1 }
   0x6   : > { %322 = sbr.rel (%p319_p2) target bundleno = 3751 (0xea7), region = 52 }
   0xb   : > { %s4262_s29 = sshll.u32 %s4917_s28, 3  ;;  %v464_v0 = vlaneseq  ;;  %v7437_v1 = vmov 2   ;;  %v7435_v2 = vmov 1   ;;  %v7438_v4 = vmov 0   ;;  %p412_p4 = scmp.lt.s32.totalorder %s4917_s28, 1 }
   0xc   : > { %4772 = vset.pattern.permute.xlu1 %v7437_v1  ;;  %4771 = vset.pattern.permute.xlu0 %v7435_v2  ;;  %p377_p3 = scmp.lt.s32.totalorder %s4262_s29, 15  ;;  %v4863_v25 = vmov 3   ;;  %v7433_v51 = vmov 1.0   ;;  %vm7442_vm11 = vcmask 261120  }
   0xd   : > { %v4925_v3 = vshrl.u32 %v464_v0, 7  ;;  %4774 = vset.pattern.permute.xlu2 %v7438_v4  ;;  %v5032_v47 = vand.u32 127, %v464_v0  ;;  %s7734_s28 = smov (!%p412_p4, %s4917_s28), 1 }
   0xe   : > { %s7732_s29 = smov (!%p377_p3, %s4262_s29), 15  ;;  %s4274_s13 = sshll.u32 %s7734_s28, 3 }
   0xf   : > { %7506 = vst [vmem:[#allocation2_spill] sm:$0xff] %v4925_v3  ;;  %v531_v5 = vshra.s32 %v4925_v3, 3  ;;  %v4930_v6 = vadd.s32 32, %v4925_v3  ;;  %v4933_v7 = vadd.s32 8, %v4925_v3  ;;  %s4935_s30 = sshll.u32 %s7732_s29, 3  ;;  %v4960_v18 = vadd.s32 40, %v4925_v3  ;;  %s415_s16 = scalar_lea.vmem %s7426_s8, %s4274_s13 }
  0x10   : > { %s4941_s11 = scalar_lea.vmem %s7420_s2, %s4935_s30  ;;  %v4978_v27 = vadd.s32 16, %v4925_v3  ;;  %v4999_v34 = vadd.s32 24, %v4925_v3  ;;  %v5004_v36 = vadd.s32 56, %v4925_v3  ;;  %7513 = vst [vmem:[#allocation9_spill] sm:$0xff] %v5032_v47  ;;  %v5048_v52 = vand.u32 7, %v4925_v3  ;;  %s5063_s14 = scalar_lea.vmem %s7419_s1, %s4935_s30 }
  0x11   : > { %7507 = vst [vmem:[#allocation3_spill] sm:$0xff] %v4930_v6  ;;  %v547_v8 = vshll.u32 %v531_v5, 3  ;;  %v535_v9 = vshra.s32 %v4930_v6, 3  ;;  %v532_v10 = vshra.s32 %v4933_v7, 3  ;;  %v4946_v11 = vld [vmem:[%s4941_s11] sm:$0xff]  ;;  %v4949_v12 = vld [vmem:[%s4941_s11 + $0x8] sm:$0xff]  ;;  %s5096_s17 = scalar_lea.vmem %s7423_s5, %s4935_s30  ;;  %s5122_s20 = scalar_lea.vmem %s7421_s3, %s4935_s30 }
  0x12   : > { %7508 = vst [vmem:[#allocation4_spill] sm:$0xff] %v4933_v7  ;;  %vm563_vm0 = vcmp.ge.s32.totalorder %v4946_v11, 0  ;;  %v4956_v17 = vld [vmem:[%s4941_s11 + $0x20] sm:$0xff]  ;;  %vm564_vm1 = vcmp.ge.s32.totalorder %v4949_v12, 0  ;;  %v536_v22 = vshra.s32 %v4960_v18, 3  ;;  %v4975_v26 = vld [vmem:[%s4941_s11 + $0x28] sm:$0xff]  ;;  %vm1337_vm10 = vcmp.eq.s32.totalorder %v5048_v52, %v5032_v47  ;;  %s5162_s23 = scalar_lea.vmem %s7418_s0, %s4935_s30  ;;  %s5208_s26 = scalar_lea.vmem %s7422_s4, %s4935_s30 }
  0x13   : > { %v579_v13 = vadd.s32 %v547_v8, %v4946_v11  ;;  %v551_v14 = vshll.u32 %v535_v9, 3  ;;  %v548_v15 = vshll.u32 %v532_v10, 3  ;;  %7509 = vst [vmem:[#allocation5_spill] sm:$0xff] %v4960_v18  ;;  %vm567_vm2 = vcmp.ge.s32.totalorder %v4956_v17, 0  ;;  %v4992_v32 = vld [vmem:[%s4941_s11 + $0x10] sm:$0xff]  ;;  %v5012_v40 = vld [vmem:[%s4941_s11 + $0x18] sm:$0xff] }
  0x14   : > { %v552_v24 = vshll.u32 %v536_v22, 3  ;;  %7510 = vst [vmem:[#allocation6_spill] sm:$0xff] %v4978_v27  ;;  %vm568_vm3 = vcmp.ge.s32.totalorder %v4975_v26, 0  ;;  %v533_v29 = vshra.s32 %v4978_v27, 3  ;;  %vm565_vm4 = vcmp.ge.s32.totalorder %v4992_v32, 0  ;;  %v5015_v42 = vld [vmem:[%s4941_s11 + $0x38] sm:$0xff] }
  0x15   : > { %v595_v16 = vsel %vm563_vm0, %v579_v13, 4294967295  ;;  %v580_v19 = vadd.s32 %v548_v15, %v4949_v12  ;;  %v583_v20 = vadd.s32 %v551_v14, %v4956_v17  ;;  %7511 = vst [vmem:[#allocation7_spill] sm:$0xff] %v4999_v34  ;;  %v534_v37 = vshra.s32 %v4999_v34, 3  ;;  %v432_v53 = vld [vmem:[%s5063_s14] sm:$0xff]  ;;  %v433_v55 = vld [vmem:[%s5063_s14 + $0x8] sm:$0xff]  ;;  %v434_v58 = vld [vmem:[%s5063_s14 + $0x10] sm:$0xff] }
  0x16   : > { %836 = vperm.xlu1 %4772, %v595_v16   ;;  %724 = vperm.xlu0 %4771, %v595_v16   ;;  %v584_v28 = vadd.s32 %v552_v24, %v4975_v26  ;;  %v549_v31 = vshll.u32 %v533_v29, 3  ;;  %7512 = vst [vmem:[#allocation8_spill] sm:$0xff] %v5004_v36  ;;  %v538_v38 = vshra.s32 %v5004_v36, 3  ;;  %vm566_vm5 = vcmp.ge.s32.totalorder %v5012_v40, 0  ;;  %v5085_v59 = vld [vmem:[%s4941_s11 + $0x30] sm:$0xff]  ;;  %v5104_v0 = vld [vmem:[%s5096_s17] sm:$0xff] }
  0x17   : > { %v596_v21 = vsel %vm564_vm1, %v580_v19, 4294967295  ;;  %v4970_v23 = vsel %vm567_vm2, %v583_v20, 4294967295  ;;  %v550_v39 = vshll.u32 %v534_v37, 3  ;;  %vm570_vm6 = vcmp.ge.s32.totalorder %v5015_v42, 0  ;;  %7517 = vst [vmem:[#allocation13_spill] sm:$0xff] %v5048_v52  ;;  %v435_v9 = vld [vmem:[%s5063_s14 + $0x18] sm:$0xff] }
  0x18   : > { %615 = vperm.xlu2 %4774, %v596_v21   ;;  %v4987_v30 = vsel %vm568_vm3, %v584_v28, 4294967295  ;;  %v581_v33 = vadd.s32 %v549_v31, %v4992_v32  ;;  %v554_v41 = vshll.u32 %v538_v38, 3  ;;  %v5036_v48 = vand.u32 7, %v4999_v34  ;;  %v431_v13 = vld [vmem:[%s5122_s20 + $0x38] sm:$0xff]  ;;  %v430_v14 = vld [vmem:[%s5122_s20 + $0x30] sm:$0xff]  ;;  %v428_v29 = vld [vmem:[%s5122_s20 + $0x20] sm:$0xff] }
  0x19   : > { %v582_v43 = vadd.s32 %v550_v39, %v5012_v40  ;;  %v5041_v49 = vand.u32 7, %v4978_v27  ;;  %v5044_v50 = vand.u32 7, %v4933_v7  ;;  %v5074_v54 = vadd.s32 48, %v4925_v3  ;;  %1527 = vmatpush.msra.mxu1 %v431_v13  ;;  %v437_v31 = vld [vmem:[%s5063_s14 + $0x28] sm:$0xff]  ;;  %v424_v37 = vld [vmem:[%s5122_s20] sm:$0xff] }
  0x1a   : > { %v597_v35 = vsel %vm565_vm4, %v581_v33, 4294967295  ;;  %v586_v44 = vadd.s32 %v554_v41, %v5015_v42  ;;  %7514 = vst [vmem:[#allocation10_spill] sm:$0xff] %v5036_v48  ;;  %vm1340_vm7 = vcmp.eq.s32.totalorder %v5036_v48, %v5032_v47  ;;  %v5088_v60 = vadd.s32 64, %v4925_v3  ;;  %v426_v33 = vld [vmem:[%s5122_s20 + $0x10] sm:$0xff]  ;;  %v417_v13 = vld [vmem:[%s5162_s23 + $0x8] sm:$0xff] }
  0x1b   : > { %v598_v45 = vsel %vm566_vm5, %v582_v43, 4294967295  ;;  %7515 = vst [vmem:[#allocation11_spill] sm:$0xff] %v5041_v49  ;;  %4375 = vmatpush.msk.msra.mxu0 %vm1340_vm7, %v7433_v51  ;;  %vm1339_vm8 = vcmp.eq.s32.totalorder %v5041_v49, %v5032_v47  ;;  %vm1338_vm9 = vcmp.eq.s32.totalorder %v5044_v50, %v5032_v47  ;;  %v537_v56 = vshra.s32 %v5074_v54, 3  ;;  %1528 = vmatpush.msra.mxu1 %v430_v14  ;;  %v438_v41 = vld [vmem:[%s5063_s14 + $0x30] sm:$0xff]  ;;  %v423_v43 = vld [vmem:[%s5162_s23 + $0x38] sm:$0xff]  ;;  %v416_v14 = vld [vmem:[%s5162_s23] sm:$0xff] }
  0x1c   : > { %v5027_v46 = vsel %vm570_vm6, %v586_v44, 4294967295  ;;  %7516 = vst [vmem:[#allocation12_spill] sm:$0xff] %v5044_v50  ;;  %v539_v61 = vshra.s32 %v5088_v60, 3  ;;  %vm569_vm12 = vcmp.ge.s32.totalorder %v5085_v59, 0  ;;  %vm7430_vm13 = vcmp.ge.s32.totalorder %v5104_v0, 0  ;;  %v422_v44 = vld [vmem:[%s5162_s23 + $0x30] sm:$0xff] }
  0x1d   : > { %4376 = vmatpush.msk.msra.mxu0 %vm1339_vm8, %v7433_v51  ;;  %7518 = vst [vmem:[#allocation14_spill] sm:$0xff] %v5074_v54  ;;  %v553_v57 = vshll.u32 %v537_v56, 3  ;;  %v5128_v15 = vadd.s32 72, %v4925_v3  ;;  %v5170_v39 = vadd.s32 80, %v4925_v3  ;;  %v5181_v56 = vld [vmem:[%s5096_s17 + $0x10] sm:$0xff]  ;;  %vm483_vm8 = vcmp.eq.s32.totalorder %v4925_v3, %v5032_v47 }
  0x1e   : > { %4773 = vset.pattern.permute.xlu1 %v4863_v25  ;;  %4786 = vset.pattern.permute.xlu0 %v7437_v1  ;;  %7519 = vst [vmem:[#allocation15_spill] sm:$0xff] %v5088_v60  ;;  %v555_v63 = vshll.u32 %v539_v61, 3  ;;  %vm7428_vm15 = vcmp.ge.s32.totalorder %v5181_v56, 0  ;;  %v7530_v52 = vmov 0  }
  0x1f   : > { %948 = vperm.xlu1 %4773, %v595_v16   ;;  %848 = vperm.xlu0 %4786, %v4970_v23   ;;  %v585_v62 = vadd.s32 %v553_v57, %v5085_v59  ;;  %7520 = vst [vmem:[#allocation16_spill] sm:$0xff] %v5128_v15  ;;  %v540_v19 = vshra.s32 %v5128_v15, 3 }
  0x20   : > { %4775 = vset.pattern.permute.xlu2 %v7435_v2  ;;  %4377 = vmatpush.msk.msra.mxu0 %vm1338_vm9, %v7433_v51  ;;  %v587_v5 = vadd.s32 %v555_v63, %v5104_v0  ;;  %7521 = vst [vmem:[#allocation17_spill] sm:$0xff] %v5170_v39  ;;  %v419_v63 = vld [vmem:[%s5162_s23 + $0x18] sm:$0xff] }
  0x21   : > { %727 = vperm.xlu2 %4775, %v596_v21   ;;  %v601_v8 = vsel %vm569_vm12, %v585_v62, 4294967295  ;;  %v556_v20 = vshll.u32 %v540_v19, 3  ;;  %v439_v62 = vld [vmem:[%s5063_s14 + $0x38] sm:$0xff]  ;;  %v440_v19 = vld [vmem:[%s5208_s26] sm:$0xff] }
  0x22   : > { %4378 = vmatpush.msk.msra.mxu0 %vm1337_vm10, %v7433_v51  ;;  %v5113_v10 = vsel %vm7430_vm13, %v587_v5, 4294967295  ;;  %vm484_vm10 = vcmp.eq.s32.totalorder %v4933_v7, %v5032_v47 }
  0x23   : > { %4379 = vmatmul.msk.f32.vlgmr.msra.gmra.mxu0 %vm7442_vm11, %v432_v53 }
  0x27   : > { %4776 = vset.pattern.permute.xlu1 %v7437_v1  ;;  %4791 = vset.pattern.permute.xlu0 %v4863_v25 }
  0x28   : > { %839 = vperm.xlu1 %4776, %v596_v21   ;;  %963 = vperm.xlu0 %4791, %v4987_v30  }
  0x29   : > { %4777 = vset.pattern.permute.xlu2 %v4863_v25 }
  0x2a   : > { %951 = vperm.xlu2 %4777, %v596_v21   ;;  %v5136_v21 = vld [vmem:[%s5096_s17 + $0x8] sm:$0xff] }
  0x2b   : > { %4380 = vmatmul.msk.f32.gmra.mxu0 %vm7442_vm11, %v433_v55  ;;  %v588_v22 = vadd.s32 %v556_v20, %v5136_v21  ;;  %vm7429_vm14 = vcmp.ge.s32.totalorder %v5136_v21, 0  ;;  %v421_v55 = vld [vmem:[%s5162_s23 + $0x28] sm:$0xff] }
  0x2d   : > { %v5146_v28 = vsel %vm7429_vm14, %v588_v22, 4294967295  ;;  %vm485_vm14 = vcmp.eq.s32.totalorder %v4978_v27, %v5032_v47 }
  0x30   : > { %4778 = vset.pattern.permute.xlu1 %v7435_v2  ;;  %4792 = vset.pattern.permute.xlu0 %v7438_v4 }
  0x31   : > { %730 = vperm.xlu1 %4778, %v597_v35   ;;  %612 = vperm.xlu0 %4792, %v595_v16   ;;  %v436_v16 = vld [vmem:[%s5063_s14 + $0x20] sm:$0xff] }
  0x32   : > { %4779 = vset.pattern.permute.xlu2 %v7437_v1 }
  0x33   : > { %842 = vperm.xlu2 %4779, %v597_v35   ;;  %4381 = vmatmul.msk.f32.gmra.mxu0 %vm7442_vm11, %v434_v58  ;;  %v420_v58 = vld [vmem:[%s5162_s23 + $0x20] sm:$0xff] }
  0x39   : > { %4780 = vset.pattern.permute.xlu1 %v4863_v25  ;;  %618 = vperm.xlu0 %4792, %v597_v35  }
  0x3a   : > { %954 = vperm.xlu1 %4780, %v597_v35   ;;  %v425_v35 = vld [vmem:[%s5122_s20 + $0x8] sm:$0xff] }
  0x3b   : > { %4781 = vset.pattern.permute.xlu2 %v7438_v4  ;;  %4382 = vmatmul.msk.f32.gmra.mxu0 %vm7442_vm11, %v435_v9  ;;  %v418_v9 = vld [vmem:[%s5162_s23 + $0x10] sm:$0xff] }
  0x3c   : > { %621 = vperm.xlu2 %4781, %v598_v45  }
  0x41   : > { %633 = vperm.xlu0 %4792, %v5027_v46  }
  0x42   : > { %4782 = vset.pattern.permute.xlu1 %v7437_v1 }
  0x43   : > { %845 = vperm.xlu1 %4782, %v598_v45   ;;  %4383 = vmatmul.msk.f32.gmra.mxu0 %vm7442_vm11, %v436_v16 }
  0x44   : > { %4783 = vset.pattern.permute.xlu2 %v4863_v25 }
  0x45   : > { %957 = vperm.xlu2 %4783, %v598_v45  }
  0x49   : > { %4797 = vset.pattern.permute.xlu0 %v7435_v2 }
  0x4a   : > { %733 = vperm.xlu0 %4797, %v598_v45   ;;  %v541_v45 = vshra.s32 %v5170_v39, 3 }
  0x4b   : > { %4784 = vset.pattern.permute.xlu1 %v7438_v4  ;;  %4384 = vmatmul.msk.f32.gmra.mxu0 %vm7442_vm11, %v437_v31 }
  0x4c   : > { %624 = vperm.xlu1 %4784, %v4970_v23   ;;  %v557_v53 = vshll.u32 %v541_v45, 3  ;;  %v442_v45 = vld [vmem:[%s5208_s26 + $0x10] sm:$0xff] }
  0x4d   : > { %4785 = vset.pattern.permute.xlu2 %v7435_v2 }
  0x4e   : > { %736 = vperm.xlu2 %4785, %v4970_v23   ;;  %v589_v57 = vadd.s32 %v557_v53, %v5181_v56 }
  0x52   : > { %748 = vperm.xlu0 %4797, %v5113_v10  }
  0x53   : > { %4385 = vmatmul.msk.f32.gmra.mxu0 %vm7442_vm11, %v438_v41  ;;  %v5243_v41 = vadd.s32 88, %v4925_v3 }
  0x54   : > { %4787 = vset.pattern.permute.xlu1 %v4863_v25 }
  0x55   : > { %960 = vperm.xlu1 %4787, %v4970_v23   ;;  %v429_v23 = vld [vmem:[%s5122_s20 + $0x28] sm:$0xff]  ;;  %7523 = vst [vmem:[#allocation19_spill] sm:$0xff] %v5243_v41  ;;  %v542_v53 = vshra.s32 %v5243_v41, 3 }
  0x56   : > { %4788 = vset.pattern.permute.xlu2 %v7438_v4  ;;  %1529 = vmatpush.msra.mxu1 %v429_v23  ;;  %v441_v23 = vld [vmem:[%s5208_s26 + $0x8] sm:$0xff] }
  0x57   : > { %627 = vperm.xlu2 %4788, %v4987_v30  }
  0x58   : > { %1530 = vmatpush.msra.mxu1 %v428_v29 }
  0x5a   : > { %4806 = vset.pattern.permute.xlu0 %v7437_v1 }
  0x5b   : > { %863 = vperm.xlu0 %4806, %v5146_v28   ;;  %4386 = vmatmul.msk.f32.gmra.mxu0 %vm7442_vm11, %v439_v62 }
  0x5d   : > { %4789 = vset.pattern.permute.xlu1 %v7435_v2 }
  0x5e   : > { %739 = vperm.xlu1 %4789, %v4987_v30  }
  0x5f   : > { %4790 = vset.pattern.permute.xlu2 %v7437_v1 }
  0x60   : > { %851 = vperm.xlu2 %4790, %v4987_v30   ;;  %v427_v30 = vld [vmem:[%s5122_s20 + $0x18] sm:$0xff] }
  0x61   : > { %1531 = vmatpush.msra.mxu1 %v427_v30 }
  0x63   : > { %1532 = vmatpush.msra.mxu1 %v426_v33  ;;  %4811 = vset.pattern.permute.xlu0 %v4863_v25 }
  0x64   : > { %4387 = vmatmul.msk.f32.gmra.mxu0 %vm7442_vm11, %v440_v19 }
  0x65   : > { %1533 = vmatpush.msra.mxu1 %v425_v35 }
  0x66   : > { %4793 = vset.pattern.permute.xlu1 %v7438_v4 }
  0x67   : > { %630 = vperm.xlu1 %4793, %v601_v8   ;;  %1534 = vmatpush.msra.mxu1 %v424_v37  ;;  %v5239_v37 = vld [vmem:[%s5096_s17 + $0x20] sm:$0xff] }
  0x68   : > { %4794 = vset.pattern.permute.xlu2 %v7435_v2  ;;  %vm7427_vm7 = vcmp.ge.s32.totalorder %v5239_v37, 0 }
  0x69   : > { %742 = vperm.xlu2 %4794, %v601_v8   ;;  %1535 = vmatpush.msra.mxu1 %v423_v43 }
  0x6b   : > { %1536 = vmatpush.msra.mxu1 %v422_v44 }
  0x6c   : > { %4388 = vmatmul.msk.f32.gmra.mxu0 %vm7442_vm11, %v441_v23 }
  0x6d   : > { %1537 = vmatpush.msra.mxu1 %v421_v55 }
  0x6f   : > { %4795 = vset.pattern.permute.xlu1 %v7437_v1  ;;  %1538 = vmatpush.msra.mxu1 %v420_v58 }
  0x70   : > { %854 = vperm.xlu1 %4795, %v601_v8  }
  0x71   : > { %4796 = vset.pattern.permute.xlu2 %v4863_v25  ;;  %1539 = vmatpush.msra.mxu1 %v419_v63  ;;  %v558_v63 = vshll.u32 %v542_v53, 3 }
  0x72   : > { %v5142_v24 = vpop.permute.xlu2 %615  ;;  %966 = vperm.xlu2 %4796, %v601_v8  }
  0x73   : > { %1540 = vmatpush.msra.mxu1 %v418_v9 }
  0x74   : > { %4389 = vmatmul.msk.f32.gmra.mxu0 %vm7442_vm11, %v442_v45 }
  0x75   : > { %1541 = vmatpush.msra.mxu1 %v417_v13  ;;  %v5275_v13 = vld [vmem:[%s5096_s17 + $0x18] sm:$0xff] }
  0x77   : > { %1542 = vmatpush.msra.mxu1 %v416_v14  ;;  %v5278_v14 = vadd.s32 104, %v4925_v3 }
  0x78   : > { %4798 = vset.pattern.permute.xlu1 %v7435_v2 }
  0x79   : > { %745 = vperm.xlu1 %4798, %v5027_v46   ;;  %7524 = vst [vmem:[#allocation20_spill] sm:$0xff] %v5278_v14 }
  0x7a   : > { %4799 = vset.pattern.permute.xlu2 %v7437_v1 }
  0x7b   : > { %857 = vperm.xlu2 %4799, %v5027_v46   ;;  %v5167_v38 = vpop.permute.xlu2 %727 }
  0x81   : > { %4800 = vset.pattern.permute.xlu1 %v4863_v25 }
  0x82   : > { %969 = vperm.xlu1 %4800, %v5027_v46   ;;  %v5192_v46 = vsel %vm7428_vm15, %v589_v57, 4294967295  ;;  %v7474_v57 = vmov 0.0  }
  0x83   : > { %4801 = vset.pattern.permute.xlu2 %v7438_v4  ;;  %978 = vperm.xlu0 %4811, %v5192_v46   ;;  %v4275_v58 = vsel %vm483_vm8, 1.0, %v7474_v57  ;;  %v4276_v23 = vsel %vm484_vm10, 1.0, %v7474_v57 }
  0x84   : > { %636 = vperm.xlu2 %4801, %v5113_v10   ;;  %v5188_v61 = vpop.permute.xlu2 %951 }
  0x88   : > { %v5198_v5 = vpop.permute.xlu1 %836  ;;  %v725_v8 = vpop.permute.xlu0 %724 }
  0x89   : > { %vm771_vm9 = vcmp.eq.s32.totalorder %v5032_v47, %v725_v8  ;;  %vm883_vm8 = vcmp.eq.s32.totalorder %v5032_v47, %v5198_v5 }
  0x8a   : > { %4802 = vset.pattern.permute.xlu1 %v7437_v1  ;;  %v4307_v9 = vsel %vm771_vm9, 1.0, %v7474_v57  ;;  %v4323_v45 = vsel %vm883_vm8, 1.0, %v7474_v57 }
  0x8b   : > { %860 = vperm.xlu1 %4802, %v5113_v10   ;;  %4816 = vset.pattern.permute.xlu0 %v7438_v4 }
  0x8c   : > { %4803 = vset.pattern.permute.xlu2 %v4863_v25 }
  0x8d   : > { %972 = vperm.xlu2 %4803, %v5113_v10   ;;  %v5213_v16 = vpop.permute.xlu2 %842  ;;  %v5227_v10 = vadd.s32 96, %v4925_v3 }
  0x8f   : > { %7522 = vst [vmem:[#allocation18_spill] sm:$0xff] %v5227_v10  ;;  %v543_v30 = vshra.s32 %v5227_v10, 3 }
  0x91   : > { %v5218_v20 = vpop.permute.xlu1 %948  ;;  %v5220_v22 = vpop.permute.xlu0 %848  ;;  %v559_v35 = vshll.u32 %v543_v30, 3 }
  0x92   : > { %vm995_vm9 = vcmp.eq.s32.totalorder %v5032_v47, %v5218_v20 }
  0x93   : > { %4804 = vset.pattern.permute.xlu1 %v7438_v4  ;;  %v591_v43 = vadd.s32 %v559_v35, %v5239_v37  ;;  %v544_v35 = vshra.s32 %v5278_v14, 3 }
  0x94   : > { %639 = vperm.xlu1 %4804, %v5146_v28  }
  0x95   : > { %4805 = vset.pattern.permute.xlu2 %v7435_v2  ;;  %v5250_v44 = vsel %vm7427_vm7, %v591_v43, 4294967295  ;;  %vm660_vm7 = vcmp.eq.s32.totalorder %v5032_v47, %v5142_v24  ;;  %v443_v24 = vld [vmem:[%s5208_s26 + $0x18] sm:$0xff]  ;;  %v590_v43 = vadd.s32 %v558_v63, %v5275_v13 }
  0x96   : > { %751 = vperm.xlu2 %4805, %v5146_v28   ;;  %v5230_v29 = vpop.permute.xlu2 %621  ;;  %648 = vperm.xlu0 %4816, %v5250_v44   ;;  %v4292_v30 = vsel %vm660_vm7, 1.0, %v7474_v57  ;;  %vm7465_vm7 = vcmp.ge.s32.totalorder %v5275_v13, 0 }
  0x97   : > { %4390 = vmatmul.msk.f32.gmra.mxu0 %vm7442_vm11, %v443_v24 }
  0x9a   : > { %v5234_v31 = vpop.permute.xlu1 %839  ;;  %v5236_v33 = vpop.permute.xlu0 %963 }
  0x9b   : > { %vm884_vm10 = vcmp.eq.s32.totalorder %v5032_v47, %v5234_v31 }
  0x9c   : > { %4807 = vset.pattern.permute.xlu1 %v4863_v25 }
  0x9d   : > { %975 = vperm.xlu1 %4807, %v5146_v28  }
  0x9e   : > { %4808 = vset.pattern.permute.xlu2 %v7438_v4  ;;  %4821 = vset.pattern.permute.xlu0 %v7435_v2 }
  0x9f   : > { %642 = vperm.xlu2 %4808, %v5192_v46   ;;  %v5259_v28 = vpop.permute.xlu2 %957 }
  0xa3   : > { %v5263_v55 = vpop.permute.xlu1 %730  ;;  %v613_v62 = vpop.permute.xlu0 %612 }
  0xa4   : > { %vm659_vm15 = vcmp.eq.s32.totalorder %v5032_v47, %v613_v62  ;;  %v708_v62 = vadd.f32 %v4292_v30, %v4276_v23  ;;  %v4324_v30 = vsel %vm884_vm10, 1.0, %v7474_v57  ;;  %vm662_vm10 = vcmp.eq.s32.totalorder %v5032_v47, %v5230_v29 }
  0xa5   : > { %v4291_v8 = vsel %vm659_vm15, 1.0, %v7474_v57  ;;  %4809 = vset.pattern.permute.xlu1 %v7435_v2  ;;  %vm772_vm15 = vcmp.eq.s32.totalorder %v5032_v47, %v5167_v38  ;;  %v606_v38 = vsel %vm7465_vm7, %v590_v43, 4294967295 }
  0xa6   : > { %v707_v19 = vadd.f32 %v4291_v8, %v4275_v58  ;;  %754 = vperm.xlu1 %4809, %v5192_v46   ;;  %v560_v58 = vshll.u32 %v544_v35, 3  ;;  %v4308_v8 = vsel %vm772_vm15, 1.0, %v7474_v57  ;;  %v4277_v35 = vsel %vm485_vm14, 1.0, %v7474_v57 }
  0xa7   : > { %4810 = vset.pattern.permute.xlu2 %v7437_v1  ;;  %vm996_vm15 = vcmp.eq.s32.totalorder %v5032_v47, %v5188_v61  ;;  %vm885_vm14 = vcmp.eq.s32.totalorder %v5032_v47, %v5213_v16 }
  0xa8   : > { %v819_v5 = vadd.f32 %v4307_v9, %v707_v19  ;;  %866 = vperm.xlu2 %4810, %v5192_v46   ;;  %v5298_v53 = vpop.permute.xlu2 %736  ;;  %v5305_v9 = vld [vmem:[%s5096_s17 + $0x28] sm:$0xff]  ;;  %v4339_v46 = vsel %vm995_vm9, 1.0, %v7474_v57  ;;  %vm486_vm9 = vcmp.eq.s32.totalorder %v4999_v34, %v5032_v47 }
  0xa9   : > { %vm7432_vm8 = vcmp.ge.s32.totalorder %v5305_v9, 0  ;;  %v592_v31 = vadd.s32 %v560_v58, %v5305_v9  ;;  %v444_v58 = vld [vmem:[%s5208_s26 + $0x20] sm:$0xff] }
  0xaa   : > { %v931_v63 = vadd.f32 %v4323_v45, %v819_v5  ;;  %v820_v45 = vadd.f32 %v4308_v8, %v708_v62  ;;  %4391 = vmatmul.msk.f32.gmra.mxu0 %vm7442_vm11, %v444_v58  ;;  %v4340_v62 = vsel %vm996_vm15, 1.0, %v7474_v57 }
  0xab   : > { %v619_v19 = vpop.permute.xlu0 %618  ;;  %v5327_v5 = vsel %vm7432_vm8, %v592_v31, 4294967295  ;;  %vm775_vm8 = vcmp.eq.s32.totalorder %v5032_v47, %v5298_v53  ;;  %v5410_v53 = vadd.s32 120, %v4925_v3 }
  0xac   : > { %vm661_vm13 = vcmp.eq.s32.totalorder %v5032_v47, %v619_v19  ;;  %v955_v24 = vpop.permute.xlu1 %954  ;;  %v5318_v23 = vadd.f32 %v4339_v46, %v931_v63  ;;  %763 = vperm.xlu0 %4821, %v5327_v5   ;;  %v932_v43 = vadd.f32 %v4324_v30, %v820_v45  ;;  %v5346_v19 = vadd.s32 112, %v4925_v3 }
  0xad   : > { %v4293_v20 = vsel %vm661_vm13, 1.0, %v7474_v57  ;;  %vm773_vm13 = vcmp.eq.s32.totalorder %v5032_v47, %v5263_v55  ;;  %v4325_v45 = vsel %vm885_vm14, 1.0, %v7474_v57  ;;  %vm997_vm15 = vcmp.eq.s32.totalorder %v5032_v47, %v955_v24  ;;  %7526 = vst [vmem:[#allocation22_spill] sm:$0xff] %v5410_v53 }
  0xae   : > { %4812 = vset.pattern.permute.xlu1 %v7438_v4  ;;  %1543 = vmatmul.f32.vlgmr.msra.gmra.mxu1 %v5318_v23  ;;  %v709_v63 = vadd.f32 %v4293_v20, %v4277_v35  ;;  %v4309_v8 = vsel %vm773_vm13, 1.0, %v7474_v57  ;;  %7525 = vst [vmem:[#allocation21_spill] sm:$0xff] %v5346_v19  ;;  %v5348_v31 = vadd.f32 %v4340_v62, %v932_v43  ;;  %v445_v35 = vld [vmem:[%s5208_s26 + $0x28] sm:$0xff]  ;;  %v545_v20 = vshra.s32 %v5346_v19, 3  ;;  %v5365_v43 = vld [vmem:[%s5096_s17 + $0x30] sm:$0xff] }
  0xaf   : > { %645 = vperm.xlu1 %4812, %v606_v38   ;;  %v4278_v62 = vsel %vm486_vm9, 1.0, %v7474_v57  ;;  %vm7431_vm13 = vcmp.ge.s32.totalorder %v5365_v43, 0  ;;  %v4341_v29 = vsel %vm997_vm15, 1.0, %v7474_v57  ;;  %vm487_vm14 = vcmp.eq.s32.totalorder %v4930_v6, %v5032_v47 }
  0xb0   : > { %4813 = vset.pattern.permute.xlu2 %v7435_v2  ;;  %v821_v55 = vadd.f32 %v4309_v8, %v709_v63  ;;  %v561_v58 = vshll.u32 %v545_v20, 3  ;;  %v4294_v8 = vsel %vm662_vm10, 1.0, %v7474_v57  ;;  %vm998_vm15 = vcmp.eq.s32.totalorder %v5032_v47, %v5259_v28 }
  0xb1   : > { %757 = vperm.xlu2 %4813, %v606_v38   ;;  %v5340_v61 = vpop.permute.xlu2 %627  ;;  %v4342_v28 = vsel %vm998_vm15, 1.0, %v7474_v57  ;;  %vm7468_vm15 = vcmask 64512  }
  0xb2   : > { %v933_v16 = vadd.f32 %v4325_v45, %v821_v55  ;;  %4392 = vmatmul.msk.f32.gmra.mxu0 %vm7442_vm11, %v445_v35  ;;  %v593_v63 = vadd.s32 %v561_v58, %v5365_v43  ;;  %v710_v45 = vadd.f32 %v4294_v8, %v4278_v62 }
  0xb3   : > { %v5343_v46 = vpop.permute.xlu0 %633 }
  0xb4   : > { %4826 = vset.pattern.permute.xlu0 %v7437_v1  ;;  %v5375_v24 = vsel %vm7431_vm13, %v593_v63, 4294967295  ;;  %v5377_v55 = vadd.f32 %v4341_v29, %v933_v16  ;;  %v446_v16 = vld [vmem:[%s5208_s26 + $0x30] sm:$0xff]  ;;  %v4279_v29 = vsel %vm487_vm14, 1.0, %v7474_v57  ;;  %vm488_vm14 = vcmp.eq.s32.totalorder %v4960_v18, %v5032_v47 }
  0xb5   : > { %v846_v30 = vpop.permute.xlu1 %845  ;;  %878 = vperm.xlu0 %4826, %v5375_v24  }
  0xb6   : > { %1546 = vmatmul.f32.gmra.mxu1 %v5348_v31  ;;  %vm886_vm9 = vcmp.eq.s32.totalorder %v5032_v47, %v846_v30 }
  0xb7   : > { %4814 = vset.pattern.permute.xlu1 %v7437_v1  ;;  %v4326_v62 = vsel %vm886_vm9, 1.0, %v7474_v57  ;;  %vm664_vm9 = vcmp.eq.s32.totalorder %v5032_v47, %v5340_v61 }
  0xb8   : > { %869 = vperm.xlu1 %4814, %v606_v38   ;;  %v4296_v61 = vsel %vm664_vm9, 1.0, %v7474_v57  ;;  %vm489_vm9 = vcmp.eq.s32.totalorder %v5074_v54, %v5032_v47 }
  0xb9   : > { %4815 = vset.pattern.permute.xlu2 %v4863_v25 }
  0xba   : > { %981 = vperm.xlu2 %4815, %v606_v38   ;;  %v5381_v20 = vpop.permute.xlu2 %851  ;;  %4393 = vmatmul.msk.f32.gmra.mxu0 %vm7442_vm11, %v446_v16 }
  0xbc   : > { %v734_v35 = vpop.permute.xlu0 %733 }
  0xbd   : > { %vm774_vm10 = vcmp.eq.s32.totalorder %v5032_v47, %v734_v35  ;;  %4831 = vset.pattern.permute.xlu0 %v4863_v25 }
  0xbe   : > { %v4310_v38 = vsel %vm774_vm10, 1.0, %v7474_v57  ;;  %v625_v58 = vpop.permute.xlu1 %624  ;;  %1549 = vmatmul.f32.gmra.mxu1 %v5377_v55 }
  0xbf   : > { %v822_v63 = vadd.f32 %v4310_v38, %v710_v45  ;;  %vm663_vm13 = vcmp.eq.s32.totalorder %v5032_v47, %v625_v58  ;;  %v4311_v45 = vsel %vm775_vm8, 1.0, %v7474_v57 }
  0xc0   : > { %v4295_v30 = vsel %vm663_vm13, 1.0, %v7474_v57  ;;  %4817 = vset.pattern.permute.xlu1 %v7435_v2  ;;  %vm887_vm13 = vcmp.eq.s32.totalorder %v5032_v47, %v5220_v22 }
  0xc1   : > { %v934_v8 = vadd.f32 %v4326_v62, %v822_v63  ;;  %760 = vperm.xlu1 %4817, %v5250_v44   ;;  %v711_v35 = vadd.f32 %v4295_v30, %v4279_v29  ;;  %v447_v63 = vld [vmem:[%s5208_s26 + $0x38] sm:$0xff]  ;;  %v4327_v29 = vsel %vm887_vm13, 1.0, %v7474_v57  ;;  %v546_v30 = vshra.s32 %v5410_v53, 3 }
  0xc2   : > { %4818 = vset.pattern.permute.xlu2 %v7437_v1  ;;  %4394 = vmatmul.msk.f32.gmra.mxu0 %vm7442_vm11, %v447_v63  ;;  %v5434_v63 = vpop.f32.mrf.mxu0  ;;  %vm888_vm13 = vcmp.eq.s32.totalorder %v5032_v47, %v5381_v20 }
  0xc3   : > { %v5402_v38 = vadd.f32 %v4342_v28, %v934_v8  ;;  %872 = vperm.xlu2 %4818, %v5250_v44   ;;  %v823_v58 = vadd.f32 %v4311_v45, %v711_v35  ;;  %v5413_v16 = vpop.permute.xlu2 %742  ;;  %v562_v8 = vshll.u32 %v546_v30, 3  ;;  %v5424_v35 = vld [vmem:[%s5096_s17 + $0x38] sm:$0xff] }
  0xc4   : > { %vm7463_vm10 = vcmp.ge.s32.totalorder %v5424_v35, 0 }
  0xc5   : > { %v935_v28 = vadd.f32 %v4327_v29, %v823_v58  ;;  %v594_v45 = vadd.s32 %v562_v8, %v5424_v35  ;;  %v4280_v58 = vsel %vm488_vm14, 1.0, %v7474_v57 }
  0xc6   : > { %1552 = vmatmul.f32.gmra.mxu1 %v5402_v38  ;;  %v712_v8 = vadd.f32 %v4296_v61, %v4280_v58 }
  0xc7   : > { %v961_v62 = vpop.permute.xlu1 %960  ;;  %v5446_v29 = vsel %vm7463_vm10, %v594_v45, 4294967295  ;;  %v4328_v45 = vsel %vm888_vm13, 1.0, %v7474_v57 }
  0xc8   : > { %vm999_vm8 = vcmp.eq.s32.totalorder %v5032_v47, %v961_v62  ;;  %993 = vperm.xlu0 %4831, %v5446_v29  }
  0xc9   : > { %v4343_v22 = vsel %vm999_vm8, 1.0, %v7474_v57  ;;  %4819 = vset.pattern.permute.xlu1 %v4863_v25  ;;  %vm1000_vm8 = vcmp.eq.s32.totalorder %v5032_v47, %v5236_v33 }
  0xca   : > { %984 = vperm.xlu1 %4819, %v5250_v44   ;;  %v5431_v62 = vadd.f32 %v4343_v22, %v935_v28  ;;  %v2009_v44 = vld [vmem:[%s7424_s6 + $0x38] sm:$0xff]  ;;  %v5461_v51 = vpop.f32.mrf.mxu0 }
  0xcb   : > { %4820 = vset.pattern.permute.xlu2 %v7438_v4  ;;  %2025 = vmatpush.msrb.mxu0 %v2009_v44  ;;  %v4344_v44 = vsel %vm1000_vm8, 1.0, %v7474_v57  ;;  %vm777_vm8 = vcmp.eq.s32.totalorder %v5032_v47, %v5413_v16 }
  0xcc   : > { %651 = vperm.xlu2 %4820, %v5327_v5   ;;  %v967_v22 = vpop.permute.xlu2 %966  ;;  %4459 = vmatmul.msk.f32.vlgmr.msrb.gmra.mxu0 %vm7468_vm15, %v5434_v63 }
  0xce   : > { %1555 = vmatmul.f32.gmra.mxu1 %v5431_v62 }
  0xd0   : > { %v740_v30 = vpop.permute.xlu1 %739 }
  0xd1   : > { %vm776_vm14 = vcmp.eq.s32.totalorder %v5032_v47, %v740_v30  ;;  %v4281_v30 = vsel %vm489_vm9, 1.0, %v7474_v57 }
  0xd2   : > { %v4312_v28 = vsel %vm776_vm14, 1.0, %v7474_v57  ;;  %4822 = vset.pattern.permute.xlu1 %v7437_v1  ;;  %vm1001_vm14 = vcmp.eq.s32.totalorder %v5032_v47, %v967_v22 }
  0xd3   : > { %v824_v20 = vadd.f32 %v4312_v28, %v712_v8  ;;  %875 = vperm.xlu1 %4822, %v5327_v5   ;;  %v7528_v8 = vmov 1   ;;  %v4345_v16 = vsel %vm1001_vm14, 1.0, %v7474_v57 }
  0xd4   : > { %4823 = vset.pattern.permute.xlu2 %v4863_v25  ;;  %4460 = vmatmul.msk.f32.gmra.mxu0 %vm7468_vm15, %v5461_v51 }
  0xd5   : > { %v936_v2 = vadd.f32 %v4328_v45, %v824_v20  ;;  %987 = vperm.xlu2 %4823, %v5327_v5   ;;  %v858_v61 = vpop.permute.xlu2 %857  ;;  %v4313_v45 = vsel %vm777_vm8, 1.0, %v7474_v57  ;;  %vm666_vm8 = vcmp.eq.s32.totalorder %v5032_v47, %v5343_v46  ;;  %v7531_v46 = vmov 2  }
  0xd7   : > { %v5465_v33 = vadd.f32 %v4344_v44, %v936_v2  ;;  %v5477_v2 = vpop.f32.mrf.mxu0 }
  0xd9   : > { %7527 = vst [vmem:[#allocation23_spill] sm:$0xff] %v5465_v33  ;;  %v631_v58 = vpop.permute.xlu1 %630  ;;  %1558 = vmatmul.f32.gmra.mxu1 %v5465_v33 }
  0xda   : > { %vm665_vm13 = vcmp.eq.s32.totalorder %v5032_v47, %v631_v58 }
  0xdb   : > { %4824 = vset.pattern.permute.xlu1 %v7438_v4  ;;  %v4297_v5 = vsel %vm665_vm13, 1.0, %v7474_v57  ;;  %vm490_vm13 = vcmp.eq.s32.totalorder %v5004_v36, %v5032_v47 }
  0xdc   : > { %654 = vperm.xlu1 %4824, %v5375_v24   ;;  %v713_v28 = vadd.f32 %v4297_v5, %v4281_v30  ;;  %4461 = vmatmul.msk.f32.gmra.mxu0 %vm7468_vm15, %v5477_v2 }
  0xdd   : > { %4825 = vset.pattern.permute.xlu2 %v7528_v8 }
  0xde   : > { %766 = vperm.xlu2 %4825, %v5375_v24   ;;  %v825_v44 = vadd.f32 %v4313_v45, %v713_v28  ;;  %v637_v30 = vpop.permute.xlu2 %636 }
  0xdf   : > { %v5491_v5 = vpop.f32.mrf.mxu0 }
  0xe2   : > { %v855_v20 = vpop.permute.xlu1 %854 }
  0xe3   : > { %vm889_vm9 = vcmp.eq.s32.totalorder %v5032_v47, %v855_v20 }
  0xe4   : > { %v4329_v58 = vsel %vm889_vm9, 1.0, %v7474_v57  ;;  %4827 = vset.pattern.permute.xlu1 %v4863_v25  ;;  %4462 = vmatmul.msk.f32.gmra.mxu0 %vm7468_vm15, %v5491_v5  ;;  %vm890_vm9 = vcmp.eq.s32.totalorder %v5032_v47, %v858_v61  ;;  %v749_v61 = vpop.permute.xlu0 %748 }
  0xe5   : > { %v937_v1 = vadd.f32 %v4329_v58, %v825_v44  ;;  %990 = vperm.xlu1 %4827, %v5375_v24   ;;  %v4282_v24 = vsel %vm490_vm13, 1.0, %v7474_v57  ;;  %v4330_v58 = vsel %vm890_vm9, 1.0, %v7474_v57  ;;  %vm491_vm13 = vcmp.eq.s32.totalorder %v5088_v60, %v5032_v47 }
  0xe6   : > { %4828 = vset.pattern.permute.xlu2 %v7530_v52  ;;  %vm779_vm9 = vcmp.eq.s32.totalorder %v5032_v47, %v749_v61 }
  0xe7   : > { %v5494_v4 = vadd.f32 %v4345_v16, %v937_v1  ;;  %657 = vperm.xlu2 %4828, %v5446_v29   ;;  %v4298_v1 = vsel %vm666_vm8, 1.0, %v7474_v57  ;;  %v5508_v22 = vpop.f32.mrf.mxu0  ;;  %v973_v45 = vpop.permute.xlu2 %972  ;;  %vm667_vm8 = vcmp.eq.s32.totalorder %v5032_v47, %v637_v30 }
  0xe8   : > { %v714_v20 = vadd.f32 %v4298_v1, %v4282_v24  ;;  %vm1003_vm11 = vcmp.eq.s32.totalorder %v5032_v47, %v973_v45 }
  0xe9   : > { %7529 = vst [vmem:[#allocation24_spill] sm:$0xff] %v5494_v4  ;;  %1561 = vmatmul.f32.gmra.mxu1 %v5494_v4  ;;  %v4347_v61 = vsel %vm1003_vm11, 1.0, %v7474_v57 }
  0xeb   : > { %v746_v25 = vpop.permute.xlu1 %745 }
  0xec   : > { %vm778_vm14 = vcmp.eq.s32.totalorder %v5032_v47, %v746_v25  ;;  %4463 = vmatmul.msk.f32.gmra.mxu0 %vm7468_vm15, %v5508_v22 }
  0xed   : > { %4829 = vset.pattern.permute.xlu1 %v7528_v8  ;;  %v4314_v28 = vsel %vm778_vm14, 1.0, %v7474_v57 }
  0xee   : > { %769 = vperm.xlu1 %4829, %v5446_v29   ;;  %v826_v44 = vadd.f32 %v4314_v28, %v714_v20  ;;  %v4299_v28 = vsel %vm667_vm8, 1.0, %v7474_v57  ;;  %vm492_vm8 = vcmp.eq.s32.totalorder %v5128_v15, %v5032_v47 }
  0xef   : > { %4830 = vset.pattern.permute.xlu2 %v7531_v46  ;;  %v5522_v8 = vpop.f32.mrf.mxu0  ;;  %v4315_v46 = vsel %vm779_vm9, 1.0, %v7474_v57 }
  0xf0   : > { %881 = vperm.xlu2 %4830, %v5446_v29   ;;  %v938_v25 = vadd.f32 %v4330_v58, %v826_v44  ;;  %v4283_v29 = vsel %vm491_vm13, 1.0, %v7474_v57  ;;  %v752_v20 = vpop.permute.xlu2 %751 }
  0xf1   : > { %v715_v30 = vadd.f32 %v4299_v28, %v4283_v29  ;;  %v4284_v28 = vsel %vm492_vm8, 1.0, %v7474_v57  ;;  %vm7464_vm8 = vcmask 31744  }
  0xf4   : > { %v970_v16 = vpop.permute.xlu1 %969  ;;  %4464 = vmatmul.msk.f32.gmra.mxu0 %vm7468_vm15, %v5522_v8 }
  0xf5   : > { %vm1002_vm14 = vcmp.eq.s32.totalorder %v5032_v47, %v970_v16  ;;  %v827_v16 = vadd.f32 %v4315_v46, %v715_v30  ;;  %v1593_v46 = vld [vmem:[%s7424_s6 + $0x8] sm:$0xff] }
  0xf6   : > { %v4346_v24 = vsel %vm1002_vm14, 1.0, %v7474_v57  ;;  %vm780_vm14 = vcmp.eq.s32.totalorder %v5032_v47, %v752_v20  ;;  %1772 = vmatpush.msra.mxu3 %v1593_v46  ;;  %v1594_v20 = vld [vmem:[%s7424_s6 + $0x10] sm:$0xff] }
  0xf7   : > { %v5526_v1 = vadd.f32 %v4346_v24, %v938_v25  ;;  %v5536_v44 = vpop.f32.mrf.mxu0  ;;  %1659 = vmatpush.msra.mxu2 %v1594_v20 }
  0xf8   : > { %4411 = vmatmul.msk.f32.vlgmr.msra.gmra.mxu2 %vm7468_vm15, %v5434_v63 }
  0xf9   : > { %7532 = vst [vmem:[#allocation25_spill] sm:$0xff] %v5526_v1  ;;  %1564 = vmatmul.f32.gmra.mxu1 %v5526_v1  ;;  %v643_v29 = vpop.permute.xlu2 %642 }
  0xfc   : > { %4465 = vmatmul.msk.f32.gmra.mxu0 %vm7468_vm15, %v5536_v44 }
  0xfd   : > { %v861_v58 = vpop.permute.xlu1 %860 }
  0xfe   : > { %vm891_vm13 = vcmp.eq.s32.totalorder %v5032_v47, %v861_v58  ;;  %v864_v58 = vpop.permute.xlu0 %863 }
  0xff   : > { %v4331_v25 = vsel %vm891_vm13, 1.0, %v7474_v57  ;;  %v5548_v45 = vpop.f32.mrf.mxu0  ;;  %vm892_vm9 = vcmp.eq.s32.totalorder %v5032_v47, %v864_v58 }
 0x100   : > { %v939_v24 = vadd.f32 %v4331_v25, %v827_v16  ;;  %4412 = vmatmul.msk.f32.gmra.mxu2 %vm7468_vm15, %v5461_v51 }
 0x102   : > { %v5543_v50 = vadd.f32 %v4347_v61, %v939_v24  ;;  %v4316_v61 = vsel %vm780_vm14, 1.0, %v7474_v57  ;;  %v1592_v24 = vld [vmem:[%s7424_s6] sm:$0xff]  ;;  %v867_v46 = vpop.permute.xlu2 %866  ;;  %vm493_vm14 = vcmp.eq.s32.totalorder %v5170_v39, %v5032_v47 }
 0x103   : > { %1773 = vmatpush.msra.mxu3 %v1592_v24 }
 0x104   : > { %7533 = vst [vmem:[#allocation26_spill] sm:$0xff] %v5543_v50  ;;  %1567 = vmatmul.f32.gmra.mxu1 %v5543_v50  ;;  %4466 = vmatmul.msk.f32.gmra.mxu0 %vm7468_vm15, %v5548_v45 }
 0x106   : > { %v640_v30 = vpop.permute.xlu1 %639 }
 0x107   : > { %vm668_vm11 = vcmp.eq.s32.totalorder %v5032_v47, %v640_v30  ;;  %v5567_v49 = vpop.f32.mrf.mxu0 }
 0x108   : > { %v4300_v16 = vsel %vm668_vm11, 1.0, %v7474_v57  ;;  %vm669_vm11 = vcmp.eq.s32.totalorder %v5032_v47, %v643_v29  ;;  %4413 = vmatmul.msk.f32.gmra.mxu2 %vm7468_vm15, %v5477_v2 }
 0x109   : > { %v716_v25 = vadd.f32 %v4300_v16, %v4284_v28  ;;  %v4332_v28 = vsel %vm892_vm9, 1.0, %v7474_v57  ;;  %v4301_v11 = vsel %vm669_vm11, 1.0, %v7474_v57 }
 0x10b   : > { %v828_v30 = vadd.f32 %v4316_v61, %v716_v25  ;;  %v1059_v25 = vsel %vm563_vm0, 1, %v7530_v52  ;;  %vm893_vm0 = vcmp.eq.s32.totalorder %v5032_v47, %v867_v46  ;;  %v1060_v46 = vsel %vm564_vm1, 1, %v7530_v52 }
 0x10c   : > { %4467 = vmatmul.msk.f32.gmra.mxu0 %vm7468_vm15, %v5567_v49  ;;  %v1076_v61 = vsel %vm7464_vm8, %v1059_v25, 0  ;;  %v4333_v4 = vsel %vm893_vm0, 1.0, %v7474_v57  ;;  %vm494_vm1 = vcmp.eq.s32.totalorder %v5243_v41, %v5032_v47  ;;  %vm7469_vm0 = vcmask 130048  }
 0x10d   : > { %v940_v16 = vadd.f32 %v4332_v28, %v828_v30  ;;  %v4285_v30 = vsel %vm493_vm14, 1.0, %v7474_v57  ;;  %v979_v28 = vpop.permute.xlu0 %978  ;;  %v1077_v50 = vand.u32 65535, %v1076_v61 }
 0x10f   : > { %v976_v58 = vpop.permute.xlu1 %975  ;;  %v5586_v24 = vpop.f32.mrf.mxu0  ;;  %v1079_v25 = vcvt.s32.f32 %v1077_v50 }
 0x110   : > { %vm1004_vm13 = vcmp.eq.s32.totalorder %v5032_v47, %v976_v58  ;;  %v758_v58 = vpop.permute.xlu2 %757  ;;  %4414 = vmatmul.msk.f32.gmra.mxu2 %vm7468_vm15, %v5491_v5 }
 0x111   : > { %v4348_v48 = vsel %vm1004_vm13, 1.0, %v7474_v57  ;;  %vm1005_vm13 = vcmp.eq.s32.totalorder %v5032_v47, %v979_v28  ;;  %vm782_vm11 = vcmp.eq.s32.totalorder %v5032_v47, %v758_v58  ;;  %v1062_v58 = vsel %vm566_vm5, 1, %v7530_v52 }
 0x112   : > { %v5576_v20 = vadd.f32 %v4348_v48, %v940_v16  ;;  %v1078_v48 = vshrl.u32 %v1076_v61, 16  ;;  %v4318_v32 = vsel %vm782_vm11, 1.0, %v7474_v57  ;;  %vm495_vm5 = vcmp.eq.s32.totalorder %v5227_v10, %v5032_v47 }
 0x114   : > { %7534 = vst [vmem:[#allocation27_spill] sm:$0xff] %v5576_v20  ;;  %1570 = vmatmul.f32.gmra.mxu1 %v5576_v20  ;;  %v1080_v16 = vcvt.s32.f32 %v1078_v48  ;;  %4468 = vmatmul.msk.f32.gmra.mxu0 %vm7468_vm15, %v5586_v24  ;;  %v717_v20 = vadd.f32 %v4301_v11, %v4285_v30  ;;  %v1089_v48 = vsel %vm7464_vm8, %v1060_v46, 0  ;;  %v4286_v46 = vsel %vm494_vm1, 1.0, %v7474_v57 }
 0x115   : > { %v1091_v50 = vshrl.u32 %v1089_v48, 16 }
 0x117   : > { %v5606_v11 = vpop.f32.mrf.mxu0  ;;  %v1093_v28 = vcvt.s32.f32 %v1091_v50 }
 0x118   : > { %v755_v29 = vpop.permute.xlu1 %754  ;;  %1083 = vadd.xlane.f32.xlu1 %v1080_v16  ;;  %v4349_v16 = vsel %vm1005_vm13, 1.0, %v7474_v57  ;;  %4415 = vmatmul.msk.f32.gmra.mxu2 %vm7468_vm15, %v5508_v22 }
 0x119   : > { %vm781_vm9 = vcmp.eq.s32.totalorder %v5032_v47, %v755_v29  ;;  %1081 = vadd.xlane.f32.xlu2 %v1079_v25  ;;  %v1090_v29 = vand.u32 65535, %v1089_v48  ;;  %v982_v25 = vpop.permute.xlu2 %981  ;;  %1096 = vadd.xlane.f32.xlu0 %v1093_v28 }
 0x11a   : > { %v4317_v1 = vsel %vm781_vm9, 1.0, %v7474_v57 }
 0x11b   : > { %v829_v61 = vadd.f32 %v4317_v1, %v717_v20  ;;  %v1092_v12 = vcvt.s32.f32 %v1090_v29 }
 0x11c   : > { %4469 = vmatmul.msk.f32.gmra.mxu0 %vm7468_vm15, %v5606_v11 }
 0x11d   : > { %v941_v30 = vadd.f32 %v4333_v4, %v829_v61  ;;  %v1061_v4 = vsel %vm565_vm4, 1, %v7530_v52  ;;  %vm1006_vm4 = vcmp.eq.s32.totalorder %v5032_v47, %v982_v25  ;;  %v649_v25 = vpop.permute.xlu0 %648 }
 0x11e   : > { %v1102_v20 = vsel %vm7464_vm8, %v1061_v4, 0  ;;  %vm671_vm13 = vcmp.eq.s32.totalorder %v5032_v47, %v649_v25 }
 0x11f   : > { %v5608_v33 = vadd.f32 %v4349_v16, %v941_v30  ;;  %v1104_v48 = vshrl.u32 %v1102_v20, 16  ;;  %v5625_v16 = vpop.f32.mrf.mxu0  ;;  %v1103_v30 = vand.u32 65535, %v1102_v20 }
 0x120   : > { %4416 = vmatmul.msk.f32.gmra.mxu2 %vm7468_vm15, %v5522_v8 }
 0x121   : > { %7535 = vst [vmem:[#allocation28_spill] sm:$0xff] %v5608_v33  ;;  %v646_v1 = vpop.permute.xlu1 %645  ;;  %1573 = vmatmul.f32.gmra.mxu1 %v5608_v33  ;;  %1094 = vadd.xlane.f32.xlu2 %v1092_v12  ;;  %v1106_v50 = vcvt.s32.f32 %v1104_v48  ;;  %v1105_v29 = vcvt.s32.f32 %v1103_v30  ;;  %v4350_v48 = vsel %vm1006_vm4, 1.0, %v7474_v57 }
 0x122   : > { %vm670_vm14 = vcmp.eq.s32.totalorder %v5032_v47, %v646_v1  ;;  %v873_v1 = vpop.permute.xlu2 %872 }
 0x123   : > { %v4302_v61 = vsel %vm670_vm14, 1.0, %v7474_v57  ;;  %1109 = vadd.xlane.f32.xlu1 %v1106_v50  ;;  %vm496_vm14 = vcmp.eq.s32.totalorder %v5278_v14, %v5032_v47 }
 0x124   : > { %v718_v28 = vadd.f32 %v4302_v61, %v4286_v46  ;;  %4470 = vmatmul.msk.f32.gmra.mxu0 %vm7468_vm15, %v5625_v16  ;;  %v1115_v46 = vsel %vm7464_vm8, %v1062_v58, 0  ;;  %v4287_v58 = vsel %vm495_vm5, 1.0, %v7474_v57 }
 0x125   : > { %v1117_v50 = vshrl.u32 %v1115_v46, 16 }
 0x126   : > { %v830_v4 = vadd.f32 %v4318_v32, %v718_v28  ;;  %v1116_v32 = vand.u32 65535, %v1115_v46 }
 0x127   : > { %v5641_v40 = vpop.f32.mrf.mxu0  ;;  %v1119_v28 = vcvt.s32.f32 %v1117_v50 }
 0x128   : > { %4417 = vmatmul.msk.f32.gmra.mxu2 %vm7468_vm15, %v5536_v44 }
 0x129   : > { %1107 = vadd.xlane.f32.xlu2 %v1105_v29 }
 0x12a   : > { %v870_v12 = vpop.permute.xlu1 %869  ;;  %v652_v25 = vpop.permute.xlu2 %651 }
 0x12b   : > { %vm894_vm9 = vcmp.eq.s32.totalorder %v5032_v47, %v870_v12  ;;  %v1544_v20 = vpop.f32.mrf.mxu1  ;;  %1122 = vadd.xlane.f32.xlu1 %v1119_v28  ;;  %v1118_v12 = vcvt.s32.f32 %v1116_v32  ;;  %vm672_vm11 = vcmp.eq.s32.totalorder %v5032_v47, %v652_v25  ;;  %v4288_v25 = vsel %vm496_vm14, 1.0, %v7474_v57 }
 0x12c   : > { %v4334_v61 = vsel %vm894_vm9, 1.0, %v7474_v57  ;;  %4427 = vmatmul.msk.f32.vlgmr.msra.gmra.mxu3 %vm7469_vm0, %v1544_v20  ;;  %4471 = vmatmul.msk.f32.gmra.mxu0 %vm7468_vm15, %v5641_v40  ;;  %v1063_v20 = vsel %vm567_vm2, 1, %v7530_v52  ;;  %vm895_vm2 = vcmp.eq.s32.totalorder %v5032_v47, %v873_v1 }
 0x12d   : > { %v942_v30 = vadd.f32 %v4334_v61, %v830_v4  ;;  %v4303_v4 = vsel %vm671_vm13, 1.0, %v7474_v57  ;;  %vm497_vm13 = vcmp.eq.s32.totalorder %v5346_v19, %v5032_v47 }
 0x12e   : > { %v4289_v59 = vsel %vm497_vm13, 1.0, %v7474_v57  ;;  %vm7538_vm13 = vcmp.ge.s32.totalorder %v5136_v21, 0 }
 0x12f   : > { %v5643_v29 = vadd.f32 %v4350_v48, %v942_v30  ;;  %v1128_v48 = vsel %vm7464_vm8, %v1063_v20, 0  ;;  %v719_v30 = vadd.f32 %v4303_v4, %v4287_v58  ;;  %v5661_v28 = vpop.f32.mrf.mxu0  ;;  %v764_v58 = vpop.permute.xlu0 %763 }
 0x130   : > { %v1130_v50 = vshrl.u32 %v1128_v48, 16  ;;  %vm784_vm9 = vcmp.eq.s32.totalorder %v5032_v47, %v764_v58  ;;  %4418 = vmatmul.msk.f32.gmra.mxu2 %vm7468_vm15, %v5548_v45 }
 0x131   : > { %7536 = vst [vmem:[#allocation29_spill] sm:$0xff] %v5643_v29  ;;  %1576 = vmatmul.f32.gmra.mxu1 %v5643_v29  ;;  %1120 = vadd.xlane.f32.xlu2 %v1118_v12  ;;  %v1129_v12 = vand.u32 65535, %v1128_v48  ;;  %v1064_v48 = vsel %vm568_vm3, 1, %v7530_v52 }
 0x132   : > { %v1132_v17 = vcvt.s32.f32 %v1130_v50  ;;  %v988_v50 = vpop.permute.xlu2 %987 }
 0x133   : > { %v761_v46 = vpop.permute.xlu1 %760  ;;  %v1547_v61 = vpop.f32.mrf.mxu1  ;;  %v1131_v20 = vcvt.s32.f32 %v1129_v12  ;;  %vm1008_vm3 = vcmp.eq.s32.totalorder %v5032_v47, %v988_v50  ;;  %v2374_v50 = vld [vmem:[%s7424_s6 + $0x60] sm:$0xff] }
 0x134   : > { %vm783_vm1 = vcmp.eq.s32.totalorder %v5032_v47, %v761_v46  ;;  %4428 = vmatmul.msk.f32.gmra.mxu3 %vm7469_vm0, %v1547_v61  ;;  %4472 = vmatmul.msk.f32.gmra.mxu0 %vm7468_vm15, %v5661_v28  ;;  %v4335_v61 = vsel %vm895_vm2, 1.0, %v7474_v57 }
 0x135   : > { %v4319_v32 = vsel %vm783_vm1, 1.0, %v7474_v57  ;;  %1135 = vadd.xlane.f32.xlu0 %v1132_v17  ;;  %1133 = vadd.xlane.f32.xlu1 %v1131_v20  ;;  %v4304_v17 = vsel %vm672_vm11, 1.0, %v7474_v57  ;;  %vm498_vm11 = vcmp.eq.s32.totalorder %v5410_v53, %v5032_v47 }
 0x136   : > { %v831_v46 = vadd.f32 %v4319_v32, %v719_v30  ;;  %v1141_v30 = vsel %vm7464_vm8, %v1064_v48, 0  ;;  %v720_v20 = vadd.f32 %v4304_v17, %v4288_v25  ;;  %2390 = vmatpush.msra.mxu0 %v2374_v50 }
 0x137   : > { %v5675_v4 = vpop.f32.mrf.mxu0  ;;  %v1143_v12 = vshrl.u32 %v1141_v30, 16 }
 0x138   : > { %v943_v1 = vadd.f32 %v4335_v61, %v831_v46  ;;  %v4320_v46 = vsel %vm784_vm9, 1.0, %v7474_v57  ;;  %4419 = vmatmul.msk.f32.gmra.mxu2 %vm7468_vm15, %v5567_v49 }
 0x139   : > { %v1145_v26 = vcvt.s32.f32 %v1143_v12  ;;  %v832_v48 = vadd.f32 %v4320_v46, %v720_v20 }
 0x13a   : > { %v767_v12 = vpop.permute.xlu2 %766 }
 0x13b   : > { %v1550_v29 = vpop.f32.mrf.mxu1  ;;  %1148 = vadd.xlane.f32.xlu2 %v1145_v26  ;;  %v1065_v26 = vsel %vm569_vm12, 1, %v7530_v52  ;;  %vm785_vm12 = vcmp.eq.s32.totalorder %v5032_v47, %v767_v12 }
 0x13c   : > { %v985_v33 = vpop.permute.xlu1 %984  ;;  %4429 = vmatmul.msk.f32.gmra.mxu3 %vm7469_vm0, %v1550_v29  ;;  %4473 = vmatmul.msk.f32.gmra.mxu0 %vm7468_vm15, %v5675_v4  ;;  %v1154_v20 = vsel %vm7464_vm8, %v1065_v26, 0  ;;  %v4321_v26 = vsel %vm785_vm12, 1.0, %v7474_v57 }
 0x13d   : > { %vm1007_vm4 = vcmp.eq.s32.totalorder %v5032_v47, %v985_v33  ;;  %v1142_v33 = vand.u32 65535, %v1141_v30  ;;  %v4352_v30 = vsel %vm1008_vm3, 1.0, %v7474_v57 }
 0x13e   : > { %v4351_v29 = vsel %vm1007_vm4, 1.0, %v7474_v57 }
 0x13f   : > { %v5682_v32 = vadd.f32 %v4351_v29, %v943_v1  ;;  %v1144_v1 = vcvt.s32.f32 %v1142_v33  ;;  %v5698_v25 = vpop.f32.mrf.mxu0 }
 0x140   : > { %4420 = vmatmul.msk.f32.gmra.mxu2 %vm7468_vm15, %v5586_v24 }
 0x141   : > { %1579 = vmatmul.f32.gmra.mxu1 %v5682_v32  ;;  %1146 = vadd.xlane.f32.xlu0 %v1144_v1  ;;  %v1155_v1 = vand.u32 65535, %v1154_v20 }
 0x143   : > { %v1553_v61 = vpop.f32.mrf.mxu1 }
 0x144   : > { %4430 = vmatmul.msk.f32.gmra.mxu3 %vm7469_vm0, %v1553_v61  ;;  %4474 = vmatmul.msk.f32.gmra.mxu0 %vm7468_vm15, %v5698_v25  ;;  %v1156_v61 = vshrl.u32 %v1154_v20, 16  ;;  %v658_v20 = vpop.permute.xlu2 %657 }
 0x145   : > { %v876_v58 = vpop.permute.xlu1 %875  ;;  %vm674_vm4 = vcmp.eq.s32.totalorder %v5032_v47, %v658_v20 }
 0x146   : > { %vm896_vm5 = vcmp.eq.s32.totalorder %v5032_v47, %v876_v58  ;;  %v1158_v58 = vcvt.s32.f32 %v1156_v61 }
 0x147   : > { %v4336_v29 = vsel %vm896_vm5, 1.0, %v7474_v57 }
 0x148   : > { %v944_v17 = vadd.f32 %v4336_v29, %v832_v48  ;;  %v1157_v48 = vcvt.s32.f32 %v1155_v1  ;;  %1161 = vadd.xlane.f32.xlu1 %v1158_v58  ;;  %4421 = vmatmul.msk.f32.gmra.mxu2 %vm7468_vm15, %v5606_v11 }
 0x14a   : > { %v5708_v33 = vadd.f32 %v4352_v30, %v944_v17  ;;  %v879_v30 = vpop.permute.xlu0 %878  ;;  %1159 = vadd.xlane.f32.xlu2 %v1157_v48 }
 0x14b   : > { %v1556_v46 = vpop.f32.mrf.mxu1  ;;  %vm897_vm2 = vcmp.eq.s32.totalorder %v5032_v47, %v879_v30  ;;  %v4306_v30 = vsel %vm674_vm4, 1.0, %v7474_v57 }
 0x14c   : > { %1582 = vmatmul.f32.gmra.mxu1 %v5708_v33  ;;  %4431 = vmatmul.msk.f32.gmra.mxu3 %vm7469_vm0, %v1556_v46  ;;  %v4337_v61 = vsel %vm897_vm2, 1.0, %v7474_v57 }
 0x14d   : > { %4507 = vmatmul.msk.f32.vlgmr.msra.gmra.mxu0 %vm7468_vm15, %v5434_v63 }
 0x14e   : > { %v655_v29 = vpop.permute.xlu1 %654 }
 0x14f   : > { %vm673_vm1 = vcmp.eq.s32.totalorder %v5032_v47, %v655_v29  ;;  %v4290_v29 = vsel %vm498_vm11, 1.0, %v7474_v57 }
 0x150   : > { %v4305_v17 = vsel %vm673_vm1, 1.0, %v7474_v57  ;;  %v722_v20 = vadd.f32 %v4306_v30, %v4290_v29  ;;  %4422 = vmatmul.msk.f32.gmra.mxu2 %vm7468_vm15, %v5625_v16 }
 0x151   : > { %v721_v50 = vadd.f32 %v4305_v17, %v4289_v59  ;;  %v882_v59 = vpop.permute.xlu2 %881 }
 0x152   : > { %v994_v17 = vpop.permute.xlu0 %993  ;;  %vm898_vm9 = vcmp.eq.s32.totalorder %v5032_v47, %v882_v59 }
 0x153   : > { %v833_v46 = vadd.f32 %v4321_v26, %v721_v50  ;;  %vm1010_vm5 = vcmp.eq.s32.totalorder %v5032_v47, %v994_v17 }
 0x155   : > { %v945_v58 = vadd.f32 %v4337_v61, %v833_v46  ;;  %4508 = vmatmul.msk.f32.gmra.mxu0 %vm7468_vm15, %v5461_v51  ;;  %v1066_v51 = vsel %vm570_vm6, 1, %v7530_v52  ;;  %vm7537_vm6 = vcmp.ge.s32.totalorder %v5104_v0, 0 }
 0x156   : > { %v1559_v12 = vpop.f32.mrf.mxu1  ;;  %v1167_v50 = vsel %vm7464_vm8, %v1066_v51, 0 }
 0x157   : > { %v991_v1 = vpop.permute.xlu1 %990  ;;  %4432 = vmatmul.msk.f32.gmra.mxu3 %vm7469_vm0, %v1559_v12  ;;  %v1169_v26 = vshrl.u32 %v1167_v50, 16  ;;  %v1168_v61 = vand.u32 65535, %v1167_v50 }
 0x158   : > { %vm1009_vm14 = vcmp.eq.s32.totalorder %v5032_v47, %v991_v1  ;;  %v4338_v1 = vsel %vm898_vm9, 1.0, %v7474_v57  ;;  %4423 = vmatmul.msk.f32.gmra.mxu2 %vm7468_vm15, %v5641_v40  ;;  %vm7552_vm9 = vcmp.ge.s32.totalorder %v5181_v56, 0  ;;  %v1469_v56 = vand.u32 31, %v5074_v54 }
 0x159   : > { %v4353_v63 = vsel %vm1009_vm14, 1.0, %v7474_v57  ;;  %v1171_v42 = vcvt.s32.f32 %v1169_v26  ;;  %v1170_v59 = vcvt.s32.f32 %v1168_v61  ;;  %v1476_v61 = vand.u32 31, %v5278_v14 }
 0x15a   : > { %v5733_v48 = vadd.f32 %v4353_v63, %v945_v58  ;;  %v1067_v58 = vsel %vm7537_vm6, 1, %v7530_v52 }
 0x15b   : > { %1174 = vadd.xlane.f32.xlu0 %v1171_v42  ;;  %v1180_v29 = vsel %vm7464_vm8, %v1067_v58, 0  ;;  %1172 = vadd.xlane.f32.xlu1 %v1170_v59  ;;  %v1477_v42 = vand.u32 31, %v5346_v19  ;;  %v7543_v58 = vmov 1.0   ;;  %vm5793_vm2 = vcmp.eq.s32.totalorder %v1476_v61, %v5032_v47 }
 0x15c   : > { %1585 = vmatmul.f32.gmra.mxu1 %v5733_v48  ;;  %v1182_v30 = vshrl.u32 %v1180_v29, 16  ;;  %v1181_v51 = vand.u32 65535, %v1180_v29  ;;  %v1470_v61 = vand.u32 31, %v5004_v36 }
 0x15d   : > { %4509 = vmatmul.msk.f32.gmra.mxu0 %vm7468_vm15, %v5477_v2  ;;  %v4354_v2 = vsel %vm1010_vm5, 1.0, %v7474_v57  ;;  %vm5783_vm1 = vcmp.eq.s32.totalorder %v1477_v42, %v5032_v47 }
 0x15e   : > { %v1184_v26 = vcvt.s32.f32 %v1182_v30  ;;  %v1183_v0 = vcvt.s32.f32 %v1181_v51  ;;  %v1474_v51 = vand.u32 31, %v5243_v41  ;;  %vm5863_vm6 = vcmp.eq.s32.totalorder %v1470_v61, %v5032_v47 }
 0x15f   : > { %v7561_v61 = vmov 0 }
 0x160   : > { %v770_v46 = vpop.permute.xlu1 %769  ;;  %1187 = vadd.xlane.f32.xlu2 %v1184_v26  ;;  %4424 = vmatmul.msk.f32.gmra.mxu2 %vm7468_vm15, %v5661_v28  ;;  %vm5818_vm11 = vcmp.eq.s32.totalorder %v1474_v51, %v5032_v47  ;;  %v1473_v26 = vand.u32 31, %v5170_v39 }
 0x161   : > { %vm786_vm3 = vcmp.eq.s32.totalorder %v5032_v47, %v770_v46 }
 0x162   : > { %v4322_v12 = vsel %vm786_vm3, 1.0, %v7474_v57  ;;  %vm5833_vm4 = vcmp.eq.s32.totalorder %v1473_v26, %v5032_v47 }
 0x163   : > { %v834_v63 = vadd.f32 %v4322_v12, %v722_v20  ;;  %1185 = vadd.xlane.f32.xlu0 %v1183_v0  ;;  %v1478_v20 = vand.u32 31, %v5410_v53  ;;  %v1472_v0 = vand.u32 31, %v5128_v15 }
 0x165   : > { %v946_v17 = vadd.f32 %v4338_v1, %v834_v63  ;;  %4510 = vmatmul.msk.f32.gmra.mxu0 %vm7468_vm15, %v5491_v5  ;;  %v1068_v5 = vsel %vm7538_vm13, 1, %v7530_v52  ;;  %vm5778_vm12 = vcmp.eq.s32.totalorder %v1478_v20, %v5032_v47  ;;  %v1471_v20 = vand.u32 31, %v5088_v60 }
 0x166   : > { %v1562_v50 = vpop.f32.mrf.mxu1  ;;  %4443 = vmatpush.msk.msrb.mxu2 %vm5778_vm12, %v7543_v58  ;;  %v1193_v63 = vsel %vm7464_vm8, %v1068_v5, 0  ;;  %v1069_v5 = vsel %vm7552_vm9, 1, %v7530_v52  ;;  %vm5847_vm3 = vcmp.eq.s32.totalorder %v1472_v0, %v5032_v47  ;;  %vm5872_vm13 = vcmp.eq.s32.totalorder %v1469_v56, %v5032_v47 }
 0x167   : > { %v5761_v46 = vadd.f32 %v4354_v2, %v946_v17  ;;  %4433 = vmatmul.msk.f32.gmra.mxu3 %vm7469_vm0, %v1562_v50  ;;  %v1195_v29 = vshrl.u32 %v1193_v63, 16  ;;  %v1194_v17 = vand.u32 65535, %v1193_v63  ;;  %vm5853_vm5 = vcmp.eq.s32.totalorder %v1471_v20, %v5032_v47 }
 0x168   : > { %4444 = vmatpush.msk.msrb.mxu2 %vm5783_vm1, %v7543_v58  ;;  %v7559_v20 = vmov 0 }
 0x169   : > { %1588 = vmatmul.f32.gmra.mxu1 %v5761_v46  ;;  %v1197_v30 = vcvt.s32.f32 %v1195_v29  ;;  %v1196_v50 = vcvt.s32.f32 %v1194_v17  ;;  %4425 = vmatmul.msk.f32.gmra.mxu2 %vm7468_vm15, %v5675_v4  ;;  %v1206_v29 = vsel %vm7464_vm8, %v1069_v5, 0  ;;  %v7560_v20 = vsel %vm5872_vm13, 4294967295, %v7559_v20 }
 0x16a   : > { %4445 = vmatpush.msk.msrb.mxu2 %vm5793_vm2, %v7543_v58  ;;  %v1207_v51 = vand.u32 65535, %v1206_v29  ;;  %v1467_v5 = vand.u32 31, %v4930_v6 }
 0x16b   : > { %1200 = vadd.xlane.f32.xlu1 %v1197_v30  ;;  %1198 = vadd.xlane.f32.xlu2 %v1196_v50  ;;  %v1208_v30 = vshrl.u32 %v1206_v29, 16  ;;  %v1468_v50 = vand.u32 31, %v4960_v18  ;;  %v7565_v29 = vmov 0 }
 0x16c   : > { %v1209_v0 = vcvt.s32.f32 %v1207_v51  ;;  %vm5893_vm10 = vcmp.eq.s32.totalorder %v1467_v5, %v5032_v47  ;;  %v7567_v51 = vmov 0 }
 0x16d   : > { %4511 = vmatmul.msk.f32.gmra.mxu0 %vm7468_vm15, %v5508_v22  ;;  %v1475_v22 = vand.u32 31, %v5227_v10  ;;  %v1210_v26 = vcvt.s32.f32 %v1208_v30  ;;  %vm5885_vm9 = vcmp.eq.s32.totalorder %v1468_v50, %v5032_v47  ;;  %v1465_v30 = vand.u32 31, %v4978_v27 }
 0x16e   : > { %v7562_v61 = vsel %vm5885_vm9, 4294967295, %v7561_v61  ;;  %v1464_v50 = vand.u32 31, %v4933_v7 }
 0x16f   : > { %vm5806_vm14 = vcmp.eq.s32.totalorder %v1475_v22, %v5032_v47  ;;  %v5841_v22 = vpop.f32.mrf.mxu0  ;;  %1213 = vadd.xlane.f32.xlu0 %v1210_v26  ;;  %vm5918_vm7 = vcmp.eq.s32.totalorder %v1465_v30, %v5032_v47 }
 0x170   : > { %4446 = vmatpush.msk.msrb.mxu2 %vm5806_vm14, %v7543_v58  ;;  %v7568_v51 = vsel %vm5918_vm7, 4294967295, %v7567_v51 }
 0x171   : > { %4426 = vmatmul.msk.f32.gmra.mxu2 %vm7468_vm15, %v5698_v25 }
 0x172   : > { %4447 = vmatpush.msk.msrb.mxu2 %vm5818_vm11, %v7543_v58 }
 0x173   : > { %1211 = vadd.xlane.f32.xlu1 %v1209_v0  ;;  %v7569_v0 = vmov 0 }
 0x174   : > { %4448 = vmatpush.msk.msrb.mxu2 %vm5833_vm4, %v7543_v58 }
 0x175   : > { %4512 = vmatmul.msk.f32.gmra.mxu0 %vm7468_vm15, %v5522_v8 }
 0x176   : > { %v1565_v21 = vpop.f32.mrf.mxu1  ;;  %4449 = vmatpush.msk.msrb.mxu2 %vm5847_vm3, %v7543_v58 }
 0x177   : > { %4434 = vmatmul.msk.f32.gmra.mxu3 %vm7469_vm0, %v1565_v21  ;;  %v5897_v56 = vpop.f32.mrf.mxu0 }
 0x178   : > { %4450 = vmatpush.msk.msrb.mxu2 %vm5853_vm5, %v7543_v58 }
 0x17a   : > { %4451 = vmatpush.msk.msrb.mxu2 %vm5863_vm6, %v7543_v58 }
 0x17c   : > { %4452 = vmatpush.msk.msrb.mxu2 %vm5872_vm13, %v7543_v58 }
 0x17d   : > { %4513 = vmatmul.msk.f32.gmra.mxu0 %vm7468_vm15, %v5536_v44 }
 0x17e   : > { %4453 = vmatpush.msk.msrb.mxu2 %vm5885_vm9, %v7543_v58 }
 0x180   : > { %4454 = vmatpush.msk.msrb.mxu2 %vm5893_vm10, %v7543_v58 }
 0x181   : > { %v1568_v63 = vpop.f32.mrf.mxu1 }
 0x182   : > { %4435 = vmatmul.msk.f32.gmra.mxu3 %vm7469_vm0, %v1568_v63  ;;  %v7563_v63 = vmov 0 }
 0x183   : > { %v7564_v63 = vsel %vm5893_vm10, 4294967295, %v7563_v63  ;;  %vm5928_vm10 = vcmp.eq.s32.totalorder %v1464_v50, %v5032_v47 }
 0x184   : > { %v7570_v0 = vsel %vm5928_vm10, 4294967295, %v7569_v0 }
 0x185   : > { %4514 = vmatmul.msk.f32.gmra.mxu0 %vm7468_vm15, %v5548_v45  ;;  %v1466_v45 = vand.u32 31, %v4999_v34 }
 0x187   : > { %vm5907_vm8 = vcmp.eq.s32.totalorder %v1466_v45, %v5032_v47  ;;  %v5941_v45 = vpop.f32.mrf.mxu0 }
 0x188   : > { %v7566_v29 = vsel %vm5907_vm8, 4294967295, %v7565_v29  ;;  %4455 = vmatpush.msk.msrb.mxu2 %vm5907_vm8, %v7543_v58 }
 0x18a   : > { %4456 = vmatpush.msk.msrb.mxu2 %vm5918_vm7, %v7543_v58  ;;  %vm7574_vm7 = vcmask 31744  }
 0x18c   : > { %4457 = vmatpush.msk.msrb.mxu2 %vm5928_vm10, %v7543_v58  ;;  %vm7575_vm10 = vcmask 64512  }
 0x18d   : > { %4515 = vmatmul.msk.f32.gmra.mxu0 %vm7468_vm15, %v5567_v49  ;;  %v1463_v49 = vand.u32 31, %v4925_v3 }
 0x18f   : > { %vm5937_vm15 = vcmp.eq.s32.totalorder %v1463_v49, %v5032_v47 }
 0x190   : > { %4458 = vmatpush.msk.msrb.mxu2 %vm5937_vm15, %v7543_v58 }
 0x191   : > { %v1571_v26 = vpop.f32.mrf.mxu1 }
 0x192   : > { %4436 = vmatmul.msk.f32.gmra.mxu3 %vm7469_vm0, %v1571_v26  ;;  %vm7573_vm0 = vcmp.ge.s32.totalorder %v5275_v13, 0  ;;  %4491 = vmatpush.msk.msra.mxu2 %vm5778_vm12, %v7543_v58  ;;  %v1082_v13 = vpop.xlane.xlu2 %1081 }
 0x193   : > { %v1070_v30 = vsel %vm7573_vm0, 1, %v7530_v52  ;;  %vm7577_vm0 = vcmp.ge.s32.totalorder %v5239_v37, 0 }
 0x194   : > { %v1219_v50 = vsel %vm7574_vm7, %v1070_v30, 0  ;;  %4492 = vmatpush.msk.msra.mxu2 %vm5783_vm1, %v7543_v58  ;;  %vm7576_vm7 = vcmask 130048  }
 0x195   : > { %v1221_v26 = vshrl.u32 %v1219_v50, 16  ;;  %4516 = vmatmul.msk.f32.gmra.mxu0 %vm7575_vm10, %v5586_v24  ;;  %v1220_v49 = vand.u32 65535, %v1219_v50  ;;  %v5967_v24 = vpop.f32.mrf.mxu0  ;;  %v1084_v50 = vpop.xlane.xlu1 %1083 }
 0x196   : > { %4493 = vmatpush.msk.msra.mxu2 %vm5793_vm2, %v7543_v58 }
 0x197   : > { %v1223_v57 = vcvt.s32.f32 %v1221_v26  ;;  %v1222_v7 = vcvt.s32.f32 %v1220_v49  ;;  %v1071_v26 = vsel %vm7577_vm0, 1, %v7530_v52  ;;  %vm7579_vm0 = vnez %v7564_v63 }
 0x198   : > { %4494 = vmatpush.msk.msra.mxu2 %vm5806_vm14, %v7543_v58 }
 0x199   : > { %1226 = vadd.xlane.f32.xlu2 %v1223_v57  ;;  %1224 = vadd.xlane.f32.xlu0 %v1222_v7  ;;  %v1086_v7 = vcvt.f32.s32 %v1084_v50  ;;  %v1661_v57 = vpop.f32.mrf.mxu2  ;;  %v1097_v50 = vpop.xlane.xlu0 %1096 }
 0x19a   : > { %4495 = vmatpush.msk.msra.mxu2 %vm5818_vm11, %v7543_v58  ;;  %v1095_v27 = vpop.xlane.xlu2 %1094  ;;  %v1099_v15 = vcvt.f32.s32 %v1097_v50 }
 0x19b   : > { %v1087_v49 = vshll.u32 %v1086_v7, 16 }
 0x19c   : > { %4496 = vmatpush.msk.msra.mxu2 %vm5833_vm4, %v7543_v58 }
 0x19d   : > { %4517 = vmatmul.msk.f32.gmra.mxu0 %vm7575_vm10, %v5606_v11  ;;  %v1085_v11 = vcvt.f32.s32 %v1082_v13  ;;  %v5993_v37 = vpop.f32.mrf.mxu0 }
 0x19e   : > { %v1574_v30 = vpop.f32.mrf.mxu1  ;;  %4497 = vmatpush.msk.msra.mxu2 %vm5847_vm3, %v7543_v58 }
 0x19f   : > { %4437 = vmatmul.msk.f32.gmra.mxu3 %vm7576_vm7, %v1574_v30  ;;  %vm7578_vm7 = vcmask 31744   ;;  %v1088_v60 = vadd.s32 %v1087_v49, %v1085_v11  ;;  %v6008_v49 = vld [vmem:[%s7424_s6 + $0x2d8] ss:$0 sm:$0xff]  ;;  %v1100_v11 = vshll.u32 %v1099_v15, 16 }
 0x1a0   : > { %4498 = vmatpush.msk.msra.mxu2 %vm5853_vm5, %v7543_v58  ;;  %v1232_v30 = vsel %vm7578_vm7, %v1071_v26, 0  ;;  %v5996_v26 = vshra.s32 %v5032_v47, 5 }
 0x1a1   : > { %v1234_v34 = vshrl.u32 %v1232_v30, 16  ;;  %v1233_v13 = vand.u32 65535, %v1232_v30  ;;  %v1098_v30 = vcvt.f32.s32 %v1095_v27  ;;  %v7584_v27 = vmov 0.0  }
 0x1a2   : > { %4499 = vmatpush.msk.msra.mxu2 %vm5863_vm6, %v7543_v58  ;;  %vm1285_vm7 = vcmp.eq.s32.totalorder %v5996_v26, %v1088_v60 }
 0x1a3   : > { %v1236_v7 = vcvt.s32.f32 %v1234_v34  ;;  %v1235_v39 = vcvt.s32.f32 %v1233_v13  ;;  %v6023_v15 = vsel %vm1285_vm7, 1.0, %v7584_v27  ;;  %vm7591_vm7 = vcmask 31744  }
 0x1a4   : > { %4500 = vmatpush.msk.msra.mxu2 %vm5872_vm13, %v7543_v58  ;;  %vm7583_vm13 = vnez %v7568_v51 }
 0x1a5   : > { %4518 = vmatmul.msk.f32.gmra.mxu0 %vm7575_vm10, %v5625_v16  ;;  %1239 = vadd.xlane.f32.xlu1 %v1236_v7  ;;  %v1110_v16 = vpop.xlane.xlu1 %1109  ;;  %vm7580_vm10 = vcmask 130048   ;;  %v1664_v7 = vpop.f32.mrf.mxu2 }
 0x1a6   : > { %4501 = vmatpush.msk.msra.mxu2 %vm5885_vm9, %v7543_v58  ;;  %1237 = vadd.xlane.f32.xlu2 %v1235_v39  ;;  %vm7582_vm9 = vcmp.ge.s32.totalorder %v5305_v9, 0  ;;  %v1108_v39 = vpop.xlane.xlu2 %1107  ;;  %v6030_v9 = vpop.f32.mrf.mxu0 }
 0x1a7   : > { %v1072_v60 = vsel %vm7582_vm9, 1, %v7530_v52  ;;  %vm7587_vm9 = vcmask 64512  }
 0x1a8   : > { %4502 = vmatpush.msk.msra.mxu2 %vm7579_vm0, %v7543_v58  ;;  %vm7581_vm0 = vcmask 64512  }
 0x1aa   : > { %4503 = vmatpush.msk.msra.mxu2 %vm5907_vm8, %v7543_v58  ;;  %vm7585_vm8 = vcmask 31744  }
 0x1ab   : > { %v1245_v41 = vsel %vm7585_vm8, %v1072_v60, 0 }
 0x1ac   : > { %4504 = vmatpush.msk.msra.mxu2 %vm7583_vm13, %v7543_v58  ;;  %v1247_v10 = vshrl.u32 %v1245_v41, 16  ;;  %v1246_v19 = vand.u32 65535, %v1245_v41 }
 0x1ad   : > { %4519 = vmatmul.msk.f32.gmra.mxu0 %vm7581_vm0, %v5641_v40  ;;  %vm7586_vm0 = vnez %v7570_v0  ;;  %v1123_v60 = vpop.xlane.xlu1 %1122  ;;  %v1667_v41 = vpop.f32.mrf.mxu2 }
 0x1ae   : > { %v1577_v34 = vpop.f32.mrf.mxu1  ;;  %4505 = vmatpush.msk.msra.mxu2 %vm7586_vm0, %v7543_v58  ;;  %v1249_v14 = vcvt.s32.f32 %v1247_v10  ;;  %v6053_v12 = vpop.f32.mrf.mxu0 }
 0x1af   : > { %v1775_v50 = vpop.f32.mrf.mxu3  ;;  %4438 = vmatmul.msk.f32.gmra.mxu3 %vm7580_vm10, %v1577_v34 }
 0x1b0   : > { %v1776_v13 = vadd.f32 %v1775_v50, %v1661_v57  ;;  %v1101_v57 = vadd.s32 %v1100_v11, %v1098_v30  ;;  %v1112_v50 = vcvt.f32.s32 %v1110_v16  ;;  %4506 = vmatpush.msk.msra.mxu2 %vm5937_vm15, %v7543_v58  ;;  %v1111_v16 = vcvt.f32.s32 %v1108_v39  ;;  %1252 = vadd.xlane.f32.xlu0 %v1249_v14 }
 0x1b1   : > { %v1248_v30 = vcvt.s32.f32 %v1246_v19  ;;  %v1125_v39 = vcvt.f32.s32 %v1123_v60 }
 0x1b2   : > { %v1825_v34 = vadd.f32 %v6008_v49, %v1776_v13  ;;  %vm1286_vm8 = vcmp.eq.s32.totalorder %v5996_v26, %v1101_v57  ;;  %v1113_v11 = vshll.u32 %v1112_v50, 16  ;;  %v1121_v57 = vpop.xlane.xlu2 %1120 }
 0x1b3   : > { %1250 = vadd.xlane.f32.xlu1 %v1248_v30  ;;  %v6043_v10 = vsel %vm1286_vm8, 1.0, %v7584_v27  ;;  %v1124_v50 = vcvt.f32.s32 %v1121_v57  ;;  %vm7596_vm8 = vcmp.ge.s32.totalorder %v5424_v35, 0 }
 0x1b4   : > { %v1841_v40 = vmul.f32 %v6023_v15, %v1825_v34  ;;  %v1114_v14 = vadd.s32 %v1113_v11, %v1111_v16 }
 0x1b5   : > { %4520 = vmatmul.msk.f32.gmra.mxu0 %vm7587_vm9, %v5661_v28 }
 0x1b6   : > { %1875 = vmatmul.f32.vlgmr.msrb.gmra.mxu2 %v1841_v40  ;;  %v1136_v40 = vpop.xlane.xlu0 %1135  ;;  %v6087_v44 = vpop.f32.mrf.mxu0 }
 0x1b7   : > { %v1778_v13 = vpop.f32.mrf.mxu3  ;;  %4539 = vmatpush.msk.msrb.mxu2 %vm5778_vm12, %v7543_v58  ;;  %vm1287_vm12 = vcmp.eq.s32.totalorder %v5996_v26, %v1114_v14  ;;  %v1138_v30 = vcvt.f32.s32 %v1136_v40 }
 0x1b8   : > { %v1779_v34 = vadd.f32 %v1778_v13, %v1664_v7  ;;  %v1126_v7 = vshll.u32 %v1125_v39, 16  ;;  %v6069_v16 = vsel %vm1287_vm12, 1.0, %v7584_v27  ;;  %vm7598_vm12 = vmmov %vm7591_vm7 }
 0x1b9   : > { %4540 = vmatpush.msk.msrb.mxu2 %vm5783_vm1, %v7543_v58  ;;  %vm7588_vm1 = vmmov %vm7580_vm10  ;;  %v1139_v39 = vshll.u32 %v1138_v30, 16 }
 0x1ba   : > { %v1826_v19 = vadd.f32 %v6008_v49, %v1779_v34  ;;  %v1127_v8 = vadd.s32 %v1126_v7, %v1124_v50  ;;  %v1134_v34 = vpop.xlane.xlu1 %1133  ;;  %v1149_v40 = vpop.xlane.xlu2 %1148 }
 0x1bb   : > { %4541 = vmatpush.msk.msrb.mxu2 %vm5793_vm2, %v7543_v58  ;;  %vm7589_vm2 = vmmov %vm7587_vm9  ;;  %v1137_v57 = vcvt.f32.s32 %v1134_v34  ;;  %vm7597_vm9 = vnez %v7564_v63 }
 0x1bc   : > { %v1842_v28 = vmul.f32 %v6043_v10, %v1826_v19 }
 0x1bd   : > { %4542 = vmatpush.msk.msrb.mxu2 %vm5806_vm14, %v7543_v58  ;;  %4521 = vmatmul.msk.f32.gmra.mxu0 %vm7589_vm2, %v5675_v4  ;;  %vm7590_vm14 = vcmp.ge.s32.totalorder %v5365_v43, 0  ;;  %v1670_v4 = vpop.f32.mrf.mxu2  ;;  %v1140_v21 = vadd.s32 %v1139_v39, %v1137_v57 }
 0x1be   : > { %v1580_v1 = vpop.f32.mrf.mxu1  ;;  %1878 = vmatmul.f32.gmra.mxu2 %v1842_v28  ;;  %v1073_v2 = vsel %vm7590_vm14, 1, %v7530_v52 }
 0x1bf   : > { %v1781_v11 = vpop.f32.mrf.mxu3  ;;  %4439 = vmatmul.msk.f32.gmra.mxu3 %vm7588_vm1, %v1580_v1  ;;  %4543 = vmatpush.msk.msrb.mxu2 %vm5818_vm11, %v7543_v58  ;;  %v1258_v13 = vsel %vm7591_vm7, %v1073_v2, 0  ;;  %vm1288_vm11 = vcmp.eq.s32.totalorder %v5996_v26, %v1127_v8  ;;  %vm1289_vm10 = vcmp.eq.s32.totalorder %v5996_v26, %v1140_v21  ;;  %v1147_v2 = vpop.xlane.xlu0 %1146 }
 0x1c0   : > { %v1782_v59 = vadd.f32 %v1781_v11, %v1667_v41  ;;  %v1260_v41 = vshrl.u32 %v1258_v13, 16  ;;  %v1259_v19 = vand.u32 65535, %v1258_v13  ;;  %v6092_v50 = vsel %vm1288_vm11, 1.0, %v7584_v27 }
 0x1c1   : > { %4544 = vmatpush.msk.msrb.mxu2 %vm5833_vm4, %v7543_v58  ;;  %vm7592_vm4 = vmmov %vm7589_vm2 }
 0x1c2   : > { %v1827_v60 = vadd.f32 %v6008_v49, %v1782_v59  ;;  %v1262_v14 = vcvt.s32.f32 %v1260_v41  ;;  %v1261_v42 = vcvt.s32.f32 %v1259_v19  ;;  %v1151_v59 = vcvt.f32.s32 %v1149_v40  ;;  %v1162_v39 = vpop.xlane.xlu1 %1161 }
 0x1c3   : > { %4545 = vmatpush.msk.msrb.mxu2 %vm5847_vm3, %v7543_v58  ;;  %vm7593_vm3 = vnez %v7560_v20  ;;  %v1074_v20 = vsel %vm7596_vm8, 1, %v7530_v52  ;;  %v1150_v52 = vcvt.f32.s32 %v1147_v2 }
 0x1c4   : > { %v1843_v43 = vmul.f32 %v6069_v16, %v1827_v60  ;;  %1265 = vadd.xlane.f32.xlu2 %v1262_v14  ;;  %1263 = vadd.xlane.f32.xlu0 %v1261_v42  ;;  %v1271_v30 = vsel %vm7598_vm12, %v1074_v20, 0  ;;  %v6115_v60 = vsel %vm1289_vm10, 1.0, %v7584_v27  ;;  %v1152_v35 = vshll.u32 %v1151_v59, 16 }
 0x1c5   : > { %4546 = vmatpush.msk.msrb.mxu2 %vm5853_vm5, %v7543_v58  ;;  %4522 = vmatmul.msk.f32.gmra.mxu0 %vm7592_vm4, %v5698_v25  ;;  %vm7594_vm5 = vmmov %vm7588_vm1  ;;  %v1673_v11 = vpop.f32.mrf.mxu2  ;;  %v1273_v13 = vshrl.u32 %v1271_v30, 16  ;;  %vm7599_vm1 = vnez %v7566_v29  ;;  %v1272_v41 = vand.u32 65535, %v1271_v30 }
 0x1c6   : > { %1881 = vmatmul.f32.gmra.mxu2 %v1843_v43  ;;  %v1153_v43 = vadd.s32 %v1152_v35, %v1150_v52  ;;  %vm7600_vm2 = vmmov %vm7594_vm5 }
 0x1c7   : > { %v1784_v28 = vpop.f32.mrf.mxu3  ;;  %4547 = vmatpush.msk.msrb.mxu2 %vm5863_vm6, %v7543_v58  ;;  %vm7595_vm6 = vnez %v7562_v61  ;;  %v1275_v34 = vcvt.s32.f32 %v1273_v13 }
 0x1c8   : > { %v1785_v1 = vadd.f32 %v1784_v28, %v1670_v4  ;;  %v1274_v4 = vcvt.s32.f32 %v1272_v41  ;;  %v1164_v28 = vcvt.f32.s32 %v1162_v39 }
 0x1c9   : > { %v1583_v7 = vpop.f32.mrf.mxu1  ;;  %4548 = vmatpush.msk.msrb.mxu2 %vm7593_vm3, %v7543_v58  ;;  %1278 = vadd.xlane.f32.xlu1 %v1275_v34 }
 0x1ca   : > { %4440 = vmatmul.msk.f32.gmra.mxu3 %vm7594_vm5, %v1583_v7  ;;  %v1828_v17 = vadd.f32 %v6008_v49, %v1785_v1  ;;  %v1160_v1 = vpop.xlane.xlu2 %1159  ;;  %v1165_v7 = vshll.u32 %v1164_v28, 16 }
 0x1cb   : > { %4549 = vmatpush.msk.msrb.mxu2 %vm7595_vm6, %v7543_v58  ;;  %v1163_v21 = vcvt.f32.s32 %v1160_v1 }
 0x1cc   : > { %v1844_v25 = vmul.f32 %v6092_v50, %v1828_v17  ;;  %1276 = vadd.xlane.f32.xlu2 %v1274_v4 }
 0x1cd   : > { %4550 = vmatpush.msk.msrb.mxu2 %vm7597_vm9, %v7543_v58  ;;  %v1676_v14 = vpop.f32.mrf.mxu2  ;;  %v1166_v17 = vadd.s32 %v1165_v7, %v1163_v21  ;;  %vm7610_vm9 = vcmask 261120  }
 0x1ce   : > { %1884 = vmatmul.f32.gmra.mxu2 %v1844_v25  ;;  %v1175_v59 = vpop.xlane.xlu0 %1174  ;;  %v1173_v13 = vpop.xlane.xlu1 %1172  ;;  %vm7611_vm12 = vmmov %vm7610_vm9 }
 0x1cf   : > { %v1787_v61 = vpop.f32.mrf.mxu3  ;;  %4551 = vmatpush.msk.msrb.mxu2 %vm7599_vm1, %v7543_v58  ;;  %v1176_v52 = vcvt.f32.s32 %v1173_v13  ;;  %vm7612_vm1 = vmmov %vm7610_vm9 }
 0x1d0   : > { %v1788_v8 = vadd.f32 %v1787_v61, %v1673_v11  ;;  %v1177_v61 = vcvt.f32.s32 %v1175_v59 }
 0x1d1   : > { %4552 = vmatpush.msk.msrb.mxu2 %vm7583_vm13, %v7543_v58  ;;  %vm1290_vm13 = vcmp.eq.s32.totalorder %v5996_v26, %v1153_v43 }
 0x1d2   : > { %v1829_v63 = vadd.f32 %v6008_v49, %v1788_v8  ;;  %v6131_v0 = vsel %vm1290_vm13, 1.0, %v7584_v27  ;;  %v1178_v35 = vshll.u32 %v1177_v61, 16  ;;  %vm7613_vm13 = vmmov %vm7612_vm1 }
 0x1d3   : > { %4553 = vmatpush.msk.msrb.mxu2 %vm7586_vm0, %v7543_v58  ;;  %vm1291_vm0 = vcmp.eq.s32.totalorder %v5996_v26, %v1166_v17  ;;  %v1188_v41 = vpop.xlane.xlu2 %1187 }
 0x1d4   : > { %v1845_v29 = vmul.f32 %v6115_v60, %v1829_v63  ;;  %v6138_v2 = vsel %vm1291_vm0, 1.0, %v7584_v27  ;;  %v1179_v34 = vadd.s32 %v1178_v35, %v1176_v52  ;;  %v1190_v63 = vcvt.f32.s32 %v1188_v41  ;;  %vm7616_vm0 = vmmov %vm7612_vm1 }
 0x1d5   : > { %4554 = vmatpush.msk.msrb.mxu2 %vm5937_vm15, %v7543_v58  ;;  %vm7601_vm15 = vmmov %vm7600_vm2  ;;  %v1679_v25 = vpop.f32.mrf.mxu2 }
 0x1d6   : > { %1887 = vmatmul.f32.gmra.mxu2 %v1845_v29  ;;  %vm1292_vm14 = vcmp.eq.s32.totalorder %v5996_v26, %v1179_v34  ;;  %v1186_v4 = vpop.xlane.xlu0 %1185 }
 0x1d7   : > { %v1189_v39 = vcvt.f32.s32 %v1186_v4 }
 0x1d9   : > { %v1586_v51 = vpop.f32.mrf.mxu1 }
 0x1da   : > { %v1790_v19 = vpop.f32.mrf.mxu3  ;;  %4441 = vmatmul.msk.f32.gmra.mxu3 %vm7600_vm2, %v1586_v51  ;;  %v1191_v51 = vshll.u32 %v1190_v63, 16  ;;  %vm7614_vm2 = vmmov %vm7612_vm1 }
 0x1db   : > { %v1791_v57 = vadd.f32 %v1790_v19, %v1676_v14  ;;  %v6144_v19 = vsel %vm1292_vm14, 1.0, %v7584_v27  ;;  %vm7617_vm14 = vmmov %vm7616_vm0 }
 0x1dc   : > { %v1192_v28 = vadd.s32 %v1191_v51, %v1189_v39 }
 0x1dd   : > { %v1830_v42 = vadd.f32 %v6008_v49, %v1791_v57  ;;  %v1682_v29 = vpop.f32.mrf.mxu2 }
 0x1de   : > { %vm1293_vm7 = vcmp.eq.s32.totalorder %v5996_v26, %v1192_v28  ;;  %v1201_v7 = vpop.xlane.xlu1 %1200 }
 0x1df   : > { %v1846_v5 = vmul.f32 %v6131_v0, %v1830_v42  ;;  %v6150_v17 = vsel %vm1293_vm7, 1.0, %v7584_v27  ;;  %vm7618_vm7 = vmmov %vm7616_vm0 }
 0x1e1   : > { %1890 = vmatmul.f32.gmra.mxu2 %v1846_v5 }
 0x1e2   : > { %v1214_v13 = vpop.xlane.xlu0 %1213 }
 0x1e3   : > { %v1216_v52 = vcvt.f32.s32 %v1214_v13 }
 0x1e5   : > { %v1685_v1 = vpop.f32.mrf.mxu2 }
 0x1e6   : > { %v1589_v40 = vpop.f32.mrf.mxu1  ;;  %v1212_v41 = vpop.xlane.xlu1 %1211 }
 0x1e7   : > { %4442 = vmatmul.msk.f32.gmra.mxu3 %vm7601_vm15, %v1589_v40  ;;  %vm7615_vm15 = vmmov %vm7612_vm1 }
 0x1ea   : > { %v1793_v11 = vpop.f32.mrf.mxu3 }
 0x1eb   : > { %v1794_v20 = vadd.f32 %v1793_v11, %v1679_v25  ;;  %v1203_v25 = vcvt.f32.s32 %v1201_v7  ;;  %v1199_v11 = vpop.xlane.xlu2 %1198 }
 0x1ed   : > { %v1831_v30 = vadd.f32 %v6008_v49, %v1794_v20  ;;  %v1204_v20 = vshll.u32 %v1203_v25, 16 }
 0x1ef   : > { %v1847_v8 = vmul.f32 %v6138_v2, %v1831_v30  ;;  %v1202_v30 = vcvt.f32.s32 %v1199_v11 }
 0x1f1   : > { %1893 = vmatmul.f32.gmra.mxu2 %v1847_v8  ;;  %v1205_v61 = vadd.s32 %v1204_v20, %v1202_v30  ;;  %v1688_v8 = vpop.f32.mrf.mxu2 }
 0x1f3   : > { %vm1294_vm11 = vcmp.eq.s32.totalorder %v5996_v26, %v1205_v61 }
 0x1f4   : > { %v6156_v63 = vsel %vm1294_vm11, 1.0, %v7584_v27  ;;  %vm7619_vm11 = vmmov %vm7616_vm0 }
 0x1f9   : > { %v1691_v39 = vpop.f32.mrf.mxu2 }
 0x1fa   : > { %v1796_v43 = vpop.f32.mrf.mxu3 }
 0x1fb   : > { %v1797_v14 = vadd.f32 %v1796_v43, %v1682_v29  ;;  %v1217_v29 = vshll.u32 %v1216_v52, 16  ;;  %v1215_v43 = vcvt.f32.s32 %v1212_v41 }
 0x1fd   : > { %v1832_v57 = vadd.f32 %v6008_v49, %v1797_v14  ;;  %v1218_v51 = vadd.s32 %v1217_v29, %v1215_v43 }
 0x1ff   : > { %v1848_v42 = vmul.f32 %v6144_v19, %v1832_v57  ;;  %vm1295_vm4 = vcmp.eq.s32.totalorder %v5996_v26, %v1218_v51 }
 0x201   : > { %1896 = vmatmul.f32.gmra.mxu2 %v1848_v42  ;;  %v1694_v20 = vpop.f32.mrf.mxu2 }
 0x205   : > { %v1799_v5 = vpop.f32.mrf.mxu3 }
 0x206   : > { %v1800_v21 = vadd.f32 %v1799_v5, %v1685_v1  ;;  %v6162_v1 = vsel %vm1295_vm4, 1.0, %v7584_v27  ;;  %vm7620_vm4 = vmmov %vm7616_vm0 }
 0x208   : > { %v1833_v40 = vadd.f32 %v6008_v49, %v1800_v21 }
 0x20a   : > { %v1849_v59 = vmul.f32 %v6150_v17, %v1833_v40 }
 0x20c   : > { %1899 = vmatmul.f32.gmra.mxu2 %v1849_v59  ;;  %v1227_v42 = vpop.xlane.xlu2 %1226  ;;  %v1225_v21 = vpop.xlane.xlu0 %1224 }
 0x20d   : > { %v1229_v7 = vcvt.f32.s32 %v1227_v42  ;;  %v1228_v11 = vcvt.f32.s32 %v1225_v21 }
 0x20f   : > { %v1230_v25 = vshll.u32 %v1229_v7, 16 }
 0x211   : > { %v1231_v59 = vadd.s32 %v1230_v25, %v1228_v11 }
 0x213   : > { %vm1296_vm3 = vcmp.eq.s32.totalorder %v5996_v26, %v1231_v59 }
 0x215   : > { %v1802_v35 = vpop.f32.mrf.mxu3 }
 0x216   : > { %v1803_v34 = vadd.f32 %v1802_v35, %v1688_v8  ;;  %v6168_v8 = vsel %vm1296_vm3, 1.0, %v7584_v27  ;;  %vm7621_vm3 = vmmov %vm7616_vm0 }
 0x218   : > { %v1834_v4 = vadd.f32 %v6008_v49, %v1803_v34  ;;  %v1240_v61 = vpop.xlane.xlu1 %1239 }
 0x219   : > { %v1242_v52 = vcvt.f32.s32 %v1240_v61  ;;  %v1238_v34 = vpop.xlane.xlu2 %1237 }
 0x21a   : > { %v1850_v14 = vmul.f32 %v6156_v63, %v1834_v4  ;;  %v1241_v29 = vcvt.f32.s32 %v1238_v34 }
 0x21b   : > { %v1243_v4 = vshll.u32 %v1242_v52, 16 }
 0x21c   : > { %1902 = vmatmul.f32.gmra.mxu2 %v1850_v14 }
 0x21d   : > { %v1244_v43 = vadd.s32 %v1243_v4, %v1241_v29 }
 0x21f   : > { %vm1297_vm5 = vcmp.eq.s32.totalorder %v5996_v26, %v1244_v43 }
 0x222   : > { %v1805_v57 = vpop.f32.mrf.mxu3 }
 0x223   : > { %v1806_v28 = vadd.f32 %v1805_v57, %v1691_v39  ;;  %v1253_v14 = vpop.xlane.xlu0 %1252  ;;  %v1697_v57 = vpop.f32.mrf.mxu2 }
 0x224   : > { %v1255_v51 = vcvt.f32.s32 %v1253_v14 }
 0x225   : > { %v1835_v5 = vadd.f32 %v6008_v49, %v1806_v28 }
 0x226   : > { %v1251_v39 = vpop.xlane.xlu1 %1250  ;;  %v1256_v7 = vshll.u32 %v1255_v51, 16 }
 0x227   : > { %v1851_v40 = vmul.f32 %v6162_v1, %v1835_v5  ;;  %v6174_v5 = vsel %vm1297_vm5, 1.0, %v7584_v27  ;;  %v1254_v21 = vcvt.f32.s32 %v1251_v39  ;;  %vm7622_vm5 = vmmov %vm7616_vm0 }
 0x229   : > { %1905 = vmatmul.f32.gmra.mxu2 %v1851_v40  ;;  %v1257_v11 = vadd.s32 %v1256_v7, %v1254_v21 }
 0x22b   : > { %v1700_v59 = vpop.f32.mrf.mxu2  ;;  %vm1298_vm6 = vcmp.eq.s32.totalorder %v5996_v26, %v1257_v11 }
 0x232   : > { %v1808_v30 = vpop.f32.mrf.mxu3 }
 0x233   : > { %v1809_v13 = vadd.f32 %v1808_v30, %v1694_v20  ;;  %v1703_v51 = vpop.f32.mrf.mxu2 }
 0x235   : > { %v1836_v35 = vadd.f32 %v6008_v49, %v1809_v13  ;;  %v6180_v13 = vsel %vm1298_vm6, 1.0, %v7584_v27  ;;  %vm7623_vm6 = vmmov %vm7616_vm0 }
 0x237   : > { %v1852_v41 = vmul.f32 %v6168_v8, %v1836_v35  ;;  %v1266_v30 = vpop.xlane.xlu2 %1265  ;;  %v1264_v34 = vpop.xlane.xlu0 %1263 }
 0x238   : > { %v1268_v52 = vcvt.f32.s32 %v1266_v30  ;;  %v1267_v29 = vcvt.f32.s32 %v1264_v34 }
 0x239   : > { %1908 = vmatmul.f32.gmra.mxu2 %v1852_v41 }
 0x23a   : > { %v1269_v4 = vshll.u32 %v1268_v52, 16 }
 0x23c   : > { %v1270_v43 = vadd.s32 %v1269_v4, %v1267_v29  ;;  %v1279_v14 = vpop.xlane.xlu1 %1278 }
 0x23e   : > { %vm1299_vm10 = vcmp.eq.s32.totalorder %v5996_v26, %v1270_v43 }
 0x23f   : > { %v6186_v7 = vsel %vm1299_vm10, 1.0, %v7584_v27  ;;  %vm7624_vm10 = vmmov %vm7616_vm0 }
 0x242   : > { %v1811_v42 = vpop.f32.mrf.mxu3 }
 0x243   : > { %v1812_v28 = vadd.f32 %v1811_v42, %v1697_v57  ;;  %v1281_v57 = vcvt.f32.s32 %v1279_v14 }
 0x245   : > { %v1837_v40 = vadd.f32 %v6008_v49, %v1812_v28  ;;  %v1277_v28 = vpop.xlane.xlu2 %1276 }
 0x247   : > { %v1853_v25 = vmul.f32 %v6174_v5, %v1837_v40  ;;  %v1282_v40 = vshll.u32 %v1281_v57, 16 }
 0x249   : > { %1911 = vmatmul.f32.gmra.mxu2 %v1853_v25  ;;  %v1280_v25 = vcvt.f32.s32 %v1277_v28 }
 0x24d   : > { %v1814_v20 = vpop.f32.mrf.mxu3 }
 0x24e   : > { %v1815_v61 = vadd.f32 %v1814_v20, %v1700_v59  ;;  %v1283_v59 = vadd.s32 %v1282_v40, %v1280_v25  ;;  %v1706_v20 = vpop.f32.mrf.mxu2 }
 0x250   : > { %v1838_v35 = vadd.f32 %v6008_v49, %v1815_v61  ;;  %vm1300_vm8 = vcmp.eq.s32.totalorder %v5996_v26, %v1283_v59 }
 0x252   : > { %v1854_v41 = vmul.f32 %v6180_v13, %v1838_v35  ;;  %v6192_v35 = vsel %vm1300_vm8, 1.0, %v7584_v27  ;;  %vm7625_vm8 = vmmov %vm7616_vm0 }
 0x253   : > { %7602 = vst [vmem:[#allocation30_spill] sm:$0xff] %v6192_v35 }
 0x254   : > { %1914 = vmatmul.f32.gmra.mxu2 %v1854_v41 }
 0x256   : > { %v1876_v41 = vpop.f32.mrf.mxu2 }
 0x25d   : > { %v1817_v39 = vpop.f32.mrf.mxu3 }
 0x25e   : > { %v1818_v42 = vadd.f32 %v1817_v39, %v1703_v51  ;;  %v1879_v4 = vpop.f32.mrf.mxu2 }
 0x260   : > { %v1839_v21 = vadd.f32 %v6008_v49, %v1818_v42 }
 0x262   : > { %v1855_v11 = vmul.f32 %v6186_v7, %v1839_v21 }
 0x264   : > { %1917 = vmatmul.f32.gmra.mxu2 %v1855_v11 }
 0x266   : > { %v1882_v29 = vpop.f32.mrf.mxu2 }
 0x26a   : > { %v1820_v30 = vpop.f32.mrf.mxu3 }
 0x26b   : > { %v1821_v61 = vadd.f32 %v1820_v30, %v1706_v20 }
 0x26d   : > { %v1840_v52 = vadd.f32 %v6008_v49, %v1821_v61  ;;  %v4833_v49 = vld [vmem:[%s7424_s6 + $0x2db] ss:$0 sm:$0xff] }
 0x26e   : > { %v1885_v43 = vpop.f32.mrf.mxu2 }
 0x26f   : > { %v1856_v34 = vmul.f32 %v6192_v35, %v1840_v52 }
 0x271   : > { %1920 = vmatmul.f32.gmra.mxu2 %v1856_v34 }
 0x276   : > { %v1888_v14 = vpop.f32.mrf.mxu2 }
 0x27e   : > { %v1891_v51 = vpop.f32.mrf.mxu2 }
 0x286   : > { %v1894_v39 = vpop.f32.mrf.mxu2 }
 0x28e   : > { %v1897_v57 = vpop.f32.mrf.mxu2 }
 0x28f   : > { %v1898_v35 = vadd.f32 %v4833_v49, %v1897_v57  ;;  %v7609_v57 = vld [vmem:[#allocation29_spill] sm:$0xff] }
 0x296   : > { %v1900_v26 = vpop.f32.mrf.mxu2 }
 0x297   : > { %v1901_v36 = vadd.f32 %v4833_v49, %v1900_v26  ;;  %v2007_v26 = vld [vmem:[%s7424_s6 + $0x28] sm:$0xff] }
 0x29f   : > { %v1903_v42 = vpop.f32.mrf.mxu2 }
 0x2a0   : > { %v1904_v18 = vadd.f32 %v4833_v49, %v1903_v42 }
 0x2ac   : > { %v1906_v28 = vpop.f32.mrf.mxu2 }
 0x2ad   : > { %v1907_v27 = vadd.f32 %v4833_v49, %v1906_v28 }
 0x2af   : > { %v1934_v47 = vmax.f32 %v1907_v27, 0.0 }
 0x2bc   : > { %v1909_v21 = vpop.f32.mrf.mxu2 }
 0x2bd   : > { %v1910_v58 = vadd.f32 %v4833_v49, %v1909_v21  ;;  %v1931_v21 = vmax.f32 %v1898_v35, 0.0  ;;  %v7603_v35 = vld [vmem:[#allocation23_spill] sm:$0xff] }
 0x2bf   : > { %v1935_v54 = vmax.f32 %v1910_v58, 0.0 }
 0x2cc   : > { %v1912_v40 = vpop.f32.mrf.mxu2 }
 0x2cd   : > { %v1913_v34 = vadd.f32 %v4833_v49, %v1912_v40  ;;  %v1932_v40 = vmax.f32 %v1901_v36, 0.0 }
 0x2cf   : > { %v1936_v6 = vmax.f32 %v1913_v34, 0.0 }
 0x2d7   : > { %v1915_v25 = vpop.f32.mrf.mxu2 }
 0x2d8   : > { %v1916_v61 = vadd.f32 %v4833_v49, %v1915_v25  ;;  %v1895_v25 = vadd.f32 %v4833_v49, %v1894_v39  ;;  %v7608_v39 = vld [vmem:[#allocation28_spill] sm:$0xff] }
 0x2da   : > { %v1937_v3 = vmax.f32 %v1916_v61, 0.0  ;;  %v1930_v28 = vmax.f32 %v1895_v25, 0.0 }
 0x2e7   : > { %v1918_v11 = vpop.f32.mrf.mxu2 }
 0x2e8   : > { %v1919_v20 = vadd.f32 %v4833_v49, %v1918_v11  ;;  %v1933_v11 = vmax.f32 %v1904_v18, 0.0 }
 0x2ea   : > { %v1938_v53 = vmax.f32 %v1919_v20, 0.0  ;;  %v2005_v20 = vld [vmem:[%s7424_s6 + $0x18] sm:$0xff] }
 0x2f4   : > { %v1921_v59 = vpop.f32.mrf.mxu2 }
 0x2f5   : > { %v1922_v30 = vadd.f32 %v4833_v49, %v1921_v59  ;;  %v1892_v59 = vadd.f32 %v4833_v49, %v1891_v51 }
 0x2f7   : > { %v1939_v52 = vmax.f32 %v1922_v30, 0.0  ;;  %v1929_v42 = vmax.f32 %v1892_v59, 0.0 }
 0x2f9   : > { %1940 = vmatpush.msrb.mxu3 %v1939_v52 }
 0x2fb   : > { %1941 = vmatpush.msrb.mxu3 %v1938_v53  ;;  %v1889_v53 = vadd.f32 %v4833_v49, %v1888_v14  ;;  %v7607_v14 = vld [vmem:[#allocation27_spill] sm:$0xff] }
 0x2fd   : > { %1942 = vmatpush.msrb.mxu3 %v1937_v3  ;;  %v1886_v3 = vadd.f32 %v4833_v49, %v1885_v43  ;;  %v1928_v58 = vmax.f32 %v1889_v53, 0.0  ;;  %v2008_v43 = vld [vmem:[%s7424_s6 + $0x30] sm:$0xff] }
 0x2fe   : > { %2135 = vmatpush.msrb.mxu1 %v2008_v43 }
 0x2ff   : > { %1943 = vmatpush.msrb.mxu3 %v1936_v6  ;;  %v1883_v6 = vadd.f32 %v4833_v49, %v1882_v29  ;;  %v1927_v27 = vmax.f32 %v1886_v3, 0.0  ;;  %v7606_v29 = vld [vmem:[#allocation26_spill] sm:$0xff] }
 0x300   : > { %2136 = vmatpush.msrb.mxu1 %v2007_v26 }
 0x301   : > { %1944 = vmatpush.msrb.mxu3 %v1935_v54  ;;  %v1880_v54 = vadd.f32 %v4833_v49, %v1879_v4  ;;  %v1926_v18 = vmax.f32 %v1883_v6, 0.0  ;;  %v7605_v4 = vld [vmem:[#allocation25_spill] sm:$0xff] }
 0x303   : > { %1945 = vmatpush.msrb.mxu3 %v1934_v47  ;;  %v1877_v47 = vadd.f32 %v4833_v49, %v1876_v41  ;;  %v1925_v36 = vmax.f32 %v1880_v54, 0.0  ;;  %v7604_v41 = vld [vmem:[#allocation24_spill] sm:$0xff]  ;;  %v2006_v49 = vld [vmem:[%s7424_s6 + $0x20] sm:$0xff] }
 0x304   : > { %2137 = vmatpush.msrb.mxu1 %v2006_v49 }
 0x305   : > { %1946 = vmatpush.msrb.mxu3 %v1933_v11  ;;  %v1924_v51 = vmax.f32 %v1877_v47, 0.0 }
 0x306   : > { %2138 = vmatpush.msrb.mxu1 %v2005_v20 }
 0x307   : > { %1947 = vmatpush.msrb.mxu3 %v1932_v40 }
 0x309   : > { %1948 = vmatpush.msrb.mxu3 %v1931_v21 }
 0x30b   : > { %1949 = vmatpush.msrb.mxu3 %v1930_v28 }
 0x30d   : > { %1950 = vmatpush.msrb.mxu3 %v1929_v42 }
 0x30f   : > { %1951 = vmatpush.msrb.mxu3 %v1928_v58 }
 0x311   : > { %1952 = vmatpush.msrb.mxu3 %v1927_v27  ;;  %v6246_v27 = vld [vmem:[%s7424_s6 + $0x2d9] ss:$0 sm:$0xff] }
 0x313   : > { %1953 = vmatpush.msrb.mxu3 %v1926_v18 }
 0x315   : > { %1954 = vmatpush.msrb.mxu3 %v1925_v36 }
 0x317   : > { %1955 = vmatpush.msrb.mxu3 %v1924_v51 }
 0x318   : > { %1956 = vmatmul.f32.vlgmr.msrb.gmra.mxu3 %v5318_v23 }
 0x320   : > { %1959 = vmatmul.f32.gmra.mxu3 %v5348_v31 }
 0x328   : > { %1962 = vmatmul.f32.gmra.mxu3 %v5377_v55 }
 0x330   : > { %1965 = vmatmul.f32.gmra.mxu3 %v5402_v38 }
 0x338   : > { %1968 = vmatmul.f32.gmra.mxu3 %v5431_v62 }
 0x340   : > { %1971 = vmatmul.f32.gmra.mxu3 %v7603_v35 }
 0x348   : > { %1974 = vmatmul.f32.gmra.mxu3 %v7604_v41 }
 0x350   : > { %1977 = vmatmul.f32.gmra.mxu3 %v7605_v4 }
 0x358   : > { %1980 = vmatmul.f32.gmra.mxu3 %v7606_v29 }
 0x360   : > { %1983 = vmatmul.f32.gmra.mxu3 %v7607_v14 }
 0x368   : > { %1986 = vmatmul.f32.gmra.mxu3 %v7608_v39 }
 0x370   : > { %1989 = vmatmul.f32.gmra.mxu3 %v7609_v57 }
 0x378   : > { %1992 = vmatmul.f32.gmra.mxu3 %v5682_v32 }
 0x380   : > { %1995 = vmatmul.f32.gmra.mxu3 %v5708_v33 }
 0x388   : > { %1998 = vmatmul.f32.gmra.mxu3 %v5733_v48 }
 0x390   : > { %2001 = vmatmul.f32.gmra.mxu3 %v5761_v46 }
 0x39b   : > { %v1957_v30 = vpop.f32.mrf.mxu3 }
 0x39c   : > { %4475 = vmatmul.msk.f32.vlgmr.msrb.gmra.mxu1 %vm7610_vm9, %v1957_v30  ;;  %vm7627_vm9 = vmmov %vm7616_vm0 }
 0x3a3   : > { %v1960_v61 = vpop.f32.mrf.mxu3 }
 0x3a4   : > { %4476 = vmatmul.msk.f32.gmra.mxu1 %vm7611_vm12, %v1960_v61  ;;  %vm7628_vm12 = vmmov %vm7616_vm0 }
 0x3ab   : > { %v1963_v52 = vpop.f32.mrf.mxu3 }
 0x3ac   : > { %4477 = vmatmul.msk.f32.gmra.mxu1 %vm7612_vm1, %v1963_v52  ;;  %vm7629_vm1 = vmmov %vm7616_vm0 }
 0x3b3   : > { %v1966_v34 = vpop.f32.mrf.mxu3 }
 0x3b4   : > { %4478 = vmatmul.msk.f32.gmra.mxu1 %vm7613_vm13, %v1966_v34  ;;  %vm7630_vm13 = vmmov %vm7616_vm0 }
 0x3bb   : > { %v1969_v11 = vpop.f32.mrf.mxu3 }
 0x3bc   : > { %4479 = vmatmul.msk.f32.gmra.mxu1 %vm7614_vm2, %v1969_v11  ;;  %vm7631_vm2 = vmmov %vm7616_vm0 }
 0x3c3   : > { %v1972_v25 = vpop.f32.mrf.mxu3 }
 0x3c4   : > { %4480 = vmatmul.msk.f32.gmra.mxu1 %vm7615_vm15, %v1972_v25  ;;  %vm7632_vm15 = vmmov %vm7616_vm0 }
 0x3cb   : > { %v1975_v40 = vpop.f32.mrf.mxu3 }
 0x3cc   : > { %4481 = vmatmul.msk.f32.gmra.mxu1 %vm7616_vm0, %v1975_v40 }
 0x3d3   : > { %v1978_v59 = vpop.f32.mrf.mxu3 }
 0x3d4   : > { %4482 = vmatmul.msk.f32.gmra.mxu1 %vm7617_vm14, %v1978_v59  ;;  %vm7633_vm14 = vmmov %vm7616_vm0 }
 0x3db   : > { %v1981_v21 = vpop.f32.mrf.mxu3 }
 0x3dc   : > { %4483 = vmatmul.msk.f32.gmra.mxu1 %vm7618_vm7, %v1981_v21  ;;  %vm7634_vm7 = vmmov %vm7616_vm0 }
 0x3e3   : > { %v1984_v53 = vpop.f32.mrf.mxu3 }
 0x3e4   : > { %4484 = vmatmul.msk.f32.gmra.mxu1 %vm7619_vm11, %v1984_v53  ;;  %vm7635_vm11 = vmmov %vm7616_vm0 }
 0x3eb   : > { %v1987_v28 = vpop.f32.mrf.mxu3 }
 0x3ec   : > { %4485 = vmatmul.msk.f32.gmra.mxu1 %vm7620_vm4, %v1987_v28  ;;  %vm7636_vm4 = vmmov %vm7616_vm0 }
 0x3f3   : > { %v1990_v3 = vpop.f32.mrf.mxu3 }
 0x3f4   : > { %4486 = vmatmul.msk.f32.gmra.mxu1 %vm7621_vm3, %v1990_v3  ;;  %vm7637_vm3 = vmmov %vm7616_vm0 }
 0x3fb   : > { %v1993_v42 = vpop.f32.mrf.mxu3 }
 0x3fc   : > { %4487 = vmatmul.msk.f32.gmra.mxu1 %vm7622_vm5, %v1993_v42  ;;  %vm7638_vm5 = vmmov %vm7616_vm0 }
 0x403   : > { %v1996_v6 = vpop.f32.mrf.mxu3 }
 0x404   : > { %4488 = vmatmul.msk.f32.gmra.mxu1 %vm7623_vm6, %v1996_v6  ;;  %vm7639_vm6 = vmmov %vm7616_vm0 }
 0x40b   : > { %v1999_v58 = vpop.f32.mrf.mxu3 }
 0x40c   : > { %4489 = vmatmul.msk.f32.gmra.mxu1 %vm7624_vm10, %v1999_v58  ;;  %v2051_v58 = vpop.f32.mrf.mxu0  ;;  %vm7640_vm10 = vmmov %vm7616_vm0 }
 0x413   : > { %v2002_v54 = vpop.f32.mrf.mxu3 }
 0x414   : > { %4490 = vmatmul.msk.f32.gmra.mxu1 %vm7625_vm8, %v2002_v54  ;;  %vm7641_vm8 = vmmov %vm7616_vm0 }
 0x419   : > { %v2140_v47 = vpop.f32.mrf.mxu1 }
 0x41a   : > { %v2141_v18 = vadd.f32 %v2140_v47, %v5841_v22 }
 0x41c   : > { %v2190_v36 = vadd.f32 %v6246_v27, %v2141_v18 }
 0x41e   : > { %v2206_v51 = vmul.f32 %v6023_v15, %v2190_v36 }
 0x420   : > { %2240 = vmatmul.f32.vlgmr.msra.gmra.mxu2 %v2206_v51 }
 0x421   : > { %v2143_v43 = vpop.f32.mrf.mxu1 }
 0x422   : > { %v2144_v26 = vadd.f32 %v2143_v43, %v5897_v56 }
 0x424   : > { %v2191_v49 = vadd.f32 %v6246_v27, %v2144_v26 }
 0x426   : > { %v2207_v20 = vmul.f32 %v6043_v10, %v2191_v49 }
 0x428   : > { %2243 = vmatmul.f32.gmra.mxu2 %v2207_v20 }
 0x429   : > { %v2146_v30 = vpop.f32.mrf.mxu1 }
 0x42a   : > { %v2147_v61 = vadd.f32 %v2146_v30, %v5941_v45 }
 0x42c   : > { %v2192_v52 = vadd.f32 %v6246_v27, %v2147_v61 }
 0x42e   : > { %v2208_v22 = vmul.f32 %v6069_v16, %v2192_v52 }
 0x430   : > { %2246 = vmatmul.f32.gmra.mxu2 %v2208_v22 }
 0x431   : > { %v2149_v34 = vpop.f32.mrf.mxu1 }
 0x432   : > { %v2150_v11 = vadd.f32 %v2149_v34, %v5967_v24 }
 0x434   : > { %v2193_v25 = vadd.f32 %v6246_v27, %v2150_v11 }
 0x436   : > { %v2209_v56 = vmul.f32 %v6092_v50, %v2193_v25 }
 0x438   : > { %2249 = vmatmul.f32.gmra.mxu2 %v2209_v56 }
 0x439   : > { %v2152_v40 = vpop.f32.mrf.mxu1 }
 0x43a   : > { %v2153_v59 = vadd.f32 %v2152_v40, %v5993_v37 }
 0x43c   : > { %v2194_v21 = vadd.f32 %v6246_v27, %v2153_v59 }
 0x43e   : > { %v2210_v45 = vmul.f32 %v6115_v60, %v2194_v21 }
 0x440   : > { %2252 = vmatmul.f32.gmra.mxu2 %v2210_v45 }
 0x441   : > { %v2155_v53 = vpop.f32.mrf.mxu1 }
 0x442   : > { %v2156_v28 = vadd.f32 %v2155_v53, %v6030_v9  ;;  %v2054_v9 = vpop.f32.mrf.mxu0 }
 0x444   : > { %v2195_v3 = vadd.f32 %v6246_v27, %v2156_v28 }
 0x446   : > { %v2211_v24 = vmul.f32 %v6131_v0, %v2195_v3 }
 0x448   : > { %2255 = vmatmul.f32.gmra.mxu2 %v2211_v24 }
 0x449   : > { %v2158_v42 = vpop.f32.mrf.mxu1 }
 0x44a   : > { %v2159_v6 = vadd.f32 %v2158_v42, %v6053_v12  ;;  %v2057_v20 = vpop.f32.mrf.mxu0 }
 0x44c   : > { %v2196_v54 = vadd.f32 %v6246_v27, %v2159_v6 }
 0x44e   : > { %v2212_v37 = vmul.f32 %v6138_v2, %v2196_v54 }
 0x450   : > { %2258 = vmatmul.f32.gmra.mxu2 %v2212_v37 }
 0x451   : > { %v2161_v47 = vpop.f32.mrf.mxu1 }
 0x452   : > { %v2162_v18 = vadd.f32 %v2161_v47, %v6087_v44  ;;  %v2060_v22 = vpop.f32.mrf.mxu0 }
 0x454   : > { %v2197_v36 = vadd.f32 %v6246_v27, %v2162_v18 }
 0x456   : > { %v2213_v51 = vmul.f32 %v6144_v19, %v2197_v36 }
 0x458   : > { %2261 = vmatmul.f32.gmra.mxu2 %v2213_v51 }
 0x459   : > { %v2164_v43 = vpop.f32.mrf.mxu1 }
 0x45a   : > { %v2165_v26 = vadd.f32 %v2164_v43, %v2051_v58  ;;  %v2063_v21 = vpop.f32.mrf.mxu0 }
 0x45c   : > { %v2198_v49 = vadd.f32 %v6246_v27, %v2165_v26 }
 0x45e   : > { %v2214_v12 = vmul.f32 %v6150_v17, %v2198_v49 }
 0x460   : > { %2264 = vmatmul.f32.gmra.mxu2 %v2214_v12 }
 0x461   : > { %v2167_v30 = vpop.f32.mrf.mxu1 }
 0x462   : > { %v2168_v61 = vadd.f32 %v2167_v30, %v2054_v9  ;;  %v2066_v42 = vpop.f32.mrf.mxu0  ;;  %v7626_v30 = vld [vmem:[#allocation30_spill] sm:$0xff] }
 0x464   : > { %v2199_v52 = vadd.f32 %v6246_v27, %v2168_v61 }
 0x466   : > { %v2215_v44 = vmul.f32 %v6156_v63, %v2199_v52 }
 0x468   : > { %2267 = vmatmul.f32.gmra.mxu2 %v2215_v44 }
 0x469   : > { %v2170_v34 = vpop.f32.mrf.mxu1 }
 0x46a   : > { %v2171_v11 = vadd.f32 %v2170_v34, %v2057_v20  ;;  %v2069_v18 = vpop.f32.mrf.mxu0 }
 0x46c   : > { %v2200_v25 = vadd.f32 %v6246_v27, %v2171_v11 }
 0x46e   : > { %v2216_v56 = vmul.f32 %v6162_v1, %v2200_v25 }
 0x470   : > { %2270 = vmatmul.f32.gmra.mxu2 %v2216_v56 }
 0x471   : > { %v2173_v40 = vpop.f32.mrf.mxu1 }
 0x472   : > { %v2174_v59 = vadd.f32 %v2173_v40, %v2060_v22  ;;  %v2072_v26 = vpop.f32.mrf.mxu0 }
 0x474   : > { %v2201_v45 = vadd.f32 %v6246_v27, %v2174_v59 }
 0x476   : > { %v2217_v53 = vmul.f32 %v6168_v8, %v2201_v45 }
 0x478   : > { %2273 = vmatmul.f32.gmra.mxu2 %v2217_v53 }
 0x479   : > { %v2176_v28 = vpop.f32.mrf.mxu1 }
 0x47a   : > { %v2177_v3 = vadd.f32 %v2176_v28, %v2063_v21 }
 0x47c   : > { %v2202_v24 = vadd.f32 %v6246_v27, %v2177_v3 }
 0x47e   : > { %v2218_v6 = vmul.f32 %v6174_v5, %v2202_v24 }
 0x480   : > { %2276 = vmatmul.f32.gmra.mxu2 %v2218_v6 }
 0x481   : > { %v2179_v58 = vpop.f32.mrf.mxu1 }
 0x482   : > { %v2180_v54 = vadd.f32 %v2179_v58, %v2066_v42 }
 0x484   : > { %v2203_v37 = vadd.f32 %v6246_v27, %v2180_v54 }
 0x486   : > { %v2219_v47 = vmul.f32 %v6180_v13, %v2203_v37 }
 0x488   : > { %2279 = vmatmul.f32.gmra.mxu2 %v2219_v47 }
 0x489   : > { %v2182_v36 = vpop.f32.mrf.mxu1 }
 0x48a   : > { %v2183_v9 = vadd.f32 %v2182_v36, %v2069_v18 }
 0x48c   : > { %v2204_v51 = vadd.f32 %v6246_v27, %v2183_v9 }
 0x48e   : > { %v2220_v43 = vmul.f32 %v6186_v7, %v2204_v51 }
 0x490   : > { %2282 = vmatmul.f32.gmra.mxu2 %v2220_v43 }
 0x491   : > { %v2185_v49 = vpop.f32.mrf.mxu1 }
 0x492   : > { %v2186_v12 = vadd.f32 %v2185_v49, %v2072_v26 }
 0x494   : > { %v2205_v20 = vadd.f32 %v6246_v27, %v2186_v12  ;;  %v4835_v27 = vld [vmem:[%s7424_s6 + $0x2dc] ss:$0 sm:$0xff] }
 0x496   : > { %v2221_v61 = vmul.f32 %v7626_v30, %v2205_v20 }
 0x498   : > { %2285 = vmatmul.f32.gmra.mxu2 %v2221_v61 }
 0x4a3   : > { %v2241_v52 = vpop.f32.mrf.mxu2 }
 0x4ab   : > { %v2244_v44 = vpop.f32.mrf.mxu2 }
 0x4b3   : > { %v2247_v22 = vpop.f32.mrf.mxu2 }
 0x4bb   : > { %v2250_v34 = vpop.f32.mrf.mxu2 }
 0x4c3   : > { %v2253_v11 = vpop.f32.mrf.mxu2 }
 0x4cb   : > { %v2256_v25 = vpop.f32.mrf.mxu2 }
 0x4d3   : > { %v2259_v56 = vpop.f32.mrf.mxu2 }
 0x4db   : > { %v2262_v40 = vpop.f32.mrf.mxu2 }
 0x4dc   : > { %v2263_v61 = vadd.f32 %v4835_v27, %v2262_v40  ;;  %v2242_v40 = vadd.f32 %v4835_v27, %v2241_v52  ;;  %v2392_v52 = vpop.f32.mrf.mxu0 }
 0x4e3   : > { %v2265_v59 = vpop.f32.mrf.mxu2 }
 0x4e4   : > { %v2266_v12 = vadd.f32 %v4835_v27, %v2265_v59  ;;  %v2245_v59 = vadd.f32 %v4835_v27, %v2244_v44 }
 0x4eb   : > { %v2268_v21 = vpop.f32.mrf.mxu2 }
 0x4ec   : > { %v2269_v26 = vadd.f32 %v4835_v27, %v2268_v21  ;;  %v2248_v21 = vadd.f32 %v4835_v27, %v2247_v22 }
 0x4f3   : > { %v2271_v45 = vpop.f32.mrf.mxu2 }
 0x4f4   : > { %v2272_v51 = vadd.f32 %v4835_v27, %v2271_v45  ;;  %v2251_v45 = vadd.f32 %v4835_v27, %v2250_v34  ;;  %v2395_v34 = vpop.f32.mrf.mxu0 }
 0x4f6   : > { %v2299_v20 = vmax.f32 %v2272_v51, 0.0 }
 0x4fb   : > { %v2274_v53 = vpop.f32.mrf.mxu2 }
 0x4fc   : > { %v2275_v36 = vadd.f32 %v4835_v27, %v2274_v53  ;;  %v2254_v53 = vadd.f32 %v4835_v27, %v2253_v11 }
 0x4fe   : > { %v2300_v49 = vmax.f32 %v2275_v36, 0.0 }
 0x503   : > { %v2277_v28 = vpop.f32.mrf.mxu2 }
 0x504   : > { %v2278_v47 = vadd.f32 %v4835_v27, %v2277_v28  ;;  %v2257_v28 = vadd.f32 %v4835_v27, %v2256_v25  ;;  %v2289_v25 = vmax.f32 %v2242_v40, 0.0 }
 0x506   : > { %v2301_v43 = vmax.f32 %v2278_v47, 0.0  ;;  %v2292_v47 = vmax.f32 %v2251_v45, 0.0 }
 0x50b   : > { %v2280_v3 = vpop.f32.mrf.mxu2 }
 0x50c   : > { %v2281_v54 = vadd.f32 %v4835_v27, %v2280_v3  ;;  %v2260_v3 = vadd.f32 %v4835_v27, %v2259_v56  ;;  %v2290_v56 = vmax.f32 %v2245_v59, 0.0 }
 0x50e   : > { %v2302_v9 = vmax.f32 %v2281_v54, 0.0  ;;  %v2294_v54 = vmax.f32 %v2257_v28, 0.0 }
 0x513   : > { %v2283_v24 = vpop.f32.mrf.mxu2 }
 0x514   : > { %v2284_v6 = vadd.f32 %v4835_v27, %v2283_v24  ;;  %v2298_v24 = vmax.f32 %v2269_v26, 0.0 }
 0x516   : > { %v2303_v18 = vmax.f32 %v2284_v6, 0.0  ;;  %v2296_v6 = vmax.f32 %v2263_v61, 0.0 }
 0x51b   : > { %v2286_v42 = vpop.f32.mrf.mxu2 }
 0x51c   : > { %v2287_v58 = vadd.f32 %v4835_v27, %v2286_v42  ;;  %v2297_v42 = vmax.f32 %v2266_v12, 0.0  ;;  %v2398_v27 = vpop.f32.mrf.mxu0 }
 0x51e   : > { %v2304_v37 = vmax.f32 %v2287_v58, 0.0  ;;  %v2295_v58 = vmax.f32 %v2260_v3, 0.0 }
 0x520   : > { %2305 = vmatpush.msra.mxu3 %v2304_v37  ;;  %v2293_v37 = vmax.f32 %v2254_v53, 0.0 }
 0x522   : > { %2306 = vmatpush.msra.mxu3 %v2303_v18  ;;  %v2291_v18 = vmax.f32 %v2248_v21, 0.0 }
 0x524   : > { %2307 = vmatpush.msra.mxu3 %v2302_v9  ;;  %v6338_v9 = vld [vmem:[%s7424_s6 + $0x2da] ss:$0 sm:$0xff]  ;;  %v2401_v51 = vpop.f32.mrf.mxu0 }
 0x526   : > { %2308 = vmatpush.msra.mxu3 %v2301_v43 }
 0x528   : > { %2309 = vmatpush.msra.mxu3 %v2300_v49 }
 0x52a   : > { %2310 = vmatpush.msra.mxu3 %v2299_v20 }
 0x52c   : > { %2311 = vmatpush.msra.mxu3 %v2298_v24  ;;  %v2404_v24 = vpop.f32.mrf.mxu0 }
 0x52e   : > { %2312 = vmatpush.msra.mxu3 %v2297_v42 }
 0x530   : > { %2313 = vmatpush.msra.mxu3 %v2296_v6 }
 0x532   : > { %2314 = vmatpush.msra.mxu3 %v2295_v58 }
 0x534   : > { %2315 = vmatpush.msra.mxu3 %v2294_v54  ;;  %v2407_v58 = vpop.f32.mrf.mxu0 }
 0x536   : > { %2316 = vmatpush.msra.mxu3 %v2293_v37 }
 0x538   : > { %2317 = vmatpush.msra.mxu3 %v2292_v47 }
 0x53a   : > { %2318 = vmatpush.msra.mxu3 %v2291_v18 }
 0x53c   : > { %2319 = vmatpush.msra.mxu3 %v2290_v56  ;;  %v2410_v59 = vpop.f32.mrf.mxu0 }
 0x53e   : > { %2320 = vmatpush.msra.mxu3 %v2289_v25 }
 0x53f   : > { %2321 = vmatmul.f32.vlgmr.msra.gmra.mxu3 %v5318_v23  ;;  %v2373_v23 = vld [vmem:[%s7424_s6 + $0x58] sm:$0xff] }
 0x540   : > { %2500 = vmatpush.msra.mxu1 %v2373_v23 }
 0x544   : > { %v2413_v56 = vpop.f32.mrf.mxu0 }
 0x547   : > { %2324 = vmatmul.f32.gmra.mxu3 %v5348_v31  ;;  %v2372_v31 = vld [vmem:[%s7424_s6 + $0x50] sm:$0xff] }
 0x548   : > { %2501 = vmatpush.msra.mxu1 %v2372_v31 }
 0x54f   : > { %2327 = vmatmul.f32.gmra.mxu3 %v5377_v55  ;;  %v2371_v55 = vld [vmem:[%s7424_s6 + $0x48] sm:$0xff] }
 0x550   : > { %2502 = vmatpush.msra.mxu1 %v2371_v55 }
 0x557   : > { %2330 = vmatmul.f32.gmra.mxu3 %v5402_v38  ;;  %v2370_v38 = vld [vmem:[%s7424_s6 + $0x40] sm:$0xff] }
 0x558   : > { %2503 = vmatpush.msra.mxu1 %v2370_v38 }
 0x55f   : > { %2333 = vmatmul.f32.gmra.mxu3 %v5431_v62 }
 0x567   : > { %2336 = vmatmul.f32.gmra.mxu3 %v7603_v35 }
 0x56f   : > { %2339 = vmatmul.f32.gmra.mxu3 %v7604_v41 }
 0x577   : > { %2342 = vmatmul.f32.gmra.mxu3 %v7605_v4 }
 0x57f   : > { %2345 = vmatmul.f32.gmra.mxu3 %v7606_v29 }
 0x587   : > { %2348 = vmatmul.f32.gmra.mxu3 %v7607_v14 }
 0x58f   : > { %2351 = vmatmul.f32.gmra.mxu3 %v7608_v39 }
 0x597   : > { %2354 = vmatmul.f32.gmra.mxu3 %v7609_v57 }
 0x59f   : > { %2357 = vmatmul.f32.gmra.mxu3 %v5682_v32 }
 0x5a7   : > { %2360 = vmatmul.f32.gmra.mxu3 %v5708_v33 }
 0x5af   : > { %2363 = vmatmul.f32.gmra.mxu3 %v5733_v48 }
 0x5b7   : > { %2366 = vmatmul.f32.gmra.mxu3 %v5761_v46 }
 0x5c2   : > { %v2322_v62 = vpop.f32.mrf.mxu3 }
 0x5c3   : > { %4523 = vmatmul.msk.f32.vlgmr.msra.gmra.mxu1 %vm7627_vm9, %v2322_v62  ;;  %vm7642_vm9 = vmmov %vm7616_vm0 }
 0x5ca   : > { %v2325_v35 = vpop.f32.mrf.mxu3 }
 0x5cb   : > { %4524 = vmatmul.msk.f32.gmra.mxu1 %vm7628_vm12, %v2325_v35  ;;  %vm7643_vm12 = vmmov %vm7616_vm0 }
 0x5d2   : > { %v2328_v41 = vpop.f32.mrf.mxu3 }
 0x5d3   : > { %4525 = vmatmul.msk.f32.gmra.mxu1 %vm7629_vm1, %v2328_v41  ;;  %vm7644_vm1 = vmmov %vm7616_vm0 }
 0x5da   : > { %v2331_v32 = vpop.f32.mrf.mxu3 }
 0x5db   : > { %4526 = vmatmul.msk.f32.gmra.mxu1 %vm7630_vm13, %v2331_v32  ;;  %vm7645_vm13 = vmmov %vm7616_vm0 }
 0x5e2   : > { %v2334_v4 = vpop.f32.mrf.mxu3 }
 0x5e3   : > { %4527 = vmatmul.msk.f32.gmra.mxu1 %vm7631_vm2, %v2334_v4  ;;  %vm7646_vm2 = vmmov %vm7616_vm0 }
 0x5ea   : > { %v2337_v33 = vpop.f32.mrf.mxu3 }
 0x5eb   : > { %4528 = vmatmul.msk.f32.gmra.mxu1 %vm7632_vm15, %v2337_v33  ;;  %vm7647_vm15 = vmmov %vm7616_vm0 }
 0x5f2   : > { %v2340_v48 = vpop.f32.mrf.mxu3 }
 0x5f3   : > { %4529 = vmatmul.msk.f32.gmra.mxu1 %vm7616_vm0, %v2340_v48 }
 0x5fa   : > { %v2343_v46 = vpop.f32.mrf.mxu3 }
 0x5fb   : > { %4530 = vmatmul.msk.f32.gmra.mxu1 %vm7633_vm14, %v2343_v46  ;;  %vm7648_vm14 = vmmov %vm7616_vm0 }
 0x602   : > { %v2346_v29 = vpop.f32.mrf.mxu3 }
 0x603   : > { %4531 = vmatmul.msk.f32.gmra.mxu1 %vm7634_vm7, %v2346_v29  ;;  %vm7649_vm7 = vmmov %vm7616_vm0 }
 0x60a   : > { %v2349_v14 = vpop.f32.mrf.mxu3 }
 0x60b   : > { %4532 = vmatmul.msk.f32.gmra.mxu1 %vm7635_vm11, %v2349_v14  ;;  %vm7650_vm11 = vmmov %vm7616_vm0 }
 0x612   : > { %v2352_v39 = vpop.f32.mrf.mxu3 }
 0x613   : > { %4533 = vmatmul.msk.f32.gmra.mxu1 %vm7636_vm4, %v2352_v39  ;;  %vm7651_vm4 = vmmov %vm7616_vm0 }
 0x61a   : > { %v2355_v57 = vpop.f32.mrf.mxu3 }
 0x61b   : > { %4534 = vmatmul.msk.f32.gmra.mxu1 %vm7637_vm3, %v2355_v57  ;;  %vm7652_vm3 = vmmov %vm7616_vm0 }
 0x622   : > { %v2358_v44 = vpop.f32.mrf.mxu3 }
 0x623   : > { %4535 = vmatmul.msk.f32.gmra.mxu1 %vm7638_vm5, %v2358_v44  ;;  %vm7653_vm5 = vmmov %vm7616_vm0 }
 0x62a   : > { %v2361_v22 = vpop.f32.mrf.mxu3 }
 0x62b   : > { %4536 = vmatmul.msk.f32.gmra.mxu1 %vm7639_vm6, %v2361_v22  ;;  %vm7654_vm6 = vmmov %vm7616_vm0 }
 0x632   : > { %v2364_v11 = vpop.f32.mrf.mxu3 }
 0x633   : > { %4537 = vmatmul.msk.f32.gmra.mxu1 %vm7640_vm10, %v2364_v11  ;;  %vm7655_vm10 = vmmov %vm7616_vm0 }
 0x63a   : > { %v2367_v36 = vpop.f32.mrf.mxu3 }
 0x63b   : > { %4538 = vmatmul.msk.f32.gmra.mxu1 %vm7641_vm8, %v2367_v36  ;;  %vm7656_vm8 = vmmov %vm7616_vm0 }
 0x640   : > { %v2505_v43 = vpop.f32.mrf.mxu1 }
 0x641   : > { %v2506_v26 = vadd.f32 %v2505_v43, %v2392_v52 }
 0x643   : > { %v2555_v49 = vadd.f32 %v6338_v9, %v2506_v26 }
 0x645   : > { %v2571_v12 = vmul.f32 %v6023_v15, %v2555_v49 }
 0x647   : > { %2605 = vmatmul.f32.vlgmr.msrb.gmra.mxu2 %v2571_v12 }
 0x648   : > { %v2508_v20 = vpop.f32.mrf.mxu1 }
 0x649   : > { %v2509_v61 = vadd.f32 %v2508_v20, %v2395_v34 }
 0x64b   : > { %v2556_v3 = vadd.f32 %v6338_v9, %v2509_v61 }
 0x64d   : > { %v2572_v42 = vmul.f32 %v6043_v10, %v2556_v3 }
 0x64f   : > { %2608 = vmatmul.f32.gmra.mxu2 %v2572_v42 }
 0x650   : > { %v2511_v28 = vpop.f32.mrf.mxu1 }
 0x651   : > { %v2512_v6 = vadd.f32 %v2511_v28, %v2398_v27 }
 0x653   : > { %v2557_v53 = vadd.f32 %v6338_v9, %v2512_v6 }
 0x655   : > { %v2573_v45 = vmul.f32 %v6069_v16, %v2557_v53 }
 0x657   : > { %2611 = vmatmul.f32.gmra.mxu2 %v2573_v45 }
 0x658   : > { %v2514_v54 = vpop.f32.mrf.mxu1 }
 0x659   : > { %v2515_v21 = vadd.f32 %v2514_v54, %v2401_v51 }
 0x65b   : > { %v2558_v15 = vadd.f32 %v6338_v9, %v2515_v21 }
 0x65d   : > { %v2574_v37 = vmul.f32 %v6092_v50, %v2558_v15  ;;  %v2416_v50 = vpop.f32.mrf.mxu0 }
 0x65f   : > { %2614 = vmatmul.f32.gmra.mxu2 %v2574_v37 }
 0x660   : > { %v2517_v47 = vpop.f32.mrf.mxu1 }
 0x661   : > { %v2518_v40 = vadd.f32 %v2517_v47, %v2404_v24 }
 0x663   : > { %v2559_v10 = vadd.f32 %v6338_v9, %v2518_v40 }
 0x665   : > { %v2575_v18 = vmul.f32 %v6115_v60, %v2559_v10  ;;  %v2419_v4 = vpop.f32.mrf.mxu0 }
 0x667   : > { %2617 = vmatmul.f32.gmra.mxu2 %v2575_v18 }
 0x668   : > { %v2520_v25 = vpop.f32.mrf.mxu1 }
 0x669   : > { %v2521_v23 = vadd.f32 %v2520_v25, %v2407_v58 }
 0x66b   : > { %v2560_v16 = vadd.f32 %v6338_v9, %v2521_v23 }
 0x66d   : > { %v2576_v31 = vmul.f32 %v6131_v0, %v2560_v16  ;;  %v2422_v14 = vpop.f32.mrf.mxu0 }
 0x66f   : > { %2620 = vmatmul.f32.gmra.mxu2 %v2576_v31 }
 0x670   : > { %v2523_v55 = vpop.f32.mrf.mxu1 }
 0x671   : > { %v2524_v38 = vadd.f32 %v2523_v55, %v2410_v59 }
 0x673   : > { %v2561_v62 = vadd.f32 %v6338_v9, %v2524_v38 }
 0x675   : > { %v2577_v35 = vmul.f32 %v6138_v2, %v2561_v62  ;;  %v2425_v44 = vpop.f32.mrf.mxu0 }
 0x677   : > { %2623 = vmatmul.f32.gmra.mxu2 %v2577_v35 }
 0x678   : > { %v2526_v41 = vpop.f32.mrf.mxu1 }
 0x679   : > { %v2527_v32 = vadd.f32 %v2526_v41, %v2413_v56 }
 0x67b   : > { %v2562_v60 = vadd.f32 %v6338_v9, %v2527_v32 }
 0x67d   : > { %v2578_v33 = vmul.f32 %v6144_v19, %v2562_v60 }
 0x67f   : > { %2626 = vmatmul.f32.gmra.mxu2 %v2578_v33 }
 0x680   : > { %v2529_v48 = vpop.f32.mrf.mxu1 }
 0x681   : > { %v2530_v46 = vadd.f32 %v2529_v48, %v2416_v50 }
 0x683   : > { %v2563_v0 = vadd.f32 %v6338_v9, %v2530_v46 }
 0x685   : > { %v2579_v29 = vmul.f32 %v6150_v17, %v2563_v0  ;;  %v2428_v17 = vpop.f32.mrf.mxu0 }
 0x687   : > { %2629 = vmatmul.f32.gmra.mxu2 %v2579_v29 }
 0x688   : > { %v2532_v39 = vpop.f32.mrf.mxu1 }
 0x689   : > { %v2533_v57 = vadd.f32 %v2532_v39, %v2419_v4 }
 0x68b   : > { %v2564_v2 = vadd.f32 %v6338_v9, %v2533_v57 }
 0x68d   : > { %v2580_v52 = vmul.f32 %v6156_v63, %v2564_v2  ;;  %v2431_v12 = vpop.f32.mrf.mxu0 }
 0x68f   : > { %2632 = vmatmul.f32.gmra.mxu2 %v2580_v52 }
 0x690   : > { %v2535_v22 = vpop.f32.mrf.mxu1 }
 0x691   : > { %v2536_v34 = vadd.f32 %v2535_v22, %v2422_v14 }
 0x693   : > { %v2565_v19 = vadd.f32 %v6338_v9, %v2536_v34 }
 0x695   : > { %v2581_v11 = vmul.f32 %v6162_v1, %v2565_v19  ;;  %v2434_v42 = vpop.f32.mrf.mxu0 }
 0x697   : > { %2635 = vmatmul.f32.gmra.mxu2 %v2581_v11 }
 0x698   : > { %v2538_v27 = vpop.f32.mrf.mxu1 }
 0x699   : > { %v2539_v36 = vadd.f32 %v2538_v27, %v2425_v44 }
 0x69b   : > { %v2566_v51 = vadd.f32 %v6338_v9, %v2539_v36 }
 0x69d   : > { %v2582_v43 = vmul.f32 %v6168_v8, %v2566_v51  ;;  %v2437_v58 = vpop.f32.mrf.mxu0 }
 0x69f   : > { %2638 = vmatmul.f32.gmra.mxu2 %v2582_v43 }
 0x6a0   : > { %v2541_v26 = vpop.f32.mrf.mxu1 }
 0x6a1   : > { %v2542_v49 = vadd.f32 %v2541_v26, %v2428_v17 }
 0x6a3   : > { %v2567_v63 = vadd.f32 %v6338_v9, %v2542_v49 }
 0x6a5   : > { %v2583_v20 = vmul.f32 %v6174_v5, %v2567_v63 }
 0x6a7   : > { %2641 = vmatmul.f32.gmra.mxu2 %v2583_v20  ;;  %v2670_v20 = vld [vmem:[%s7424_s6 + $0x68] sm:$0xff] }
 0x6a8   : > { %v2544_v61 = vpop.f32.mrf.mxu1 }
 0x6a9   : > { %v2545_v24 = vadd.f32 %v2544_v61, %v2431_v12  ;;  %v2671_v61 = vld [vmem:[%s7424_s6 + $0x70] sm:$0xff] }
 0x6ab   : > { %v2568_v1 = vadd.f32 %v6338_v9, %v2545_v24  ;;  %v2672_v24 = vld [vmem:[%s7424_s6 + $0x78] sm:$0xff] }
 0x6ad   : > { %v2584_v3 = vmul.f32 %v6180_v13, %v2568_v1  ;;  %v2673_v1 = vld [vmem:[%s7424_s6 + $0x80] sm:$0xff] }
 0x6af   : > { %2644 = vmatmul.f32.gmra.mxu2 %v2584_v3  ;;  %v2674_v3 = vld [vmem:[%s7424_s6 + $0x88] sm:$0xff] }
 0x6b0   : > { %v2547_v28 = vpop.f32.mrf.mxu1 }
 0x6b1   : > { %v2548_v6 = vadd.f32 %v2547_v28, %v2434_v42  ;;  %v2675_v42 = vld [vmem:[%s7424_s6 + $0x90] sm:$0xff]  ;;  %v2676_v28 = vld [vmem:[%s7424_s6 + $0x98] sm:$0xff] }
 0x6b3   : > { %v2569_v8 = vadd.f32 %v6338_v9, %v2548_v6  ;;  %v2677_v6 = vld [vmem:[%s7424_s6 + $0xa0] sm:$0xff] }
 0x6b5   : > { %v2585_v53 = vmul.f32 %v6186_v7, %v2569_v8  ;;  %v2678_v8 = vld [vmem:[%s7424_s6 + $0xa8] sm:$0xff] }
 0x6b7   : > { %2647 = vmatmul.f32.gmra.mxu2 %v2585_v53  ;;  %v2679_v53 = vld [vmem:[%s7424_s6 + $0xb0] sm:$0xff] }
 0x6b8   : > { %v2550_v45 = vpop.f32.mrf.mxu1 }
 0x6b9   : > { %v2551_v54 = vadd.f32 %v2550_v45, %v2437_v58  ;;  %v2680_v58 = vld [vmem:[%s7424_s6 + $0xb8] sm:$0xff]  ;;  %v2681_v45 = vld [vmem:[%s7424_s6 + $0xc0] sm:$0xff] }
 0x6bb   : > { %v2570_v5 = vadd.f32 %v6338_v9, %v2551_v54  ;;  %v2682_v54 = vld [vmem:[%s7424_s6 + $0xc8] sm:$0xff] }
 0x6bd   : > { %v2586_v21 = vmul.f32 %v7626_v30, %v2570_v5  ;;  %v4837_v30 = vld [vmem:[%s7424_s6 + $0x2dd] ss:$0 sm:$0xff]  ;;  %v2683_v5 = vld [vmem:[%s7424_s6 + $0xd0] sm:$0xff] }
 0x6bf   : > { %2650 = vmatmul.f32.gmra.mxu2 %v2586_v21  ;;  %v2684_v21 = vld [vmem:[%s7424_s6 + $0xd8] sm:$0xff] }
 0x6ca   : > { %v2606_v15 = vpop.f32.mrf.mxu2 }
 0x6cb   : > { %v2607_v26 = vadd.f32 %v4837_v30, %v2606_v15  ;;  %v2685_v15 = vld [vmem:[%s7424_s6 + $0xe0] sm:$0xff] }
 0x6cd   : > { %v2654_v12 = vmax.f32 %v2607_v26, 0.0 }
 0x6d2   : > { %v2609_v37 = vpop.f32.mrf.mxu2 }
 0x6d3   : > { %v2610_v51 = vadd.f32 %v4837_v30, %v2609_v37  ;;  %v2686_v37 = vld [vmem:[%s7424_s6 + $0xe8] sm:$0xff] }
 0x6d5   : > { %v2655_v63 = vmax.f32 %v2610_v51, 0.0 }
 0x6da   : > { %v2612_v13 = vpop.f32.mrf.mxu2 }
 0x6db   : > { %v2613_v36 = vadd.f32 %v4837_v30, %v2612_v13 }
 0x6dd   : > { %v2656_v49 = vmax.f32 %v2613_v36, 0.0 }
 0x6e2   : > { %v2615_v59 = vpop.f32.mrf.mxu2 }
 0x6e3   : > { %v2616_v11 = vadd.f32 %v4837_v30, %v2615_v59  ;;  %v2687_v59 = vld [vmem:[%s7424_s6 + $0xf0] sm:$0xff] }
 0x6e5   : > { %v2657_v43 = vmax.f32 %v2616_v11, 0.0 }
 0x6ea   : > { %v2618_v47 = vpop.f32.mrf.mxu2 }
 0x6eb   : > { %v2619_v34 = vadd.f32 %v4837_v30, %v2618_v47 }
 0x6ed   : > { %v2658_v17 = vmax.f32 %v2619_v34, 0.0 }
 0x6f2   : > { %v2621_v40 = vpop.f32.mrf.mxu2 }
 0x6f3   : > { %v2622_v44 = vadd.f32 %v4837_v30, %v2621_v40  ;;  %v2688_v40 = vld [vmem:[%s7424_s6 + $0xf8] sm:$0xff] }
 0x6f5   : > { %v2659_v27 = vmax.f32 %v2622_v44, 0.0  ;;  %v6504_v44 = vld [vmem:[%s7424_s6 + $0x2df] ss:$0 sm:$0xff] }
 0x6fa   : > { %v2624_v10 = vpop.f32.mrf.mxu2 }
 0x6fb   : > { %v2625_v2 = vadd.f32 %v4837_v30, %v2624_v10 }
 0x6fd   : > { %v2660_v19 = vmax.f32 %v2625_v2, 0.0  ;;  %v6498_v2 = vld [vmem:[%s7424_s6 + $0x2de] ss:$0 sm:$0xff] }
 0x702   : > { %v2627_v18 = vpop.f32.mrf.mxu2 }
 0x703   : > { %v2628_v39 = vadd.f32 %v4837_v30, %v2627_v18  ;;  %v2689_v18 = vld [vmem:[%s7424_s6 + $0x100] sm:$0xff] }
 0x705   : > { %v2661_v22 = vmax.f32 %v2628_v39, 0.0  ;;  %v2701_v39 = vld [vmem:[%s7424_s6 + $0x160] sm:$0xff] }
 0x70a   : > { %v2630_v56 = vpop.f32.mrf.mxu2 }
 0x70b   : > { %v2631_v29 = vadd.f32 %v4837_v30, %v2630_v56 }
 0x70d   : > { %v2662_v52 = vmax.f32 %v2631_v29, 0.0  ;;  %v2700_v29 = vld [vmem:[%s7424_s6 + $0x158] sm:$0xff] }
 0x712   : > { %v2633_v25 = vpop.f32.mrf.mxu2 }
 0x713   : > { %v2634_v46 = vadd.f32 %v4837_v30, %v2633_v25  ;;  %v2690_v25 = vld [vmem:[%s7424_s6 + $0x108] sm:$0xff] }
 0x715   : > { %v2663_v57 = vmax.f32 %v2634_v46, 0.0  ;;  %v2699_v46 = vld [vmem:[%s7424_s6 + $0x150] sm:$0xff] }
 0x71a   : > { %v2636_v7 = vpop.f32.mrf.mxu2 }
 0x71b   : > { %v2637_v33 = vadd.f32 %v4837_v30, %v2636_v7 }
 0x71d   : > { %v2664_v14 = vmax.f32 %v2637_v33, 0.0  ;;  %v2698_v33 = vld [vmem:[%s7424_s6 + $0x148] sm:$0xff] }
 0x722   : > { %v2639_v23 = vpop.f32.mrf.mxu2 }
 0x723   : > { %v2640_v60 = vadd.f32 %v4837_v30, %v2639_v23  ;;  %v2691_v23 = vld [vmem:[%s7424_s6 + $0x110] sm:$0xff] }
 0x725   : > { %v2665_v0 = vmax.f32 %v2640_v60, 0.0  ;;  %v2697_v60 = vld [vmem:[%s7424_s6 + $0x140] sm:$0xff] }
 0x72a   : > { %v2642_v16 = vpop.f32.mrf.mxu2 }
 0x72b   : > { %v2643_v41 = vadd.f32 %v4837_v30, %v2642_v16 }
 0x72d   : > { %v2666_v48 = vmax.f32 %v2643_v41, 0.0  ;;  %v2696_v41 = vld [vmem:[%s7424_s6 + $0x138] sm:$0xff] }
 0x732   : > { %v2645_v31 = vpop.f32.mrf.mxu2 }
 0x733   : > { %v2646_v62 = vadd.f32 %v4837_v30, %v2645_v31  ;;  %v2692_v31 = vld [vmem:[%s7424_s6 + $0x118] sm:$0xff] }
 0x735   : > { %v2667_v4 = vmax.f32 %v2646_v62, 0.0  ;;  %v2695_v62 = vld [vmem:[%s7424_s6 + $0x130] sm:$0xff] }
 0x73a   : > { %v2648_v55 = vpop.f32.mrf.mxu2 }
 0x73b   : > { %v2649_v38 = vadd.f32 %v4837_v30, %v2648_v55 }
 0x73d   : > { %v2668_v32 = vmax.f32 %v2649_v38, 0.0  ;;  %v2694_v38 = vld [vmem:[%s7424_s6 + $0x128] sm:$0xff] }
 0x742   : > { %v2651_v9 = vpop.f32.mrf.mxu2 }
 0x743   : > { %v2652_v50 = vadd.f32 %v4837_v30, %v2651_v9  ;;  %v2693_v30 = vld [vmem:[%s7424_s6 + $0x120] sm:$0xff] }
 0x745   : > { %v2669_v35 = vmax.f32 %v2652_v50, 0.0 }
 0x747   : > { %2702 = vmatpush.msrb.mxu3 %v2669_v35 }
 0x749   : > { %2703 = vmatpush.msrb.mxu3 %v2668_v32 }
 0x74b   : > { %2704 = vmatpush.msrb.mxu3 %v2667_v4 }
 0x74d   : > { %2705 = vmatpush.msrb.mxu3 %v2666_v48 }
 0x74f   : > { %2706 = vmatpush.msrb.mxu3 %v2665_v0 }
 0x751   : > { %2707 = vmatpush.msrb.mxu3 %v2664_v14 }
 0x753   : > { %2708 = vmatpush.msrb.mxu3 %v2663_v57 }
 0x755   : > { %2709 = vmatpush.msrb.mxu3 %v2662_v52 }
 0x757   : > { %2710 = vmatpush.msrb.mxu3 %v2661_v22 }
 0x759   : > { %2711 = vmatpush.msrb.mxu3 %v2660_v19 }
 0x75b   : > { %2712 = vmatpush.msrb.mxu3 %v2659_v27 }
 0x75d   : > { %2713 = vmatpush.msrb.mxu3 %v2658_v17 }
 0x75f   : > { %2714 = vmatpush.msrb.mxu3 %v2657_v43 }
 0x761   : > { %2715 = vmatpush.msrb.mxu3 %v2656_v49 }
 0x763   : > { %2716 = vmatpush.msrb.mxu3 %v2655_v63 }
 0x765   : > { %2717 = vmatpush.msrb.mxu3 %v2654_v12 }
 0x766   : > { %2718 = vmatmul.f32.vlgmr.msrb.gmra.mxu3 %v2670_v20 }
 0x76e   : > { %2721 = vmatmul.f32.gmra.mxu3 %v2671_v61 }
 0x776   : > { %2724 = vmatmul.f32.gmra.mxu3 %v2672_v24 }
 0x77e   : > { %2727 = vmatmul.f32.gmra.mxu3 %v2673_v1 }
 0x786   : > { %2730 = vmatmul.f32.gmra.mxu3 %v2674_v3 }
 0x78e   : > { %2733 = vmatmul.f32.gmra.mxu3 %v2675_v42 }
 0x796   : > { %2736 = vmatmul.f32.gmra.mxu3 %v2676_v28 }
 0x79e   : > { %2739 = vmatmul.f32.gmra.mxu3 %v2677_v6 }
 0x7a6   : > { %2742 = vmatmul.f32.gmra.mxu3 %v2678_v8 }
 0x7ae   : > { %2745 = vmatmul.f32.gmra.mxu3 %v2679_v53 }
 0x7b6   : > { %2748 = vmatmul.f32.gmra.mxu3 %v2680_v58 }
 0x7be   : > { %2751 = vmatmul.f32.gmra.mxu3 %v2681_v45 }
 0x7c6   : > { %2754 = vmatmul.f32.gmra.mxu3 %v2682_v54 }
 0x7ce   : > { %2757 = vmatmul.f32.gmra.mxu3 %v2683_v5 }
 0x7d6   : > { %2760 = vmatmul.f32.gmra.mxu3 %v2684_v21 }
 0x7de   : > { %2763 = vmatmul.f32.gmra.mxu3 %v2685_v15 }
 0x7e6   : > { %2766 = vmatmul.f32.gmra.mxu3 %v2686_v37 }
 0x7e9   : > { %v2719_v13 = vpop.f32.mrf.mxu3 }
 0x7ea   : > { %v2817_v52 = vmul.f32 %v6498_v2, %v2719_v13 }
 0x7ec   : > { %v2851_v34 = vadd.f32 %v6504_v44, %v2817_v52 }
 0x7ee   : > { %2769 = vmatmul.f32.gmra.mxu3 %v2687_v59  ;;  %v2883_v27 = vmax.f32 %v2851_v34, 0.0 }
 0x7f1   : > { %v2722_v47 = vpop.f32.mrf.mxu3 }
 0x7f2   : > { %v2818_v36 = vmul.f32 %v6498_v2, %v2722_v47 }
 0x7f4   : > { %v2852_v26 = vadd.f32 %v6504_v44, %v2818_v36 }
 0x7f6   : > { %2772 = vmatmul.f32.gmra.mxu3 %v2688_v40  ;;  %v2884_v12 = vmax.f32 %v2852_v26, 0.0 }
 0x7f9   : > { %v2725_v10 = vpop.f32.mrf.mxu3 }
 0x7fa   : > { %v2819_v20 = vmul.f32 %v6498_v2, %v2725_v10 }
 0x7fc   : > { %v2853_v3 = vadd.f32 %v6504_v44, %v2819_v20 }
 0x7fe   : > { %2775 = vmatmul.f32.gmra.mxu3 %v2689_v18  ;;  %v2885_v6 = vmax.f32 %v2853_v3, 0.0 }
 0x801   : > { %v2728_v56 = vpop.f32.mrf.mxu3 }
 0x802   : > { %v2820_v8 = vmul.f32 %v6498_v2, %v2728_v56 }
 0x804   : > { %v2854_v54 = vadd.f32 %v6504_v44, %v2820_v8 }
 0x806   : > { %2778 = vmatmul.f32.gmra.mxu3 %v2690_v25  ;;  %v2886_v15 = vmax.f32 %v2854_v54, 0.0 }
 0x809   : > { %v6438_v7 = vpop.f32.mrf.mxu3 }
 0x80a   : > { %v2821_v37 = vmul.f32 %v6498_v2, %v6438_v7 }
 0x80c   : > { %v2855_v40 = vadd.f32 %v6504_v44, %v2821_v37 }
 0x80e   : > { %2781 = vmatmul.f32.gmra.mxu3 %v2691_v23  ;;  %v2887_v56 = vmax.f32 %v2855_v40, 0.0 }
 0x811   : > { %v6443_v16 = vpop.f32.mrf.mxu3 }
 0x812   : > { %v2822_v25 = vmul.f32 %v6498_v2, %v6443_v16 }
 0x814   : > { %v2856_v7 = vadd.f32 %v6504_v44, %v2822_v25 }
 0x816   : > { %2784 = vmatmul.f32.gmra.mxu3 %v2692_v31 }
 0x819   : > { %v6448_v55 = vpop.f32.mrf.mxu3 }
 0x81e   : > { %2787 = vmatmul.f32.gmra.mxu3 %v2693_v30 }
 0x821   : > { %v6453_v9 = vpop.f32.mrf.mxu3 }
 0x822   : > { %v2824_v34 = vmul.f32 %v6498_v2, %v6453_v9 }
 0x826   : > { %2790 = vmatmul.f32.gmra.mxu3 %v2694_v38 }
 0x829   : > { %v6458_v50 = vpop.f32.mrf.mxu3 }
 0x82e   : > { %2793 = vmatmul.f32.gmra.mxu3 %v2695_v62 }
 0x831   : > { %v6463_v35 = vpop.f32.mrf.mxu3 }
 0x836   : > { %2796 = vmatmul.f32.gmra.mxu3 %v2696_v41  ;;  %v2888_v41 = vmax.f32 %v2856_v7, 0.0 }
 0x839   : > { %v6468_v32 = vpop.f32.mrf.mxu3 }
 0x83e   : > { %2799 = vmatmul.f32.gmra.mxu3 %v2697_v60  ;;  %v2823_v60 = vmul.f32 %v6498_v2, %v6448_v55  ;;  %v2858_v55 = vadd.f32 %v6504_v44, %v2824_v34 }
 0x840   : > { %v2857_v16 = vadd.f32 %v6504_v44, %v2823_v60 }
 0x841   : > { %v6473_v4 = vpop.f32.mrf.mxu3 }
 0x846   : > { %2802 = vmatmul.f32.gmra.mxu3 %v2698_v33 }
 0x849   : > { %v6478_v48 = vpop.f32.mrf.mxu3 }
 0x84e   : > { %2805 = vmatmul.f32.gmra.mxu3 %v2699_v46 }
 0x851   : > { %v6483_v0 = vpop.f32.mrf.mxu3 }
 0x856   : > { %2808 = vmatmul.f32.gmra.mxu3 %v2700_v29 }
 0x859   : > { %v6488_v14 = vpop.f32.mrf.mxu3 }
 0x85e   : > { %2811 = vmatmul.f32.gmra.mxu3 %v2701_v39 }
 0x861   : > { %v6493_v57 = vpop.f32.mrf.mxu3 }
 0x869   : > { %v2767_v22 = vpop.f32.mrf.mxu3 }
 0x86a   : > { %v2833_v19 = vmul.f32 %v6498_v2, %v2767_v22  ;;  %v2889_v22 = vmax.f32 %v2857_v16, 0.0 }
 0x86c   : > { %v2867_v11 = vadd.f32 %v6504_v44, %v2833_v19 }
 0x86e   : > { %v2899_v17 = vmax.f32 %v2867_v11, 0.0 }
 0x870   : > { %v6510_v51 = vsub.f32 %v2883_v27, %v2899_v17 }
 0x871   : > { %v2770_v43 = vpop.f32.mrf.mxu3 }
 0x872   : > { %v2834_v49 = vmul.f32 %v6498_v2, %v2770_v43  ;;  %v2890_v43 = vmax.f32 %v2858_v55, 0.0 }
 0x874   : > { %v2868_v63 = vadd.f32 %v6504_v44, %v2834_v49 }
 0x876   : > { %v2900_v61 = vmax.f32 %v2868_v63, 0.0 }
 0x878   : > { %v6516_v24 = vsub.f32 %v2884_v12, %v2900_v61 }
 0x879   : > { %v2773_v1 = vpop.f32.mrf.mxu3 }
 0x87a   : > { %v2835_v42 = vmul.f32 %v6498_v2, %v2773_v1 }
 0x87c   : > { %v2869_v28 = vadd.f32 %v6504_v44, %v2835_v42 }
 0x87e   : > { %v2901_v53 = vmax.f32 %v2869_v28, 0.0  ;;  %v2831_v28 = vmul.f32 %v6498_v2, %v6488_v14 }
 0x880   : > { %v6522_v58 = vsub.f32 %v2885_v6, %v2901_v53  ;;  %v2832_v6 = vmul.f32 %v6498_v2, %v6493_v57  ;;  %v2830_v53 = vmul.f32 %v6498_v2, %v6483_v0  ;;  %v2828_v0 = vmul.f32 %v6498_v2, %v6473_v4 }
 0x881   : > { %v2776_v45 = vpop.f32.mrf.mxu3 }
 0x882   : > { %v2836_v5 = vmul.f32 %v6498_v2, %v2776_v45  ;;  %v2862_v60 = vadd.f32 %v6504_v44, %v2828_v0  ;;  %v2933_v0 = vand.u32 2147483647, %v6522_v58  ;;  %v2949_v58 = vld [vmem:[%s7424_s6 + $0x178] sm:$0xff] }
 0x884   : > { %v2870_v21 = vadd.f32 %v6504_v44, %v2836_v5  ;;  %v2829_v5 = vmul.f32 %v6498_v2, %v6478_v48 }
 0x886   : > { %v2902_v13 = vmax.f32 %v2870_v21, 0.0  ;;  %v2865_v21 = vadd.f32 %v6504_v44, %v2831_v28  ;;  %v2863_v25 = vadd.f32 %v6504_v44, %v2829_v5 }
 0x888   : > { %v6529_v59 = vsub.f32 %v2886_v15, %v2902_v13  ;;  %v2866_v15 = vadd.f32 %v6504_v44, %v2832_v6 }
 0x889   : > { %v2779_v47 = vpop.f32.mrf.mxu3 }
 0x88a   : > { %v2837_v10 = vmul.f32 %v6498_v2, %v2779_v47  ;;  %v2864_v47 = vadd.f32 %v6504_v44, %v2830_v53 }
 0x88c   : > { %v2871_v18 = vadd.f32 %v6504_v44, %v2837_v10 }
 0x88e   : > { %v2903_v23 = vmax.f32 %v2871_v18, 0.0 }
 0x890   : > { %v6536_v31 = vsub.f32 %v2887_v56, %v2903_v23  ;;  %v2827_v56 = vmul.f32 %v6498_v2, %v6468_v32  ;;  %v2897_v23 = vmax.f32 %v2865_v21, 0.0 }
 0x891   : > { %v2782_v30 = vpop.f32.mrf.mxu3 }
 0x892   : > { %v2838_v38 = vmul.f32 %v6498_v2, %v2782_v30  ;;  %v2898_v30 = vmax.f32 %v2866_v15, 0.0  ;;  %v2861_v34 = vadd.f32 %v6504_v44, %v2827_v56  ;;  %v2958_v56 = vld [vmem:[%s7424_s6 + $0x1c0] sm:$0xff] }
 0x894   : > { %v2872_v62 = vadd.f32 %v6504_v44, %v2838_v38 }
 0x896   : > { %v2904_v33 = vmax.f32 %v2872_v62, 0.0 }
 0x898   : > { %v6543_v46 = vsub.f32 %v2888_v41, %v2904_v33  ;;  %v2826_v41 = vmul.f32 %v6498_v2, %v6463_v35  ;;  %v2896_v33 = vmax.f32 %v2864_v47, 0.0  ;;  %v2932_v47 = vand.u32 2147483647, %v6516_v24  ;;  %v2951_v24 = vld [vmem:[%s7424_s6 + $0x188] sm:$0xff] }
 0x899   : > { %v2785_v29 = vpop.f32.mrf.mxu3 }
 0x89a   : > { %v2839_v39 = vmul.f32 %v6498_v2, %v2785_v29 }
 0x89c   : > { %v2873_v52 = vadd.f32 %v6504_v44, %v2839_v39 }
 0x89e   : > { %v2905_v19 = vmax.f32 %v2873_v52, 0.0 }
 0x8a0   : > { %v6550_v11 = vsub.f32 %v2889_v22, %v2905_v19  ;;  %v2825_v22 = vmul.f32 %v6498_v2, %v6458_v50  ;;  %v2895_v19 = vmax.f32 %v2863_v25, 0.0  ;;  %v2893_v50 = vmax.f32 %v2861_v34, 0.0  ;;  %v2959_v25 = vld [vmem:[%s7424_s6 + $0x1c8] sm:$0xff] }
 0x8a1   : > { %v2788_v27 = vpop.f32.mrf.mxu3 }
 0x8a2   : > { %v2840_v36 = vmul.f32 %v6498_v2, %v2788_v27 }
 0x8a4   : > { %v2874_v17 = vadd.f32 %v6504_v44, %v2840_v36 }
 0x8a6   : > { %v2906_v26 = vmax.f32 %v2874_v17, 0.0  ;;  %v2860_v17 = vadd.f32 %v6504_v44, %v2826_v41 }
 0x8a8   : > { %v6555_v49 = vsub.f32 %v2890_v43, %v2906_v26  ;;  %v2894_v43 = vmax.f32 %v2862_v60, 0.0 }
 0x8a9   : > { %v2791_v63 = vpop.f32.mrf.mxu3 }
 0x8aa   : > { %v2841_v29 = vmul.f32 %v6498_v2, %v2791_v63  ;;  %v2938_v15 = vand.u32 2147483647, %v6555_v49  ;;  %v2931_v49 = vand.u32 2147483647, %v6510_v51  ;;  %v2950_v51 = vld [vmem:[%s7424_s6 + $0x180] sm:$0xff] }
 0x8ac   : > { %v2875_v26 = vadd.f32 %v6504_v44, %v2841_v29 }
 0x8b1   : > { %v2794_v12 = vpop.f32.mrf.mxu3 }
 0x8b2   : > { %v2842_v7 = vmul.f32 %v6498_v2, %v2794_v12 }
 0x8b4   : > { %v2876_v27 = vadd.f32 %v6504_v44, %v2842_v7  ;;  %v2962_v7 = vld [vmem:[%s7424_s6 + $0x1e0] sm:$0xff] }
 0x8b9   : > { %v2797_v20 = vpop.f32.mrf.mxu3 }
 0x8ba   : > { %v2843_v40 = vmul.f32 %v6498_v2, %v2797_v20 }
 0x8bc   : > { %v2877_v32 = vadd.f32 %v6504_v44, %v2843_v40  ;;  %v2954_v40 = vld [vmem:[%s7424_s6 + $0x1a0] sm:$0xff] }
 0x8be   : > { %v2909_v63 = vmax.f32 %v2877_v32, 0.0 }
 0x8c0   : > { %v2925_v6 = vsub.f32 %v2893_v50, %v2909_v63 }
 0x8c1   : > { %v2800_v61 = vpop.f32.mrf.mxu3 }
 0x8c2   : > { %v2844_v37 = vmul.f32 %v6498_v2, %v2800_v61  ;;  %v2859_v61 = vadd.f32 %v6504_v44, %v2825_v22 }
 0x8c4   : > { %v2878_v4 = vadd.f32 %v6504_v44, %v2844_v37  ;;  %v2936_v37 = vand.u32 2147483647, %v6543_v46  ;;  %v2953_v46 = vld [vmem:[%s7424_s6 + $0x198] sm:$0xff] }
 0x8c6   : > { %v2910_v55 = vmax.f32 %v2878_v4, 0.0 }
 0x8c9   : > { %v2803_v1 = vpop.f32.mrf.mxu3 }
 0x8ca   : > { %v2845_v45 = vmul.f32 %v6498_v2, %v2803_v1 }
 0x8cc   : > { %v2879_v48 = vadd.f32 %v6504_v44, %v2845_v45 }
 0x8ce   : > { %v2911_v16 = vmax.f32 %v2879_v48, 0.0  ;;  %v2955_v48 = vld [vmem:[%s7424_s6 + $0x1a8] sm:$0xff] }
 0x8d0   : > { %v2927_v20 = vsub.f32 %v2895_v19, %v2911_v16 }
 0x8d1   : > { %v2806_v9 = vpop.f32.mrf.mxu3 }
 0x8d2   : > { %v2846_v8 = vmul.f32 %v6498_v2, %v2806_v9  ;;  %v2926_v9 = vsub.f32 %v2894_v43, %v2910_v55  ;;  %v2943_v28 = vand.u32 2147483647, %v2927_v20  ;;  %v4840_v55 = vld [vmem:[%s7424_s6 + $0x2e0] ss:$0 sm:$0xff] }
 0x8d4   : > { %v2880_v57 = vadd.f32 %v6504_v44, %v2846_v8  ;;  %v2891_v8 = vmax.f32 %v2859_v61, 0.0  ;;  %v2942_v53 = vand.u32 2147483647, %v2926_v9 }
 0x8d6   : > { %v2912_v38 = vmax.f32 %v2880_v57, 0.0  ;;  %v2935_v57 = vand.u32 2147483647, %v6536_v31  ;;  %v2948_v31 = vld [vmem:[%s7424_s6 + $0x170] sm:$0xff] }
 0x8d8   : > { %v2928_v36 = vsub.f32 %v2896_v33, %v2912_v38 }
 0x8d9   : > { %v2809_v3 = vpop.f32.mrf.mxu3 }
 0x8da   : > { %v2847_v42 = vmul.f32 %v6498_v2, %v2809_v3  ;;  %v2944_v1 = vand.u32 2147483647, %v2928_v36  ;;  %v2892_v3 = vmax.f32 %v2860_v17, 0.0  ;;  %v4841_v17 = vld [vmem:[%s7424_s6 + $0x2e1] ss:$0 sm:$0xff] }
 0x8dc   : > { %v2881_v54 = vadd.f32 %v6504_v44, %v2847_v42  ;;  %v2907_v42 = vmax.f32 %v2875_v26, 0.0 }
 0x8de   : > { %v2913_v10 = vmax.f32 %v2881_v54, 0.0  ;;  %v2941_v54 = vand.u32 2147483647, %v2925_v6  ;;  %v2923_v5 = vsub.f32 %v2891_v8, %v2907_v42 }
 0x8e0   : > { %v2929_v52 = vsub.f32 %v2897_v23, %v2913_v10  ;;  %v2956_v10 = vld [vmem:[%s7424_s6 + $0x1b0] sm:$0xff] }
 0x8e1   : > { %v2812_v14 = vpop.f32.mrf.mxu3  ;;  %v2960_v23 = vld [vmem:[%s7424_s6 + $0x1d0] sm:$0xff] }
 0x8e2   : > { %v2848_v13 = vmul.f32 %v6498_v2, %v2812_v14  ;;  %v2945_v12 = vand.u32 2147483647, %v2929_v52  ;;  %v2908_v2 = vmax.f32 %v2876_v27, 0.0  ;;  %v2937_v14 = vand.u32 2147483647, %v6550_v11  ;;  %v2947_v11 = vld [vmem:[%s7424_s6 + $0x168] sm:$0xff] }
 0x8e4   : > { %v2882_v18 = vadd.f32 %v6504_v44, %v2848_v13  ;;  %v2924_v45 = vsub.f32 %v2892_v3, %v2908_v2  ;;  %v2939_v44 = vand.u32 2147483647, %v2923_v5  ;;  %v2934_v13 = vand.u32 2147483647, %v6529_v59  ;;  %v2952_v59 = vld [vmem:[%s7424_s6 + $0x190] sm:$0xff] }
 0x8e6   : > { %v2914_v62 = vmax.f32 %v2882_v18, 0.0  ;;  %v2940_v21 = vand.u32 2147483647, %v2924_v45  ;;  %v2957_v18 = vld [vmem:[%s7424_s6 + $0x1b8] sm:$0xff] }
 0x8e8   : > { %v2930_v39 = vsub.f32 %v2898_v30, %v2914_v62  ;;  %v2961_v30 = vld [vmem:[%s7424_s6 + $0x1d8] sm:$0xff] }
 0x8ea   : > { %v2946_v35 = vand.u32 2147483647, %v2930_v39 }
 0x8ec   : > { %2963 = vmatpush.msrb.mxu0 %v2946_v35 }
 0x8ee   : > { %2964 = vmatpush.msrb.mxu0 %v2945_v12 }
 0x8f0   : > { %2965 = vmatpush.msrb.mxu0 %v2944_v1 }
 0x8f2   : > { %2966 = vmatpush.msrb.mxu0 %v2943_v28 }
 0x8f4   : > { %2967 = vmatpush.msrb.mxu0 %v2942_v53 }
 0x8f6   : > { %2968 = vmatpush.msrb.mxu0 %v2941_v54 }
 0x8f8   : > { %2969 = vmatpush.msrb.mxu0 %v2940_v21 }
 0x8fa   : > { %2970 = vmatpush.msrb.mxu0 %v2939_v44 }
 0x8fc   : > { %2971 = vmatpush.msrb.mxu0 %v2938_v15 }
 0x8fe   : > { %2972 = vmatpush.msrb.mxu0 %v2937_v14 }
 0x900   : > { %2973 = vmatpush.msrb.mxu0 %v2936_v37 }
 0x902   : > { %2974 = vmatpush.msrb.mxu0 %v2935_v57 }
 0x904   : > { %2975 = vmatpush.msrb.mxu0 %v2934_v13 }
 0x906   : > { %2976 = vmatpush.msrb.mxu0 %v2933_v0 }
 0x908   : > { %2977 = vmatpush.msrb.mxu0 %v2932_v47 }
 0x90a   : > { %2978 = vmatpush.msrb.mxu0 %v2931_v49 }
 0x90b   : > { %2979 = vmatmul.f32.vlgmr.msrb.gmra.mxu0 %v2947_v11 }
 0x913   : > { %2982 = vmatmul.f32.gmra.mxu0 %v2948_v31 }
 0x91b   : > { %2985 = vmatmul.f32.gmra.mxu0 %v2949_v58 }
 0x923   : > { %2988 = vmatmul.f32.gmra.mxu0 %v2950_v51 }
 0x92b   : > { %2991 = vmatmul.f32.gmra.mxu0 %v2951_v24 }
 0x933   : > { %2994 = vmatmul.f32.gmra.mxu0 %v2952_v59 }
 0x93b   : > { %2997 = vmatmul.f32.gmra.mxu0 %v2953_v46 }
 0x943   : > { %3000 = vmatmul.f32.gmra.mxu0 %v2954_v40 }
 0x94b   : > { %3003 = vmatmul.f32.gmra.mxu0 %v2955_v48 }
 0x953   : > { %3006 = vmatmul.f32.gmra.mxu0 %v2956_v10 }
 0x95b   : > { %3009 = vmatmul.f32.gmra.mxu0 %v2957_v18 }
 0x963   : > { %3012 = vmatmul.f32.gmra.mxu0 %v2958_v56 }
 0x96b   : > { %3015 = vmatmul.f32.gmra.mxu0 %v2959_v25 }
 0x973   : > { %3018 = vmatmul.f32.gmra.mxu0 %v2960_v23 }
 0x97b   : > { %3021 = vmatmul.f32.gmra.mxu0 %v2961_v30 }
 0x983   : > { %3024 = vmatmul.f32.gmra.mxu0 %v2962_v7 }
 0x988   : > { %v6653_v4 = vpop.f32.mrf.mxu0 }
 0x989   : > { %v3030_v10 = vmul.f32 %v4840_v55, %v6653_v4  ;;  %v3081_v4 = vld [vmem:[%s7424_s6 + $0x1f0] sm:$0xff] }
 0x98b   : > { %v3048_v30 = vadd.f32 %v4841_v17, %v3030_v10 }
 0x990   : > { %v2983_v38 = vpop.f32.mrf.mxu0 }
 0x991   : > { %v3031_v46 = vmul.f32 %v4840_v55, %v2983_v38  ;;  %v3080_v38 = vld [vmem:[%s7424_s6 + $0x1e8] sm:$0xff] }
 0x993   : > { %v3049_v25 = vadd.f32 %v4841_v17, %v3031_v46 }
 0x998   : > { %v2986_v62 = vpop.f32.mrf.mxu0 }
 0x999   : > { %v3032_v51 = vmul.f32 %v4840_v55, %v2986_v62  ;;  %v3065_v62 = vmax.f32 %v3049_v25, 0.0 }
 0x99b   : > { %v3050_v18 = vadd.f32 %v4841_v17, %v3032_v51 }
 0x99d   : > { %v3066_v7 = vmax.f32 %v3050_v18, 0.0 }
 0x9a0   : > { %v2989_v41 = vpop.f32.mrf.mxu0 }
 0x9a1   : > { %v3033_v11 = vmul.f32 %v4840_v55, %v2989_v41  ;;  %v3064_v41 = vmax.f32 %v3048_v30, 0.0 }
 0x9a3   : > { %v3051_v40 = vadd.f32 %v4841_v17, %v3033_v11 }
 0x9a5   : > { %v3067_v23 = vmax.f32 %v3051_v40, 0.0 }
 0x9a8   : > { %v2992_v60 = vpop.f32.mrf.mxu0 }
 0x9a9   : > { %v3034_v0 = vmul.f32 %v4840_v55, %v2992_v60  ;;  %v3082_v60 = vld [vmem:[%s7424_s6 + $0x1f8] sm:$0xff] }
 0x9ab   : > { %v3052_v24 = vadd.f32 %v4841_v17, %v3034_v0 }
 0x9ad   : > { %v3068_v56 = vmax.f32 %v3052_v24, 0.0 }
 0x9b0   : > { %v2995_v33 = vpop.f32.mrf.mxu0 }
 0x9b1   : > { %v3035_v37 = vmul.f32 %v4840_v55, %v2995_v33  ;;  %v3083_v33 = vld [vmem:[%s7424_s6 + $0x200] sm:$0xff] }
 0x9b3   : > { %v3053_v31 = vadd.f32 %v4841_v17, %v3035_v37 }
 0x9b5   : > { %v3069_v48 = vmax.f32 %v3053_v31, 0.0 }
 0x9b8   : > { %v2998_v29 = vpop.f32.mrf.mxu0 }
 0x9b9   : > { %v3036_v44 = vmul.f32 %v4840_v55, %v2998_v29  ;;  %v3084_v29 = vld [vmem:[%s7424_s6 + $0x208] sm:$0xff] }
 0x9bb   : > { %v3054_v47 = vadd.f32 %v4841_v17, %v3036_v44 }
 0x9bd   : > { %v3070_v59 = vmax.f32 %v3054_v47, 0.0 }
 0x9c0   : > { %v3001_v32 = vpop.f32.mrf.mxu0 }
 0x9c1   : > { %v3037_v54 = vmul.f32 %v4840_v55, %v3001_v32  ;;  %v3085_v32 = vld [vmem:[%s7424_s6 + $0x210] sm:$0xff] }
 0x9c3   : > { %v3055_v57 = vadd.f32 %v4841_v17, %v3037_v54 }
 0x9c5   : > { %v3071_v58 = vmax.f32 %v3055_v57, 0.0 }
 0x9c8   : > { %v3004_v16 = vpop.f32.mrf.mxu0 }
 0x9c9   : > { %v3038_v8 = vmul.f32 %v4840_v55, %v3004_v16  ;;  %v3086_v16 = vld [vmem:[%s7424_s6 + $0x218] sm:$0xff] }
 0x9cb   : > { %v3056_v15 = vadd.f32 %v4841_v17, %v3038_v8  ;;  %v3223_v8 = vld [vmem:[%s7425_s7 + $0x10] sm:$0xff] }
 0x9cd   : > { %v3072_v49 = vmax.f32 %v3056_v15, 0.0  ;;  %v6763_v15 = vld [vmem:[%s7424_s6 + $0x2e3] ss:$0 sm:$0xff] }
 0x9d0   : > { %v3007_v39 = vpop.f32.mrf.mxu0 }
 0x9d1   : > { %v3039_v42 = vmul.f32 %v4840_v55, %v3007_v39  ;;  %v3087_v39 = vld [vmem:[%s7424_s6 + $0x220] sm:$0xff] }
 0x9d3   : > { %v3057_v5 = vadd.f32 %v4841_v17, %v3039_v42  ;;  %v3227_v42 = vld [vmem:[%s7425_s7 + $0x30] sm:$0xff] }
 0x9d5   : > { %v3073_v13 = vmax.f32 %v3057_v5, 0.0 }
 0x9d8   : > { %v3010_v52 = vpop.f32.mrf.mxu0 }
 0x9d9   : > { %v3040_v1 = vmul.f32 %v4840_v55, %v3010_v52  ;;  %v3088_v52 = vld [vmem:[%s7424_s6 + $0x228] sm:$0xff] }
 0x9db   : > { %v3058_v53 = vadd.f32 %v4841_v17, %v3040_v1  ;;  %v3231_v1 = vld [vmem:[%s7425_s7 + $0x50] sm:$0xff] }
 0x9dd   : > { %v3074_v14 = vmax.f32 %v3058_v53, 0.0  ;;  %v3222_v53 = vld [vmem:[%s7425_s7 + $0x8] sm:$0xff] }
 0x9e0   : > { %v3013_v22 = vpop.f32.mrf.mxu0 }
 0x9e1   : > { %v3041_v61 = vmul.f32 %v4840_v55, %v3013_v22  ;;  %v3089_v22 = vld [vmem:[%s7424_s6 + $0x230] sm:$0xff] }
 0x9e3   : > { %v3059_v28 = vadd.f32 %v4841_v17, %v3041_v61  ;;  %v3235_v61 = vld [vmem:[%s7425_s7 + $0x70] sm:$0xff] }
 0x9e5   : > { %v3075_v21 = vmax.f32 %v3059_v28, 0.0  ;;  %v3226_v28 = vld [vmem:[%s7425_s7 + $0x28] sm:$0xff] }
 0x9e8   : > { %v3016_v34 = vpop.f32.mrf.mxu0 }
 0x9e9   : > { %v3042_v63 = vmul.f32 %v4840_v55, %v3016_v34  ;;  %v3090_v34 = vld [vmem:[%s7424_s6 + $0x238] sm:$0xff] }
 0x9eb   : > { %v3060_v9 = vadd.f32 %v4841_v17, %v3042_v63 }
 0x9ed   : > { %v3076_v45 = vmax.f32 %v3060_v9, 0.0  ;;  %v3230_v9 = vld [vmem:[%s7425_s7 + $0x48] sm:$0xff] }
 0x9f0   : > { %v3019_v19 = vpop.f32.mrf.mxu0 }
 0x9f1   : > { %v3043_v43 = vmul.f32 %v4840_v55, %v3019_v19  ;;  %v3091_v19 = vld [vmem:[%s7424_s6 + $0x240] sm:$0xff] }
 0x9f3   : > { %v3061_v50 = vadd.f32 %v4841_v17, %v3043_v43 }
 0x9f5   : > { %v3077_v6 = vmax.f32 %v3061_v50, 0.0  ;;  %v3234_v50 = vld [vmem:[%s7425_s7 + $0x68] sm:$0xff] }
 0x9f6   : > { %3314 = vmatpush.msra.mxu0 %v3234_v50 }
 0x9f8   : > { %v3022_v27 = vpop.f32.mrf.mxu0  ;;  %3315 = vmatpush.msra.mxu0 %v3230_v9 }
 0x9f9   : > { %v3044_v35 = vmul.f32 %v4840_v55, %v3022_v27  ;;  %v3092_v27 = vld [vmem:[%s7424_s6 + $0x248] sm:$0xff] }
 0x9fa   : > { %3316 = vmatpush.msra.mxu0 %v3226_v28 }
 0x9fb   : > { %v3062_v12 = vadd.f32 %v4841_v17, %v3044_v35  ;;  %v3094_v35 = vld [vmem:[%s7424_s6 + $0x258] sm:$0xff] }
 0x9fc   : > { %3317 = vmatpush.msra.mxu0 %v3222_v53 }
 0x9fd   : > { %v3078_v3 = vmax.f32 %v3062_v12, 0.0 }
 0xa00   : > { %v3025_v36 = vpop.f32.mrf.mxu0 }
 0xa01   : > { %v3045_v26 = vmul.f32 %v4840_v55, %v3025_v36  ;;  %v3093_v55 = vld [vmem:[%s7424_s6 + $0x250] sm:$0xff]  ;;  %v3095_v36 = vld [vmem:[%s7424_s6 + $0x260] sm:$0xff] }
 0xa03   : > { %v3063_v20 = vadd.f32 %v4841_v17, %v3045_v26  ;;  %v3233_v26 = vld [vmem:[%s7425_s7 + $0x60] sm:$0xff] }
 0xa04   : > { %3273 = vmatpush.msra.mxu2 %v3233_v26 }
 0xa05   : > { %v3079_v2 = vmax.f32 %v3063_v20, 0.0 }
 0xa07   : > { %3096 = vmatpush.msrb.mxu1 %v3079_v2  ;;  %v3229_v2 = vld [vmem:[%s7425_s7 + $0x40] sm:$0xff] }
 0xa08   : > { %3274 = vmatpush.msra.mxu2 %v3229_v2 }
 0xa09   : > { %3097 = vmatpush.msrb.mxu1 %v3078_v3  ;;  %v3225_v3 = vld [vmem:[%s7425_s7 + $0x20] sm:$0xff] }
 0xa0a   : > { %3275 = vmatpush.msra.mxu2 %v3225_v3 }
 0xa0b   : > { %3098 = vmatpush.msrb.mxu1 %v3077_v6  ;;  %v3221_v6 = vld [vmem:[%s7425_s7] sm:$0xff] }
 0xa0c   : > { %3276 = vmatpush.msra.mxu2 %v3221_v6 }
 0xa0d   : > { %3099 = vmatpush.msrb.mxu1 %v3076_v45 }
 0xa0f   : > { %3100 = vmatpush.msrb.mxu1 %v3075_v21  ;;  %v6757_v21 = vld [vmem:[%s7424_s6 + $0x2e2] ss:$0 sm:$0xff] }
 0xa11   : > { %3101 = vmatpush.msrb.mxu1 %v3074_v14 }
 0xa13   : > { %3102 = vmatpush.msrb.mxu1 %v3073_v13 }
 0xa15   : > { %3103 = vmatpush.msrb.mxu1 %v3072_v49 }
 0xa17   : > { %3104 = vmatpush.msrb.mxu1 %v3071_v58 }
 0xa19   : > { %3105 = vmatpush.msrb.mxu1 %v3070_v59 }
 0xa1b   : > { %3106 = vmatpush.msrb.mxu1 %v3069_v48 }
 0xa1d   : > { %3107 = vmatpush.msrb.mxu1 %v3068_v56 }
 0xa1f   : > { %3108 = vmatpush.msrb.mxu1 %v3067_v23 }
 0xa21   : > { %3109 = vmatpush.msrb.mxu1 %v3066_v7 }
 0xa23   : > { %3110 = vmatpush.msrb.mxu1 %v3065_v62 }
 0xa25   : > { %3111 = vmatpush.msrb.mxu1 %v3064_v41 }
 0xa26   : > { %3112 = vmatmul.f32.vlgmr.msrb.gmra.mxu1 %v3080_v38 }
 0xa27   : > { %3355 = vmatpush.msra.mxu1 %v3235_v61 }
 0xa29   : > { %3356 = vmatpush.msra.mxu1 %v3231_v1 }
 0xa2b   : > { %3357 = vmatpush.msra.mxu1 %v3227_v42 }
 0xa2d   : > { %3358 = vmatpush.msra.mxu1 %v3223_v8 }
 0xa2e   : > { %3115 = vmatmul.f32.gmra.mxu1 %v3081_v4 }
 0xa36   : > { %3118 = vmatmul.f32.gmra.mxu1 %v3082_v60 }
 0xa3e   : > { %3121 = vmatmul.f32.gmra.mxu1 %v3083_v33 }
 0xa46   : > { %3124 = vmatmul.f32.gmra.mxu1 %v3084_v29 }
 0xa4e   : > { %3127 = vmatmul.f32.gmra.mxu1 %v3085_v32 }
 0xa56   : > { %3130 = vmatmul.f32.gmra.mxu1 %v3086_v16 }
 0xa5e   : > { %3133 = vmatmul.f32.gmra.mxu1 %v3087_v39 }
 0xa66   : > { %3136 = vmatmul.f32.gmra.mxu1 %v3088_v52 }
 0xa6e   : > { %3139 = vmatmul.f32.gmra.mxu1 %v3089_v22 }
 0xa76   : > { %3142 = vmatmul.f32.gmra.mxu1 %v3090_v34  ;;  %v3236_v34 = vld [vmem:[%s7425_s7 + $0x78] sm:$0xff] }
 0xa77   : > { %3396 = vmatpush.msrb.mxu2 %v3236_v34 }
 0xa7e   : > { %3145 = vmatmul.f32.gmra.mxu1 %v3091_v19  ;;  %v3232_v19 = vld [vmem:[%s7425_s7 + $0x58] sm:$0xff] }
 0xa7f   : > { %3397 = vmatpush.msrb.mxu2 %v3232_v19 }
 0xa86   : > { %3148 = vmatmul.f32.gmra.mxu1 %v3092_v27 }
 0xa8e   : > { %3151 = vmatmul.f32.gmra.mxu1 %v3093_v55  ;;  %v3228_v55 = vld [vmem:[%s7425_s7 + $0x38] sm:$0xff] }
 0xa8f   : > { %3398 = vmatpush.msrb.mxu2 %v3228_v55 }
 0xa96   : > { %3154 = vmatmul.f32.gmra.mxu1 %v3094_v35 }
 0xa9e   : > { %3157 = vmatmul.f32.gmra.mxu1 %v3095_v36 }
 0xaa3   : > { %v3113_v17 = vpop.f32.mrf.mxu1 }
 0xaa4   : > { %v3163_v44 = vmul.f32 %v6757_v21, %v3113_v17 }
 0xaa6   : > { %v3181_v37 = vadd.f32 %v6763_v15, %v3163_v44 }
 0xaa8   : > { %v3197_v0 = vmax.f32 %v3181_v37, 0.0 }
 0xaab   : > { %v3116_v43 = vpop.f32.mrf.mxu1 }
 0xaac   : > { %v3164_v47 = vmul.f32 %v6757_v21, %v3116_v43  ;;  %v3224_v43 = vld [vmem:[%s7425_s7 + $0x18] sm:$0xff] }
 0xaad   : > { %3399 = vmatpush.msrb.mxu2 %v3224_v43 }
 0xaae   : > { %v3182_v58 = vadd.f32 %v6763_v15, %v3164_v47 }
 0xab0   : > { %v3198_v59 = vmax.f32 %v3182_v58, 0.0 }
 0xab3   : > { %v3119_v63 = vpop.f32.mrf.mxu1 }
 0xab4   : > { %v3165_v46 = vmul.f32 %v6757_v21, %v3119_v63 }
 0xab6   : > { %v3183_v18 = vadd.f32 %v6763_v15, %v3165_v46 }
 0xab8   : > { %v3199_v23 = vmax.f32 %v3183_v18, 0.0 }
 0xabb   : > { %v3122_v12 = vpop.f32.mrf.mxu1 }
 0xabc   : > { %v3166_v30 = vmul.f32 %v6757_v21, %v3122_v12 }
 0xabe   : > { %v3184_v38 = vadd.f32 %v6763_v15, %v3166_v30 }
 0xac0   : > { %v3200_v33 = vmax.f32 %v3184_v38, 0.0 }
 0xac3   : > { %v6713_v20 = vpop.f32.mrf.mxu1 }
 0xac4   : > { %v3167_v29 = vmul.f32 %v6757_v21, %v6713_v20 }
 0xac6   : > { %v3185_v52 = vadd.f32 %v6763_v15, %v3167_v29 }
 0xac8   : > { %v3201_v35 = vmax.f32 %v3185_v52, 0.0  ;;  %v7677_v52 = vmov 0.0  }
 0xacb   : > { %v6748_v45 = vpop.f32.mrf.mxu1 }
 0xacc   : > { %v3168_v36 = vmul.f32 %v6757_v21, %v6748_v45 }
 0xace   : > { %v3186_v12 = vadd.f32 %v6763_v15, %v3168_v36 }
 0xad0   : > { %v3202_v50 = vmax.f32 %v3186_v12, 0.0  ;;  %v7679_v12 = vld [vmem:[#allocation11_spill] sm:$0xff] }
 0xad3   : > { %v6750_v54 = vpop.f32.mrf.mxu1 }
 0xad4   : > { %v3169_v2 = vmul.f32 %v6757_v21, %v6750_v54 }
 0xad6   : > { %v3187_v42 = vadd.f32 %v6763_v15, %v3169_v2 }
 0xad8   : > { %v3203_v8 = vmax.f32 %v3187_v42, 0.0  ;;  %v7681_v42 = vld [vmem:[#allocation13_spill] sm:$0xff] }
 0xadb   : > { %v6752_v5 = vpop.f32.mrf.mxu1 }
 0xadc   : > { %v3170_v53 = vmul.f32 %v6757_v21, %v6752_v5 }
 0xae3   : > { %v3137_v14 = vpop.f32.mrf.mxu1 }
 0xae4   : > { %v3171_v57 = vmul.f32 %v6757_v21, %v3137_v14  ;;  %v3188_v14 = vadd.f32 %v6763_v15, %v3170_v53 }
 0xae6   : > { %v3189_v13 = vadd.f32 %v6763_v15, %v3171_v57 }
 0xae8   : > { %v3205_v49 = vmax.f32 %v3189_v13, 0.0  ;;  %v3204_v13 = vmax.f32 %v3188_v14, 0.0 }
 0xaea   : > { %v6769_v11 = vmax.f32 %v3197_v0, %v3205_v49 }
 0xaeb   : > { %v3140_v31 = vpop.f32.mrf.mxu1 }
 0xaec   : > { %v3172_v51 = vmul.f32 %v6757_v21, %v3140_v31  ;;  %4555 = vmatmul.msk.f32.vlgmr.msra.gmra.mxu2 %vm7642_vm9, %v6769_v11  ;;  %4571 = vmatmul.msk.f32.vlgmr.msra.gmra.mxu1 %vm7643_vm12, %v6769_v11  ;;  %vm7657_vm9 = vmmov %vm7616_vm0 }
 0xaed   : > { %4563 = vmatmul.msk.f32.vlgmr.msra.gmra.mxu0 %vm7644_vm1, %v6769_v11  ;;  %vm7658_vm12 = vmmov %vm7616_vm0 }
 0xaee   : > { %v3190_v24 = vadd.f32 %v6763_v15, %v3172_v51  ;;  %vm7659_vm1 = vmmov %vm7616_vm0 }
 0xaf0   : > { %v3206_v40 = vmax.f32 %v3190_v24, 0.0 }
 0xaf2   : > { %v6781_v48 = vmax.f32 %v3198_v59, %v3206_v40 }
 0xaf3   : > { %v3143_v10 = vpop.f32.mrf.mxu1 }
 0xaf4   : > { %v3173_v56 = vmul.f32 %v6757_v21, %v3143_v10  ;;  %4556 = vmatmul.msk.f32.gmra.mxu2 %vm7645_vm13, %v6781_v48  ;;  %4572 = vmatmul.msk.f32.gmra.mxu1 %vm7646_vm2, %v6781_v48  ;;  %vm7660_vm13 = vmmov %vm7616_vm0 }
 0xaf5   : > { %4564 = vmatmul.msk.f32.gmra.mxu0 %vm7647_vm15, %v6781_v48  ;;  %vm7661_vm2 = vmmov %vm7616_vm0 }
 0xaf6   : > { %v3191_v25 = vadd.f32 %v6763_v15, %v3173_v56  ;;  %vm7662_vm15 = vmmov %vm7616_vm0  ;;  %v7672_v56 = vld [vmem:[#allocation9_spill] sm:$0xff] }
 0xaf7   : > { %v6903_v34 = vshra.s32 %v7672_v56, 6 }
 0xaf8   : > { %v3207_v7 = vmax.f32 %v3191_v25, 0.0  ;;  %v3426_v25 = vadd.s32 256, %v7672_v56 }
 0xafa   : > { %v6793_v62 = vmax.f32 %v3199_v23, %v3207_v7  ;;  %v7673_v7 = vld [vmem:[#allocation8_spill] sm:$0xff]  ;;  %v3434_v38 = vshra.s32 %v3426_v25, 6 }
 0xafb   : > { %v3146_v41 = vpop.f32.mrf.mxu1 }
 0xafc   : > { %v3174_v4 = vmul.f32 %v6757_v21, %v3146_v41  ;;  %4557 = vmatmul.msk.f32.gmra.mxu2 %vm7616_vm0, %v6793_v62  ;;  %4573 = vmatmul.msk.f32.gmra.mxu1 %vm7648_vm14, %v6793_v62  ;;  %vm7663_vm14 = vmmov %vm7616_vm0 }
 0xafd   : > { %4565 = vmatmul.msk.f32.gmra.mxu0 %vm7649_vm7, %v6793_v62  ;;  %vm7664_vm7 = vmmov %vm7616_vm0 }
 0xafe   : > { %v3192_v60 = vadd.f32 %v6763_v15, %v3174_v4  ;;  %v7674_v4 = vld [vmem:[#allocation14_spill] sm:$0xff] }
 0xb00   : > { %v3208_v32 = vmax.f32 %v3192_v60, 0.0  ;;  %v6891_v60 = vand.u32 7, %v7674_v4 }
 0xb02   : > { %v3216_v16 = vmax.f32 %v3200_v33, %v3208_v32  ;;  %v7675_v33 = vld [vmem:[#allocation5_spill] sm:$0xff]  ;;  %v7676_v32 = vld [vmem:[#allocation3_spill] sm:$0xff] }
 0xb03   : > { %v3149_v39 = vpop.f32.mrf.mxu1  ;;  %v6894_v29 = vand.u32 7, %v7675_v33 }
 0xb04   : > { %v3175_v22 = vmul.f32 %v6757_v21, %v3149_v39  ;;  %4558 = vmatmul.msk.f32.gmra.mxu2 %vm7650_vm11, %v3216_v16  ;;  %4574 = vmatmul.msk.f32.gmra.mxu1 %vm7651_vm4, %v3216_v16  ;;  %vm7665_vm11 = vmmov %vm7616_vm0 }
 0xb05   : > { %4566 = vmatmul.msk.f32.gmra.mxu0 %vm7652_vm3, %v3216_v16  ;;  %vm7666_vm4 = vmmov %vm7616_vm0 }
 0xb06   : > { %v3193_v27 = vadd.f32 %v6763_v15, %v3175_v22  ;;  %vm7667_vm3 = vmmov %vm7616_vm0 }
 0xb08   : > { %v3209_v17 = vmax.f32 %v3193_v27, 0.0 }
 0xb0a   : > { %v3217_v26 = vmax.f32 %v3201_v35, %v3209_v17  ;;  %v7678_v17 = vld [vmem:[#allocation10_spill] sm:$0xff] }
 0xb0b   : > { %v3152_v63 = vpop.f32.mrf.mxu1 }
 0xb0c   : > { %v3176_v20 = vmul.f32 %v6757_v21, %v3152_v63  ;;  %4559 = vmatmul.msk.f32.gmra.mxu2 %vm7653_vm5, %v3217_v26  ;;  %4575 = vmatmul.msk.f32.gmra.mxu1 %vm7654_vm6, %v3217_v26  ;;  %vm7668_vm5 = vmmov %vm7616_vm0 }
 0xb0d   : > { %4567 = vmatmul.msk.f32.gmra.mxu0 %vm7655_vm10, %v3217_v26  ;;  %vm7669_vm6 = vmmov %vm7616_vm0 }
 0xb0e   : > { %v3194_v61 = vadd.f32 %v6763_v15, %v3176_v20  ;;  %vm7670_vm10 = vmmov %vm7616_vm0 }
 0xb10   : > { %v3210_v1 = vmax.f32 %v3194_v61, 0.0 }
 0xb12   : > { %v3218_v9 = vmax.f32 %v3202_v50, %v3210_v1  ;;  %v7680_v1 = vld [vmem:[#allocation12_spill] sm:$0xff] }
 0xb13   : > { %v3155_v3 = vpop.f32.mrf.mxu1 }
 0xb14   : > { %v3177_v28 = vmul.f32 %v6757_v21, %v3155_v3  ;;  %4560 = vmatmul.msk.f32.gmra.mxu2 %vm7656_vm8, %v3218_v9  ;;  %4576 = vmatmul.msk.f32.gmra.mxu1 %vm7657_vm9, %v3218_v9  ;;  %vm7671_vm8 = vmmov %vm7616_vm0 }
 0xb15   : > { %4568 = vmatmul.msk.f32.gmra.mxu0 %vm7658_vm12, %v3218_v9  ;;  %vm3462_vm12 = vcmp.eq.s32.totalorder %v6891_v60, %v3434_v38 }
 0xb16   : > { %v3195_v6 = vadd.f32 %v6763_v15, %v3177_v28  ;;  %v4613_v27 = vsel %vm3462_vm12, 1.0, %v7677_v52 }
 0xb18   : > { %v3211_v45 = vmax.f32 %v3195_v6, 0.0 }
 0xb1a   : > { %v3219_v54 = vmax.f32 %v3203_v8, %v3211_v45 }
 0xb1b   : > { %v3158_v44 = vpop.f32.mrf.mxu1 }
 0xb1c   : > { %v3178_v37 = vmul.f32 %v6757_v21, %v3158_v44  ;;  %4561 = vmatmul.msk.f32.gmra.mxu2 %vm7659_vm1, %v3219_v54  ;;  %4577 = vmatmul.msk.f32.gmra.mxu1 %vm7660_vm13, %v3219_v54  ;;  %vm3458_vm1 = vcmp.eq.s32.totalorder %v6894_v29, %v3434_v38  ;;  %v3425_v44 = vadd.s32 128, %v7672_v56 }
 0xb1d   : > { %4569 = vmatmul.msk.f32.gmra.mxu0 %vm7661_vm2, %v3219_v54  ;;  %v4609_v36 = vsel %vm3458_vm1, 1.0, %v7677_v52 }
 0xb1e   : > { %v3196_v57 = vadd.f32 %v6763_v15, %v3178_v37 }
 0xb20   : > { %v3212_v0 = vmax.f32 %v3196_v57, 0.0 }
 0xb22   : > { %v3220_v47 = vmax.f32 %v3204_v13, %v3212_v0 }
 0xb24   : > { %4562 = vmatmul.msk.f32.gmra.mxu2 %vm7662_vm15, %v3220_v47  ;;  %4578 = vmatmul.msk.f32.gmra.mxu1 %vm7616_vm0, %v3220_v47  ;;  %vm3450_vm15 = vcmp.eq.s32.totalorder %v7678_v17, %v3434_v38  ;;  %vm3460_vm0 = vcmp.eq.s32.totalorder %v6891_v60, %v6903_v34 }
 0xb25   : > { %4570 = vmatmul.msk.f32.gmra.mxu0 %vm7663_vm14, %v3220_v47  ;;  %vm3446_vm14 = vcmp.eq.s32.totalorder %v7679_v12, %v3434_v38  ;;  %v4601_v61 = vsel %vm3450_vm15, 1.0, %v7677_v52  ;;  %v4611_v50 = vsel %vm3460_vm0, 1.0, %v7677_v52 }
 0xb26   : > { %v4597_v28 = vsel %vm3446_vm14, 1.0, %v7677_v52 }
 0xb2c   : > { %4579 = vmatmul.msk.f32.vlgmr.msrb.gmra.mxu2 %vm7664_vm7, %v6769_v11  ;;  %vm3456_vm7 = vcmp.eq.s32.totalorder %v6894_v29, %v6903_v34 }
 0xb2d   : > { %v4607_v6 = vsel %vm3456_vm7, 1.0, %v7677_v52  ;;  %vm3872_vm7 = vcmask 523264  }
 0xb34   : > { %4580 = vmatmul.msk.f32.gmra.mxu2 %vm7665_vm11, %v6781_v48  ;;  %vm3442_vm11 = vcmp.eq.s32.totalorder %v7680_v1, %v3434_v38 }
 0xb3c   : > { %4581 = vmatmul.msk.f32.gmra.mxu2 %vm7666_vm4, %v6793_v62  ;;  %v6888_v62 = vand.u32 7, %v7673_v7 }
 0xb3e   : > { %vm3466_vm9 = vcmp.eq.s32.totalorder %v6888_v62, %v3434_v38  ;;  %vm3464_vm2 = vcmp.eq.s32.totalorder %v6888_v62, %v6903_v34 }
 0xb3f   : > { %v4617_v22 = vsel %vm3466_vm9, 1.0, %v7677_v52  ;;  %v4615_v63 = vsel %vm3464_vm2, 1.0, %v7677_v52 }
 0xb44   : > { %4582 = vmatmul.msk.f32.gmra.mxu2 %vm7667_vm3, %v3216_v16  ;;  %v6898_v16 = vand.u32 7, %v7676_v32  ;;  %vm3438_vm3 = vcmp.eq.s32.totalorder %v7681_v42, %v3434_v38 }
 0xb45   : > { %v4589_v13 = vsel %vm3438_vm3, 1.0, %v7677_v52 }
 0xb46   : > { %vm3454_vm13 = vcmp.eq.s32.totalorder %v6898_v16, %v3434_v38  ;;  %vm3452_vm4 = vcmp.eq.s32.totalorder %v6898_v16, %v6903_v34 }
 0xb47   : > { %v4603_v14 = vsel %vm3452_vm4, 1.0, %v7677_v52 }
 0xb4c   : > { %4583 = vmatmul.msk.f32.gmra.mxu2 %vm7668_vm5, %v3217_v26  ;;  %v4605_v26 = vsel %vm3454_vm13, 1.0, %v7677_v52  ;;  %vm3448_vm5 = vcmp.eq.s32.totalorder %v7678_v17, %v6903_v34 }
 0xb4d   : > { %v4599_v0 = vsel %vm3448_vm5, 1.0, %v7677_v52 }
 0xb54   : > { %4584 = vmatmul.msk.f32.gmra.mxu2 %vm7669_vm6, %v3218_v9  ;;  %vm3444_vm6 = vcmp.eq.s32.totalorder %v7679_v12, %v6903_v34 }
 0xb5c   : > { %4585 = vmatmul.msk.f32.gmra.mxu2 %vm7670_vm10, %v3219_v54  ;;  %v4593_v54 = vsel %vm3442_vm11, 1.0, %v7677_v52  ;;  %vm3440_vm10 = vcmp.eq.s32.totalorder %v7680_v1, %v6903_v34 }
 0xb64   : > { %4586 = vmatmul.msk.f32.gmra.mxu2 %vm7671_vm8, %v3220_v47  ;;  %vm3436_vm8 = vcmp.eq.s32.totalorder %v7681_v42, %v6903_v34 }
 0xb69   : > { %v6862_v5 = vpop.f32.mrf.mxu1 }
 0xb6a   : > { %v6864_v21 = vpop.f32.mrf.mxu0  ;;  %v3842_v25 = vmul.f32 %v4589_v13, %v6862_v5  ;;  %v4587_v5 = vsel %vm3436_vm8, 1.0, %v7677_v52 }
 0xb6f   : > { %v6866_v15 = vpop.f32.mrf.mxu2 }
 0xb71   : > { %v6868_v49 = vpop.f32.mrf.mxu1 }
 0xb72   : > { %v6872_v31 = vpop.f32.mrf.mxu0  ;;  %v3846_v47 = vmul.f32 %v4593_v54, %v6868_v49  ;;  %v7682_v49 = vld [vmem:[#allocation2_spill] sm:$0xff] }
 0xb73   : > { %v3565_v54 = vadd.s32 360, %v7682_v49  ;;  %v3562_v13 = vadd.s32 336, %v7682_v49 }
 0xb77   : > { %v6870_v11 = vpop.f32.mrf.mxu2 }
 0xb79   : > { %v3366_v58 = vpop.f32.mrf.mxu1 }
 0xb7a   : > { %v6876_v59 = vpop.f32.mrf.mxu0  ;;  %v3850_v37 = vmul.f32 %v4597_v28, %v3366_v58  ;;  %v3433_v58 = vshra.s32 %v3425_v44, 6  ;;  %v3566_v28 = vadd.s32 368, %v7682_v49  ;;  %v3629_v44 = vand.u32 63, %v3565_v54 }
 0xb7c   : > { %vm3465_vm9 = vcmp.eq.s32.totalorder %v6888_v62, %v3433_v58  ;;  %vm3461_vm12 = vcmp.eq.s32.totalorder %v6891_v60, %v3433_v58  ;;  %vm3457_vm13 = vcmp.eq.s32.totalorder %v6894_v29, %v3433_v58  ;;  %vm3453_vm2 = vcmp.eq.s32.totalorder %v6898_v16, %v3433_v58 }
 0xb7d   : > { %v4616_v34 = vsel %vm3465_vm9, 1.0, %v7677_v52  ;;  %vm3449_vm15 = vcmp.eq.s32.totalorder %v7678_v17, %v3433_v58  ;;  %vm3445_vm14 = vcmp.eq.s32.totalorder %v7679_v12, %v3433_v58  ;;  %vm3441_vm11 = vcmp.eq.s32.totalorder %v7680_v1, %v3433_v58 }
 0xb7e   : > { %vm3437_vm4 = vcmp.eq.s32.totalorder %v7681_v42, %v3433_v58  ;;  %vm3693_vm5 = vcmp.eq.s32.totalorder %v3629_v44, %v7672_v56 }
 0xb7f   : > { %v6874_v51 = vpop.f32.mrf.mxu2 }
 0xb81   : > { %v3369_v24 = vpop.f32.mrf.mxu1 }
 0xb82   : > { %v6880_v48 = vpop.f32.mrf.mxu0  ;;  %v3854_v8 = vmul.f32 %v4601_v61, %v3369_v24  ;;  %v4600_v61 = vsel %vm3449_vm15, 1.0, %v7677_v52 }
 0xb87   : > { %v6878_v46 = vpop.f32.mrf.mxu2 }
 0xb89   : > { %v3372_v40 = vpop.f32.mrf.mxu1 }
 0xb8a   : > { %v6885_v23 = vpop.f32.mrf.mxu0  ;;  %v3858_v9 = vmul.f32 %v4605_v26, %v3372_v40  ;;  %v4595_v40 = vsel %vm3444_vm6, 1.0, %v7677_v52 }
 0xb8b   : > { %v3848_v38 = vmul.f32 %v4595_v40, %v6874_v51  ;;  %v3840_v51 = vmul.f32 %v4587_v5, %v6866_v15  ;;  %v3626_v40 = vand.u32 63, %v3562_v13  ;;  %v3557_v5 = vadd.s32 296, %v7682_v49 }
 0xb8f   : > { %v6882_v10 = vpop.f32.mrf.mxu2 }
 0xb90   : > { %v3856_v24 = vmul.f32 %v4603_v14, %v6882_v10  ;;  %v4591_v10 = vsel %vm3440_vm10, 1.0, %v7677_v52 }
 0xb91   : > { %v3375_v18 = vpop.f32.mrf.mxu1 }
 0xb92   : > { %v6906_v19 = vpop.f32.mrf.mxu0  ;;  %v3862_v20 = vmul.f32 %v4609_v36, %v3375_v18 }
 0xb97   : > { %v3293_v30 = vpop.f32.mrf.mxu2 }
 0xb98   : > { %v3860_v57 = vmul.f32 %v4607_v6, %v3293_v30  ;;  %v3852_v30 = vmul.f32 %v4599_v0, %v6878_v46  ;;  %v3561_v0 = vadd.s32 328, %v7682_v49 }
 0xb99   : > { %v3378_v41 = vpop.f32.mrf.mxu1 }
 0xb9a   : > { %v3866_v43 = vmul.f32 %v4613_v27, %v3378_v41  ;;  %v3337_v45 = vpop.f32.mrf.mxu0  ;;  %v3567_v41 = vadd.s32 376, %v7682_v49  ;;  %v7683_v27 = vmov 1.0  }
 0xb9f   : > { %v3296_v39 = vpop.f32.mrf.mxu2 }
 0xba0   : > { %v3864_v53 = vmul.f32 %v4611_v50, %v3296_v39  ;;  %v3631_v39 = vand.u32 63, %v3567_v41 }
 0xba1   : > { %v3381_v55 = vpop.f32.mrf.mxu1 }
 0xba2   : > { %v3870_v35 = vmul.f32 %v4617_v22, %v3381_v55  ;;  %v3844_v22 = vmul.f32 %v4591_v10, %v6870_v11  ;;  %v3340_v46 = vpop.f32.mrf.mxu0  ;;  %vm3695_vm1 = vcmp.eq.s32.totalorder %v3631_v39, %v7672_v56  ;;  %v4612_v55 = vsel %vm3461_vm12, 1.0, %v7677_v52 }
 0xba3   : > { %4720 = vmatpush.msk.msra.mxu3 %vm3695_vm1, %v7683_v27  ;;  %v4608_v11 = vsel %vm3457_vm13, 1.0, %v7677_v52  ;;  %v3865_v26 = vmul.f32 %v4612_v55, %v3337_v45  ;;  %vm3690_vm13 = vcmp.eq.s32.totalorder %v3626_v40, %v7672_v56 }
 0xba4   : > { %3924 = vmatpush.msrb.mxu1 %v3870_v35  ;;  %v3869_v35 = vmul.f32 %v4616_v34, %v3340_v46  ;;  %v3861_v15 = vmul.f32 %v4608_v11, %v6906_v19  ;;  %v4596_v19 = vsel %vm3445_vm14, 1.0, %v7677_v52  ;;  %v3551_v46 = vadd.s32 248, %v7682_v49  ;;  %v7685_v11 = vld [vmem:[#allocation21_spill] sm:$0xff] }
 0xba5   : > { %v3849_v6 = vmul.f32 %v4596_v19, %v6876_v59  ;;  %v3550_v34 = vadd.s32 240, %v7682_v49 }
 0xba6   : > { %3925 = vmatpush.msrb.mxu1 %v3866_v43  ;;  %v3532_v43 = vshra.s32 %v7672_v56, 3 }
 0xba7   : > { %v3299_v2 = vpop.f32.mrf.mxu2 }
 0xba8   : > { %v3868_v3 = vmul.f32 %v4615_v63, %v3299_v2  ;;  %3926 = vmatpush.msrb.mxu1 %v3862_v20  ;;  %v4604_v63 = vsel %vm3453_vm2, 1.0, %v7677_v52  ;;  %vm3533_vm0 = vcmp.eq.s32.totalorder %v7682_v49, %v3532_v43  ;;  %v3853_v2 = vmul.f32 %v4600_v61, %v6880_v48 }
 0xba9   : > { %v6975_v20 = vsel %vm3533_vm0, 1.0, %v7677_v52  ;;  %v3857_v50 = vmul.f32 %v4604_v63, %v6885_v23  ;;  %v3630_v23 = vand.u32 63, %v3566_v28  ;;  %v3598_v43 = vand.u32 63, %v7685_v11  ;;  %v7690_v28 = vld [vmem:[#allocation20_spill] sm:$0xff] }
 0xbaa   : > { %3884 = vmatpush.msrb.mxu0 %v3868_v3  ;;  %3927 = vmatpush.msrb.mxu1 %v3858_v9  ;;  %v4592_v3 = vsel %vm3441_vm11, 1.0, %v7677_v52  ;;  %v3614_v61 = vand.u32 63, %v3550_v34  ;;  %v3536_v11 = vadd.s32 128, %v7682_v49 }
 0xbab   : > { %vm3694_vm3 = vcmp.eq.s32.totalorder %v3630_v23, %v7672_v56  ;;  %vm3662_vm14 = vcmp.eq.s32.totalorder %v3598_v43, %v7672_v56  ;;  %v3621_v23 = vand.u32 63, %v3557_v5 }
 0xbac   : > { %3885 = vmatpush.msrb.mxu0 %v3864_v53  ;;  %3928 = vmatpush.msrb.mxu1 %v3854_v8  ;;  %v4588_v8 = vsel %vm3437_vm4, 1.0, %v7677_v52  ;;  %v3845_v53 = vmul.f32 %v4592_v3, %v6872_v31  ;;  %v3427_v31 = vadd.s32 384, %v7672_v56  ;;  %vm7060_vm4 = vcmp.eq.s32.totalorder %v3614_v61, %v7672_v56 }
 0xbad   : > { %v3841_v48 = vmul.f32 %v4588_v8, %v6864_v21  ;;  %4721 = vmatpush.msk.msra.mxu3 %vm3694_vm3, %v7683_v27 }
 0xbae   : > { %3886 = vmatpush.msrb.mxu0 %v3860_v57  ;;  %3929 = vmatpush.msrb.mxu1 %v3850_v37  ;;  %v7006_v14 = vshra.s32 %v3427_v31, 6  ;;  %v3564_v37 = vadd.s32 352, %v7682_v49  ;;  %v3563_v57 = vadd.s32 344, %v7682_v49  ;;  %v7695_v31 = vld [vmem:[#allocation18_spill] sm:$0xff] }
 0xbaf   : > { %v6945_v18 = vpop.f32.mrf.mxu2  ;;  %4722 = vmatpush.msk.msra.mxu3 %vm3693_vm5, %v7683_v27  ;;  %v3596_v44 = vand.u32 63, %v7695_v31  ;;  %v3581_v31 = vadd.s32 488, %v7682_v49 }
 0xbb0   : > { %3887 = vmatpush.msrb.mxu0 %v3856_v24  ;;  %3930 = vmatpush.msrb.mxu1 %v3846_v47  ;;  %vm3459_vm6 = vcmp.eq.s32.totalorder %v6894_v29, %v7006_v14  ;;  %vm3463_vm10 = vcmp.eq.s32.totalorder %v6891_v60, %v7006_v14  ;;  %vm3467_vm8 = vcmp.eq.s32.totalorder %v6888_v62, %v7006_v14  ;;  %v3560_v47 = vadd.s32 320, %v7682_v49  ;;  %v7684_v60 = vld [vmem:[#allocation22_spill] sm:$0xff] }
 0xbb1   : > { %v3559_v24 = vadd.s32 312, %v7682_v49  ;;  %v3628_v58 = vand.u32 63, %v3564_v37  ;;  %v3627_v29 = vand.u32 63, %v3563_v57  ;;  %vm3455_vm9 = vcmp.eq.s32.totalorder %v6898_v16, %v7006_v14 }
 0xbb2   : > { %3888 = vmatpush.msrb.mxu0 %v3852_v30  ;;  %3931 = vmatpush.msrb.mxu1 %v3842_v25  ;;  %v3558_v25 = vadd.s32 304, %v7682_v49  ;;  %v7025_v30 = vsel %vm3459_vm6, 1.0, %v7677_v52  ;;  %v3625_v62 = vand.u32 63, %v3561_v0  ;;  %v3624_v41 = vand.u32 63, %v3560_v47  ;;  %v7698_v0 = vld [vmem:[#allocation19_spill] sm:$0xff] }
 0xbb3   : > { %4686 = vmatmul.msk.f32.vlgmr.msrb.gmra.mxu1 %vm3872_vm7, %v6975_v20  ;;  %vm3692_vm12 = vcmp.eq.s32.totalorder %v3628_v58, %v7672_v56  ;;  %vm3691_vm1 = vcmp.eq.s32.totalorder %v3627_v29, %v7672_v56  ;;  %v7035_v10 = vsel %vm3463_vm10, 1.0, %v7677_v52  ;;  %v3623_v39 = vand.u32 63, %v3559_v24 }
 0xbb4   : > { %3889 = vmatpush.msrb.mxu0 %v3848_v38  ;;  %v4618_v38 = vsel %vm3467_vm8, 1.0, %v7677_v52  ;;  %4723 = vmatpush.msk.msra.mxu3 %vm3692_vm12, %v7683_v27  ;;  %v3599_v55 = vand.u32 63, %v7684_v60  ;;  %vm3689_vm2 = vcmp.eq.s32.totalorder %v3625_v62, %v7672_v56  ;;  %vm7050_vm15 = vcmp.eq.s32.totalorder %v3624_v41, %v7672_v56 }
 0xbb5   : > { %vm7068_vm3 = vcmp.eq.s32.totalorder %v3623_v39, %v7672_v56  ;;  %vm3447_vm5 = vcmp.eq.s32.totalorder %v7679_v12, %v7006_v14  ;;  %v3546_v37 = vadd.s32 208, %v7682_v49  ;;  %v3595_v47 = vand.u32 63, %v7698_v0 }
 0xbb6   : > { %3890 = vmatpush.msrb.mxu0 %v3844_v22  ;;  %v3622_v22 = vand.u32 63, %v3558_v25  ;;  %4724 = vmatpush.msk.msra.mxu3 %vm3691_vm1, %v7683_v27  ;;  %vm3663_vm0 = vcmp.eq.s32.totalorder %v3599_v55, %v7672_v56  ;;  %v3545_v24 = vadd.s32 200, %v7682_v49  ;;  %vm3660_vm1 = vcmp.eq.s32.totalorder %v3596_v44, %v7672_v56 }
 0xbb7   : > { %v6965_v36 = vpop.f32.mrf.mxu2  ;;  %4688 = vmatpush.msk.msra.mxu1 %vm3663_vm0, %v7683_v27  ;;  %v3610_v40 = vand.u32 63, %v3546_v37  ;;  %v4606_v25 = vsel %vm3455_vm9, 1.0, %v7677_v52  ;;  %v3544_v55 = vadd.s32 192, %v7682_v49  ;;  %v4598_v8 = vsel %vm3447_vm5, 1.0, %v7677_v52 }
 0xbb8   : > { %3891 = vmatpush.msrb.mxu0 %v3840_v51  ;;  %4725 = vmatpush.msk.msra.mxu3 %vm3690_vm13, %v7683_v27  ;;  %vm7090_vm8 = vcmp.eq.s32.totalorder %v3622_v22, %v7672_v56  ;;  %vm3451_vm13 = vcmp.eq.s32.totalorder %v7678_v17, %v7006_v14  ;;  %v3609_v22 = vand.u32 63, %v3545_v24  ;;  %v3580_v37 = vadd.s32 480, %v7682_v49 }
 0xbb9   : > { %4684 = vmatmul.msk.f32.vlgmr.msrb.gmra.mxu0 %vm3872_vm7, %v6975_v20  ;;  %4689 = vmatpush.msk.msra.mxu1 %vm3662_vm14, %v7683_v27  ;;  %vm7147_vm14 = vcmp.eq.s32.totalorder %v3610_v40, %v7672_v56  ;;  %v3608_v43 = vand.u32 63, %v3544_v55  ;;  %v3540_v0 = vadd.s32 160, %v7682_v49  ;;  %v3589_v24 = vand.u32 63, %v7675_v33 }
 0xbba   : > { %3904 = vmatpush.msra.mxu0 %v3869_v35  ;;  %v3549_v35 = vadd.s32 232, %v7682_v49  ;;  %4726 = vmatpush.msk.msra.mxu3 %vm3689_vm2, %v7683_v27  ;;  %vm3659_vm2 = vcmp.eq.s32.totalorder %v3595_v47, %v7672_v56  ;;  %v3577_v47 = vadd.s32 456, %v7682_v49  ;;  %v3576_v29 = vadd.s32 448, %v7682_v49 }
 0xbbb   : > { %v3554_v40 = vadd.s32 272, %v7682_v49  ;;  %v3537_v55 = vadd.s32 136, %v7682_v49 }
 0xbbc   : > { %3905 = vmatpush.msra.mxu0 %v3865_v26  ;;  %v3548_v26 = vadd.s32 224, %v7682_v49  ;;  %v3613_v19 = vand.u32 63, %v3549_v35  ;;  %4727 = vmatpush.msk.msra.mxu3 %vm7050_vm15, %v7683_v27  ;;  %vm7120_vm15 = vcmp.eq.s32.totalorder %v3621_v23, %v7672_v56  ;;  %v3574_v35 = vadd.s32 432, %v7682_v49 }
 0xbbd   : > { %v3618_v5 = vand.u32 63, %v3554_v40 }
 0xbbe   : > { %3906 = vmatpush.msra.mxu0 %v3861_v15  ;;  %v3615_v15 = vand.u32 63, %v3551_v46  ;;  %v3612_v3 = vand.u32 63, %v3548_v26  ;;  %vm7078_vm6 = vcmp.eq.s32.totalorder %v3613_v19, %v7672_v56  ;;  %4728 = vmatpush.msk.msra.mxu3 %vm7068_vm3, %v7683_v27  ;;  %v7713_v26 = vld [vmem:[#allocation15_spill] sm:$0xff]  ;;  %vm7168_vm3 = vcmp.eq.s32.totalorder %v3609_v22, %v7672_v56 }
 0xbbf   : > { %v6987_v9 = vpop.f32.mrf.mxu2  ;;  %v3592_v63 = vand.u32 63, %v7713_v26  ;;  %v4602_v19 = vsel %vm3451_vm13, 1.0, %v7677_v52  ;;  %v3575_v22 = vadd.s32 440, %v7682_v49  ;;  %v3573_v26 = vadd.s32 424, %v7682_v49 }
 0xbc0   : > { %3907 = vmatpush.msra.mxu0 %v3857_v50  ;;  %v3556_v50 = vadd.s32 288, %v7682_v49  ;;  %vm3679_vm11 = vcmp.eq.s32.totalorder %v3615_v15, %v7672_v56  ;;  %vm7100_vm12 = vcmp.eq.s32.totalorder %v3612_v3, %v7672_v56  ;;  %4729 = vmatpush.msk.msra.mxu3 %vm7090_vm8, %v7683_v27 }
 0xbc1   : > { %4704 = vmatpush.msk.msra.mxu2 %vm3679_vm11, %v7683_v27  ;;  %vm7188_vm8 = vcmp.eq.s32.totalorder %v3592_v63, %v7672_v56  ;;  %v7726_v63 = vld [vmem:[#allocation4_spill] sm:$0xff]  ;;  %v3637_v17 = vand.u32 63, %v3573_v26 }
 0xbc2   : > { %3908 = vmatpush.msra.mxu0 %v3853_v2  ;;  %v3620_v58 = vand.u32 63, %v3556_v50  ;;  %4730 = vmatpush.msk.msra.mxu3 %vm7120_vm15, %v7683_v27  ;;  %v3542_v50 = vadd.s32 176, %v7682_v49  ;;  %v3585_v15 = vand.u32 63, %v7726_v63  ;;  %v3600_v2 = vand.u32 63, %v3536_v11 }
 0xbc3   : > { %4705 = vmatpush.msk.msra.mxu2 %vm7060_vm4, %v7683_v27 }
 0xbc4   : > { %3909 = vmatpush.msra.mxu0 %v3849_v6  ;;  %v3597_v6 = vand.u32 63, %v7690_v28  ;;  %vm7142_vm0 = vcmp.eq.s32.totalorder %v3620_v58, %v7672_v56  ;;  %v3606_v28 = vand.u32 63, %v3542_v50  ;;  %v3539_v58 = vadd.s32 152, %v7682_v49 }
 0xbc5   : > { %4706 = vmatpush.msk.msra.mxu2 %vm7078_vm6, %v7683_v27  ;;  %4731 = vmatpush.msk.msra.mxu3 %vm7142_vm0, %v7683_v27  ;;  %v3572_v50 = vadd.s32 416, %v7682_v49 }
 0xbc6   : > { %3910 = vmatpush.msra.mxu0 %v3845_v53  ;;  %v3547_v53 = vadd.s32 216, %v7682_v49  ;;  %vm3661_vm10 = vcmp.eq.s32.totalorder %v3597_v6, %v7672_v56  ;;  %v3591_v6 = vand.u32 63, %v7673_v7  ;;  %v3541_v7 = vadd.s32 168, %v7682_v49 }
 0xbc7   : > { %v6997_v45 = vpop.f32.mrf.mxu2  ;;  %4690 = vmatpush.msk.msra.mxu1 %vm3661_vm10, %v7683_v27  ;;  %4707 = vmatpush.msk.msra.mxu2 %vm7100_vm12, %v7683_v27  ;;  %vm3443_vm10 = vcmp.eq.s32.totalorder %v7680_v1, %v7006_v14  ;;  %vm7194_vm12 = vcmp.eq.s32.totalorder %v3608_v43, %v7672_v56  ;;  %v3603_v33 = vand.u32 63, %v3539_v58  ;;  %v3553_v43 = vadd.s32 264, %v7682_v49 }
 0xbc8   : > { %3911 = vmatpush.msra.mxu0 %v3841_v48  ;;  %v3555_v48 = vadd.s32 280, %v7682_v49  ;;  %v3611_v13 = vand.u32 63, %v3547_v53  ;;  %v3855_v23 = vmul.f32 %v4602_v19, %v6997_v45  ;;  %vm3655_vm5 = vcmp.eq.s32.totalorder %v3591_v6, %v7672_v56 }
 0xbc9   : > { %4685 = vmatmul.msk.f32.vlgmr.msra.gmra.mxu0 %vm3872_vm7, %v6975_v20  ;;  %4691 = vmatpush.msk.msra.mxu1 %vm3660_vm1, %v7683_v27  ;;  %vm3439_vm1 = vcmp.eq.s32.totalorder %v7681_v42, %v7006_v14  ;;  %v4594_v12 = vsel %vm3443_vm10, 1.0, %v7677_v52  ;;  %v3582_v53 = vadd.s32 496, %v7682_v49  ;;  %v3605_v45 = vand.u32 63, %v3541_v7 }
 0xbca   : > { %v3619_v41 = vand.u32 63, %v3555_v48  ;;  %vm7125_vm9 = vcmp.eq.s32.totalorder %v3611_v13, %v7672_v56  ;;  %v3851_v48 = vmul.f32 %v4598_v8, %v6987_v9  ;;  %v4590_v1 = vsel %vm3439_vm1, 1.0, %v7677_v52 }
 0xbcb   : > { %4692 = vmatpush.msk.msra.mxu1 %vm3659_vm2, %v7683_v27  ;;  %4708 = vmatpush.msk.msra.mxu2 %vm7125_vm9, %v7683_v27  ;;  %vm3670_vm2 = vcmp.eq.s32.totalorder %v3606_v28, %v7672_v56  ;;  %v3847_v44 = vmul.f32 %v4594_v12, %v6965_v36  ;;  %vm3669_vm15 = vcmp.eq.s32.totalorder %v3605_v45, %v7672_v56  ;;  %v3646_v9 = vand.u32 63, %v3582_v53 }
 0xbcc   : > { %vm7161_vm11 = vcmp.eq.s32.totalorder %v3619_v41, %v7672_v56  ;;  %v3843_v57 = vmul.f32 %v4590_v1, %v6945_v18  ;;  %v3645_v52 = vand.u32 63, %v3581_v31  ;;  %v3579_v42 = vadd.s32 472, %v7682_v49 }
 0xbcd   : > { %4709 = vmatpush.msk.msra.mxu2 %vm7147_vm14, %v7683_v27  ;;  %4732 = vmatpush.msk.msra.mxu3 %vm7161_vm11, %v7683_v27  ;;  %vm3710_vm0 = vcmp.eq.s32.totalorder %v3646_v9, %v7672_v56  ;;  %v3644_v36 = vand.u32 63, %v3580_v37  ;;  %v3578_v14 = vadd.s32 464, %v7682_v49  ;;  %v3641_v41 = vand.u32 63, %v3577_v47  ;;  %v4046_v9 = vld [vmem:[%s7424_s6 + $0x2a0] sm:$0xff]  ;;  %v4045_v37 = vld [vmem:[%s7424_s6 + $0x298] sm:$0xff] }
 0xbce   : > { %vm3709_vm14 = vcmp.eq.s32.totalorder %v3645_v52, %v7672_v56  ;;  %v3643_v18 = vand.u32 63, %v3579_v42  ;;  %vm7269_vm10 = vcmp.eq.s32.totalorder %v3589_v24, %v7672_v56  ;;  %v3584_v19 = vand.u32 63, %v7682_v49  ;;  %v4042_v52 = vld [vmem:[%s7424_s6 + $0x280] sm:$0xff]  ;;  %v4041_v42 = vld [vmem:[%s7424_s6 + $0x278] sm:$0xff] }
 0xbcf   : > { %v7001_v59 = vpop.f32.mrf.mxu2  ;;  %4710 = vmatpush.msk.msra.mxu2 %vm7168_vm3, %v7683_v27  ;;  %vm3708_vm11 = vcmp.eq.s32.totalorder %v3644_v36, %v7672_v56  ;;  %v3642_v13 = vand.u32 63, %v3578_v14  ;;  %vm3705_vm1 = vcmp.eq.s32.totalorder %v3641_v41, %v7672_v56  ;;  %v3636_v6 = vand.u32 63, %v3572_v50  ;;  %v4040_v36 = vld [vmem:[%s7424_s6 + $0x270] sm:$0xff]  ;;  %v4039_v14 = vld [vmem:[%s7424_s6 + $0x268] sm:$0xff]  ;;  %v4075_v41 = vld [vmem:[%s7424_s6 + $0x2b8] sm:$0xff] }
 0xbd0   : > { %v3859_v3 = vmul.f32 %v4606_v25, %v7001_v59  ;;  %v3583_v59 = vadd.s32 504, %v7682_v49  ;;  %v3588_v25 = vand.u32 63, %v7676_v32  ;;  %v3538_v32 = vadd.s32 144, %v7682_v49 }
 0xbd1   : > { %4711 = vmatpush.msk.msra.mxu2 %vm7194_vm12, %v7683_v27  ;;  %vm3706_vm3 = vcmp.eq.s32.totalorder %v3642_v13, %v7672_v56  ;;  %v3570_v7 = vadd.s32 400, %v7682_v49  ;;  %v3568_v31 = vadd.s32 384, %v7682_v49  ;;  %v4844_v13 = vld [vmem:[%s7424_s6 + $0x2e4] ss:$0 sm:$0xff] }
 0xbd2   : > { %v3647_v54 = vand.u32 63, %v3583_v59  ;;  %v3571_v59 = vadd.s32 408, %v7682_v49 }
 0xbd3   : > { %v3634_v53 = vand.u32 63, %v3570_v7 }
 0xbd4   : > { %vm3711_vm9 = vcmp.eq.s32.totalorder %v3647_v54, %v7672_v56  ;;  %v3635_v12 = vand.u32 63, %v3571_v59 }
 0xbd7   : > { %v7009_v21 = vpop.f32.mrf.mxu2 }
 0xbd8   : > { %v3863_v46 = vmul.f32 %v7025_v30, %v7009_v21  ;;  %v7710_v30 = vld [vmem:[#allocation16_spill] sm:$0xff]  ;;  %v3601_v21 = vand.u32 63, %v3537_v55 }
 0xbdf   : > { %v3419_v51 = vpop.f32.mrf.mxu2 }
 0xbe0   : > { %v3867_v34 = vmul.f32 %v7035_v10, %v3419_v51  ;;  %v3593_v10 = vand.u32 63, %v7710_v30  ;;  %v3543_v51 = vadd.s32 184, %v7682_v49  ;;  %v3638_v30 = vand.u32 63, %v3574_v35  ;;  %v4847_v35 = vld [vmem:[%s7424_s6 + $0x2e7] ss:$0 sm:$0xff] }
 0xbe2   : > { %vm3657_vm6 = vcmp.eq.s32.totalorder %v3593_v10, %v7672_v56  ;;  %v3607_v61 = vand.u32 63, %v3543_v51  ;;  %v7725_v10 = vld [vmem:[#allocation6_spill] sm:$0xff] }
 0xbe3   : > { %v3586_v51 = vand.u32 63, %v7725_v10 }
 0xbe4   : > { %vm3671_vm13 = vcmp.eq.s32.totalorder %v3607_v61, %v7672_v56  ;;  %v3552_v61 = vadd.s32 256, %v7682_v49 }
 0xbe5   : > { %4712 = vmatpush.msk.msra.mxu2 %vm3671_vm13, %v7683_v27  ;;  %vm3667_vm13 = vcmp.eq.s32.totalorder %v3603_v33, %v7672_v56  ;;  %v4073_v33 = vld [vmem:[%s7424_s6 + $0x2a8] sm:$0xff] }
 0xbe6   : > { %v3616_v28 = vand.u32 63, %v3552_v61 }
 0xbe7   : > { %v3422_v62 = vpop.f32.mrf.mxu2  ;;  %4713 = vmatpush.msk.msra.mxu2 %vm3670_vm2, %v7683_v27  ;;  %vm3682_vm2 = vcmp.eq.s32.totalorder %v3618_v5, %v7672_v56 }
 0xbe8   : > { %v3871_v39 = vmul.f32 %v4618_v38, %v3422_v62  ;;  %v7705_v38 = vld [vmem:[#allocation17_spill] sm:$0xff]  ;;  %v3604_v62 = vand.u32 63, %v3540_v0  ;;  %4733 = vmatpush.msk.msra.mxu3 %vm3682_vm2, %v7683_v27  ;;  %vm3698_vm2 = vcmp.eq.s32.totalorder %v3634_v53, %v7672_v56 }
 0xbe9   : > { %v3594_v60 = vand.u32 63, %v7705_v38  ;;  %4714 = vmatpush.msk.msra.mxu2 %vm3669_vm15, %v7683_v27  ;;  %v3602_v38 = vand.u32 63, %v3538_v32 }
 0xbea   : > { %3944 = vmatpush.msrb.mxu0 %v3871_v39  ;;  %v3640_v39 = vand.u32 63, %v3576_v29  ;;  %vm3668_vm12 = vcmp.eq.s32.totalorder %v3604_v62, %v7672_v56 }
 0xbeb   : > { %vm3658_vm4 = vcmp.eq.s32.totalorder %v3594_v60, %v7672_v56  ;;  %4715 = vmatpush.msk.msra.mxu2 %vm3668_vm12, %v7683_v27  ;;  %v3639_v60 = vand.u32 63, %v3575_v22  ;;  %vm3701_vm12 = vcmp.eq.s32.totalorder %v3637_v17, %v7672_v56  ;;  %v4104_v22 = vld [vmem:[%s7424_s6 + $0x2d0] sm:$0xff] }
 0xbec   : > { %3945 = vmatpush.msrb.mxu0 %v3867_v34  ;;  %4693 = vmatpush.msk.msra.mxu1 %vm3658_vm4, %v7683_v27  ;;  %vm3707_vm4 = vcmp.eq.s32.totalorder %v3643_v18, %v7672_v56  ;;  %v4076_v18 = vld [vmem:[%s7424_s6 + $0x2c0] sm:$0xff] }
 0xbed   : > { %4716 = vmatpush.msk.msra.mxu2 %vm3667_vm13, %v7683_v27  ;;  %vm3700_vm13 = vcmp.eq.s32.totalorder %v3636_v6, %v7672_v56 }
 0xbee   : > { %3946 = vmatpush.msrb.mxu0 %v3863_v46  ;;  %4694 = vmatpush.msk.msra.mxu1 %vm3657_vm6, %v7683_v27  ;;  %v7724_v46 = vld [vmem:[#allocation7_spill] sm:$0xff] }
 0xbef   : > { %v3587_v34 = vand.u32 63, %v7724_v46  ;;  %v4103_v46 = vld [vmem:[%s7424_s6 + $0x2c8] sm:$0xff] }
 0xbf0   : > { %3947 = vmatpush.msrb.mxu0 %v3859_v3  ;;  %4695 = vmatpush.msk.msra.mxu1 %vm7188_vm8, %v7683_v27  ;;  %vm7275_vm8 = vcmp.eq.s32.totalorder %v3588_v25, %v7672_v56  ;;  %v3617_v3 = vand.u32 63, %v3553_v43 }
 0xbf1   : > { %vm3651_vm15 = vcmp.eq.s32.totalorder %v3587_v34, %v7672_v56  ;;  %v4846_v34 = vld [vmem:[%s7424_s6 + $0x2e6] ss:$0 sm:$0xff] }
 0xbf2   : > { %3948 = vmatpush.msrb.mxu0 %v3855_v23  ;;  %4696 = vmatpush.msk.msra.mxu1 %vm3655_vm5, %v7683_v27  ;;  %vm3704_vm5 = vcmp.eq.s32.totalorder %v3640_v39, %v7672_v56  ;;  %v3569_v23 = vadd.s32 392, %v7682_v49  ;;  %v4044_v49 = vld [vmem:[%s7424_s6 + $0x290] sm:$0xff]  ;;  %v4845_v39 = vld [vmem:[%s7424_s6 + $0x2e5] ss:$0 sm:$0xff] }
 0xbf4   : > { %3949 = vmatpush.msrb.mxu0 %v3851_v48  ;;  %v3633_v45 = vand.u32 63, %v3569_v23 }
 0xbf6   : > { %3950 = vmatpush.msrb.mxu0 %v3847_v44  ;;  %v3632_v44 = vand.u32 63, %v3568_v31 }
 0xbf8   : > { %3951 = vmatpush.msrb.mxu0 %v3843_v57 }
 0xbf9   : > { %4687 = vmatmul.msk.f32.vlgmr.msrb.gmra.mxu0 %vm3872_vm7, %v6975_v20  ;;  %v3590_v20 = vand.u32 63, %v7674_v4  ;;  %v4074_v4 = vld [vmem:[%s7424_s6 + $0x2b0] sm:$0xff] }
 0xbfa   : > { %4736 = vmatpush.msk.msra.mxu0 %vm3711_vm9, %v7683_v27  ;;  %vm3666_vm9 = vcmp.eq.s32.totalorder %v3602_v38, %v7672_v56 }
 0xbfb   : > { %vm3654_vm6 = vcmp.eq.s32.totalorder %v3590_v20, %v7672_v56  ;;  %4717 = vmatpush.msk.msra.mxu2 %vm3666_vm9, %v7683_v27  ;;  %vm3696_vm9 = vcmp.eq.s32.totalorder %v3632_v44, %v7672_v56 }
 0xbfc   : > { %4737 = vmatpush.msk.msra.mxu0 %vm3710_vm0, %v7683_v27  ;;  %4697 = vmatpush.msk.msra.mxu1 %vm3654_vm6, %v7683_v27  ;;  %vm3703_vm0 = vcmp.eq.s32.totalorder %v3639_v60, %v7672_v56  ;;  %vm7322_vm6 = vcmp.eq.s32.totalorder %v3584_v19, %v7672_v56 }
 0xbfe   : > { %4738 = vmatpush.msk.msra.mxu0 %vm3709_vm14, %v7683_v27  ;;  %4698 = vmatpush.msk.msra.mxu1 %vm7269_vm10, %v7683_v27  ;;  %vm3665_vm14 = vcmp.eq.s32.totalorder %v3601_v21, %v7672_v56  ;;  %vm3664_vm10 = vcmp.eq.s32.totalorder %v3600_v2, %v7672_v56 }
 0xbff   : > { %4718 = vmatpush.msk.msra.mxu2 %vm3665_vm14, %v7683_v27  ;;  %vm4139_vm14 = vcmp.eq.s32.totalorder %v7672_v56, 1 }
 0xc00   : > { %4739 = vmatpush.msk.msra.mxu0 %vm3708_vm11, %v7683_v27  ;;  %4699 = vmatpush.msk.msra.mxu1 %vm7275_vm8, %v7683_v27  ;;  %vm3702_vm11 = vcmp.eq.s32.totalorder %v3638_v30, %v7672_v56  ;;  %vm3681_vm8 = vcmp.eq.s32.totalorder %v3617_v3, %v7672_v56 }
 0xc01   : > { %4719 = vmatpush.msk.msra.mxu2 %vm3664_vm10, %v7683_v27  ;;  %4734 = vmatpush.msk.msra.mxu3 %vm3681_vm8, %v7683_v27 }
 0xc02   : > { %4740 = vmatpush.msk.msra.mxu0 %vm3707_vm4, %v7683_v27  ;;  %4700 = vmatpush.msk.msra.mxu1 %vm3651_vm15, %v7683_v27  ;;  %vm3650_vm4 = vcmp.eq.s32.totalorder %v3586_v51, %v7672_v56  ;;  %vm3697_vm15 = vcmp.eq.s32.totalorder %v3633_v45, %v7672_v56 }
 0xc03   : > { %4094 = vmatpush.msrb.mxu2 %v4076_v18 }
 0xc04   : > { %4741 = vmatpush.msk.msra.mxu0 %vm3706_vm3, %v7683_v27  ;;  %4701 = vmatpush.msk.msra.mxu1 %vm3650_vm4, %v7683_v27  ;;  %vm3649_vm3 = vcmp.eq.s32.totalorder %v3585_v15, %v7672_v56 }
 0xc05   : > { %4095 = vmatpush.msrb.mxu2 %v4075_v41 }
 0xc06   : > { %4742 = vmatpush.msk.msra.mxu0 %vm3705_vm1, %v7683_v27  ;;  %vm3680_vm1 = vcmp.eq.s32.totalorder %v3616_v28, %v7672_v56  ;;  %4702 = vmatpush.msk.msra.mxu1 %vm3649_vm3, %v7683_v27 }
 0xc07   : > { %4735 = vmatpush.msk.msra.mxu3 %vm3680_vm1, %v7683_v27  ;;  %4096 = vmatpush.msrb.mxu2 %v4074_v4 }
 0xc08   : > { %4743 = vmatpush.msk.msra.mxu0 %vm3704_vm5, %v7683_v27  ;;  %4703 = vmatpush.msk.msra.mxu1 %vm7322_vm6, %v7683_v27  ;;  %vm3699_vm5 = vcmp.eq.s32.totalorder %v3635_v12, %v7672_v56 }
 0xc09   : > { %4097 = vmatpush.msrb.mxu2 %v4073_v33  ;;  %4124 = vmatpush.msrb.mxu3 %v4104_v22 }
 0xc0a   : > { %4744 = vmatpush.msk.msra.mxu0 %vm3703_vm0, %v7683_v27  ;;  %4060 = vmatpush.msrb.mxu1 %v4046_v9  ;;  %vm7730_vm0 = vcmask 130048  }
 0xc0b   : > { %4125 = vmatpush.msrb.mxu3 %v4103_v46 }
 0xc0c   : > { %4745 = vmatpush.msk.msra.mxu0 %vm3702_vm11, %v7683_v27  ;;  %4061 = vmatpush.msrb.mxu1 %v4045_v37  ;;  %vm4142_vm11 = vcmask 15360  }
 0xc0e   : > { %4746 = vmatpush.msk.msra.mxu0 %vm3701_vm12, %v7683_v27  ;;  %4062 = vmatpush.msrb.mxu1 %v4044_v49 }
 0xc10   : > { %4747 = vmatpush.msk.msra.mxu0 %vm3700_vm13, %v7683_v27 }
 0xc12   : > { %4748 = vmatpush.msk.msra.mxu0 %vm3699_vm5, %v7683_v27 }
 0xc14   : > { %4749 = vmatpush.msk.msra.mxu0 %vm3698_vm2, %v7683_v27 }
 0xc16   : > { %4750 = vmatpush.msk.msra.mxu0 %vm3697_vm15, %v7683_v27 }
 0xc18   : > { %4751 = vmatpush.msk.msra.mxu0 %vm3696_vm9, %v7683_v27  ;;  %v4043_v27 = vld [vmem:[%s7424_s6 + $0x288] sm:$0xff] }
 0xc19   : > { %4063 = vmatpush.msrb.mxu1 %v4043_v27 }
 0xc1b   : > { %4064 = vmatpush.msrb.mxu1 %v4042_v52 }
 0xc1d   : > { %4065 = vmatpush.msrb.mxu1 %v4041_v42 }
 0xc1f   : > { %4066 = vmatpush.msrb.mxu1 %v4040_v36 }
 0xc21   : > { %4067 = vmatpush.msrb.mxu1 %v4039_v14 }
 0xc30   : > { %v3933_v1 = vpop.f32.mrf.mxu1 }
 0xc31   : > { %4014 = vmatmul.f32.vlgmr.msra.gmra.mxu3 %v3933_v1 }
 0xc36   : > { %v3893_v48 = vpop.f32.mrf.mxu0 }
 0xc37   : > { %3974 = vmatmul.f32.vlgmr.msra.gmra.mxu1 %v3893_v48 }
 0xc46   : > { %v3913_v54 = vpop.f32.mrf.mxu0 }
 0xc47   : > { %3994 = vmatmul.f32.vlgmr.msra.gmra.mxu2 %v3913_v54 }
 0xc76   : > { %v3953_v57 = vpop.f32.mrf.mxu0 }
 0xc77   : > { %4034 = vmatmul.f32.vlgmr.msra.gmra.mxu0 %v3953_v57 }
 0xcb4   : > { %v3975_v20 = vpop.f32.mrf.mxu1  ;;  %v4015_v58 = vpop.f32.mrf.mxu3 }
 0xcb5   : > { %v3976_v0 = vadd.f32 %v4844_v13, %v3975_v20 }
 0xcca   : > { %v3995_v47 = vpop.f32.mrf.mxu2 }
 0xccb   : > { %v3996_v24 = vadd.f32 %v3995_v47, %v3976_v0 }
 0xccd   : > { %v4016_v29 = vadd.f32 %v4015_v58, %v3996_v24 }
 0xcf4   : > { %v4035_v40 = vpop.f32.mrf.mxu0 }
 0xcf5   : > { %v4036_v25 = vadd.f32 %v4035_v40, %v4016_v29 }
 0xcf7   : > { %v4038_v62 = vmax.f32 %v4036_v25, 0.0 }
 0xcf9   : > { %4752 = vmatmul.msk.f32.vlgmr.msrb.gmra.mxu1 %vm3872_vm7, %v4038_v62  ;;  %vm7729_vm7 = vcmask 261120  }
 0xd76   : > { %v4069_v5 = vpop.f32.mrf.mxu1 }
 0xd77   : > { %v4070_v16 = vadd.f32 %v4845_v39, %v4069_v5 }
 0xd79   : > { %v4072_v32 = vmax.f32 %v4070_v16, 0.0 }
 0xd7b   : > { %4753 = vmatmul.msk.f32.vlgmr.msrb.gmra.mxu2 %vm7729_vm7, %v4072_v32 }
 0xdfe   : > { %v4099_v38 = vpop.f32.mrf.mxu2 }
 0xdff   : > { %v4100_v60 = vadd.f32 %v4846_v34, %v4099_v38 }
 0xe01   : > { %v4102_v55 = vmax.f32 %v4100_v60, 0.0 }
 0xe03   : > { %4754 = vmatmul.msk.f32.vlgmr.msrb.gmra.mxu3 %vm7730_vm0, %v4102_v55 }
 0xe86   : > { %v4127_v21 = vpop.f32.mrf.mxu3 }
 0xe87   : > { %v4128_v30 = vadd.f32 %v4847_v35, %v4127_v21 }
 0xe89   : > { %v4131_v10 = vand.u32 2147483647, %v4128_v30  ;;  %v4130_v15 = vmax.f32 %v4128_v30, 0.0 }
 0xe8b   : > { %v4132_v51 = vsub.f32 0.0, %v4131_v10 }
 0xe8d   : > { %v4133_v11 = vmul.f32 1.442695, %v4132_v51 }
 0xe8f   : > { %4848 = vpow2.f32 %v4133_v11 }
 0xe95   : > { %v4849_v43 = vpop.eup %4848 }
 0xe96   : > { %v4135_v26 = vadd.f32 1.0, %v4849_v43 }
 0xe98   : > { %4850 = vlog2.f32 %v4135_v26 }
 0xe9e   : > { %v4851_v63 = vpop.eup %4850 }
 0xe9f   : > { %v4137_v61 = vmul.f32 0.6931472, %v4851_v63 }
 0xea1   : > { %v4138_v50 = vadd.f32 %v4137_v61, %v4130_v15 }
 0xea3   : > { %v4140_v19 = vadd.f32 1e-06, %v4138_v50 }
 0xea5   : > { %v4141_v2 = vsel %vm4139_vm14, %v4140_v19, %v4128_v30 }
 0xea6   : > { %4143 = vst.msk [vmem:[%s415_s16] sm:$0xff] %vm4142_vm11, %v4141_v2 }
 0xea7 PF: > { %s18_s27 = sadd.s32 1, %s4858_s27  }
 0xea8   : > { %p15_p5 = scmp.ge.s32.totalorder %s18_s27, 4  }
 0xeaa   :  { %17 = sbr.rel (!%p15_p5) target bundleno = 1 (0x1), region = 97 }

</bundles_post_ra>
